<compile_context>
chip_gen: v7x
topology: tpu7x:2x2x1
jax: 0.10.0
libtpu: 0.0.40
codegen_flags: <defaults>
</compile_context>

<pallas_src>
import functools

import jax
import jax.numpy as jnp
from jax.experimental import pallas as pl
from jax.experimental.pallas import tpu as pltpu


# ----------------------------------------------------------------------------
# In-kernel helper: depthwise 2-D cross-correlation, zero 'same' padding.
# `pad_ref` is a (B, H+KH-1, W+KW-1) VMEM scratch whose border must already be
# zero; only the interior is rewritten per call, so the zero border is shared
# by every conv inside the fused kernels (and across grid steps).
# ----------------------------------------------------------------------------
def _corr_same(pad_ref, v, k_ref, *, H, W, KH, KW):
    ph, pw = KH // 2, KW // 2
    pad_ref[:, ph:ph + H, pw:pw + W] = v            # in-kernel padding (interior write)
    # Two accumulators -> shorter add dependency chain on the VPU.
    acc0 = jnp.zeros(v.shape, jnp.float32)
    acc1 = jnp.zeros(v.shape, jnp.float32)
    # Small static kernel -> fully unrolled taps (SMEM scalar * vector block).
    # TODO(synk): at larger H/W route the horizontal taps through pltpu.roll
    # (XLU slot) instead of shifted VMEM slices to relieve the vld/VALU slots.
    t = 0
    for dh in range(KH):
        for dw in range(KW):
            tap = pad_ref[:, dh:dh + H, dw:dw + W] * k_ref[dh, dw]
            if t & 1:
                acc1 = acc1 + tap
            else:
                acc0 = acc0 + tap
            t += 1
    return acc0 + acc1


def _init_pad_border(pad_ref):
    """Zero the padded scratch once (grid step 0 only); later convs only ever
    rewrite the interior, so the zero border is preserved."""
    @pl.when(pl.program_id(0) == 0)
    def _():
        pad_ref[...] = jnp.zeros_like(pad_ref)


# ----------------------------------------------------------------------------
# Pallas kernel 1: fused synthetic RGDN model   y1 = corr(x, k), y2 = corr(y1, kT)
# ----------------------------------------------------------------------------
def _model_kernel(k_ref, kT_ref, x_ref, y1_ref, y2_ref, pad_ref, *, H, W, KH, KW):
    _init_pad_border(pad_ref)
    corr = functools.partial(_corr_same, pad_ref, H=H, W=W, KH=KH, KW=KW)
    y1 = corr(x_ref[...], k_ref)
    y1_ref[...] = y1
    y2_ref[...] = corr(y1, kT_ref)


# ----------------------------------------------------------------------------
# Pallas kernel 2: whole AttackerModel make_adv=True forward in one launch.
# Outputs: clean model(x) = (y1c, y2c) and adversarial model(adv) = (y1a, y2a).
# ----------------------------------------------------------------------------
def _attacker_kernel(k_ref, kT_ref, x_ref, adv0_ref,
                     y1c_ref, y2c_ref, y1a_ref, y2a_ref, pad_ref, *,
                     H, W, KH, KW, eps, step_size, iterations, neg_two_over_n):
    _init_pad_border(pad_ref)
    corr = functools.partial(_corr_same, pad_ref, H=H, W=W, KH=KH, KW=KW)

    def model_final(v):                       # last output of the deblur model
        return corr(corr(v, k_ref), kT_ref)

    x = x_ref[...]
    y1c = corr(x, k_ref)                      # clean model(x)
    y2c = corr(y1c, kT_ref)
    y1c_ref[...] = y1c
    y2c_ref[...] = y2c

    target = y2c                              # target = model(orig_input)[-1]
    adv = adv0_ref[...]
    for _ in range(iterations):               # static unroll of the PGD loop
        # Analytic grad of loss = -MSE(model(adv)[-1], target) for the linear,
        # self-adjoint synthetic model:  grad = -(2/n) * A(A(adv) - target).
        resid = model_final(adv) - target
        grad = neg_two_over_n * model_final(resid)
        adv = adv - jnp.sign(grad) * step_size          # LinfStep.step
        adv = x + jnp.clip(adv - x, -eps, eps)          # LinfStep.project

    y1a = corr(adv, k_ref)                    # adversarial model(adv)
    y1a_ref[...] = y1a
    y2a_ref[...] = corr(y1a, kT_ref)


# ----------------------------------------------------------------------------
# Wrappers
# ----------------------------------------------------------------------------
def _plane_blocking(nc):
    """Split N*C planes into >=2 parallel grid blocks when possible so both
    v7x TensorCores get work (and the per-step overhead stays amortized)."""
    if nc >= 2 and nc % 2 == 0:
        return nc // 2, 2
    return nc, 1


def rgdn_model(x, kernel, kernel_T):
    """Synthetic stand-in for the RGDN deblurring net: blur with `kernel`,
    correlate back with `kernel_T`; returns the intermediate-output tuple
    (last element = final estimate).  One fused pallas_call."""
    N, C, H, W = x.shape
    KH, KW = kernel.shape
    assert KH % 2 == 1 and KW % 2 == 1, "odd blur kernel required (adjoint assumption)"
    nc = N * C
    bp, g = _plane_blocking(nc)
    Hp, Wp = H + KH - 1, W + KW - 1
    blk = pl.BlockSpec((bp, H, W), lambda i: (i, 0, 0))
    y1, y2 = pl.pallas_call(
        functools.partial(_model_kernel, H=H, W=W, KH=KH, KW=KW),
        out_shape=(jax.ShapeDtypeStruct((nc, H, W), jnp.float32),
                   jax.ShapeDtypeStruct((nc, H, W), jnp.float32)),
        grid=(g,),
        in_specs=[pl.BlockSpec(memory_space=pltpu.MemorySpace.SMEM),
                  pl.BlockSpec(memory_space=pltpu.MemorySpace.SMEM),
                  blk],
        out_specs=(blk, blk),
        scratch_shapes=[pltpu.VMEM((bp, Hp, Wp), jnp.float32)],
        compiler_params=pltpu.CompilerParams(dimension_semantics=("parallel",)),
    )(kernel.astype(jnp.float32), kernel_T.astype(jnp.float32),
      x.reshape(nc, H, W).astype(jnp.float32))
    return (y1.reshape(N, C, H, W), y2.reshape(N, C, H, W))


def _fused_linf_attack(x, adv0, kernel, kernel_T, *, eps, step_size, iterations):
    N, C, H, W = x.shape
    KH, KW = kernel.shape
    assert KH % 2 == 1 and KW % 2 == 1, "odd blur kernel required (adjoint assumption)"
    nc = N * C
    bp, g = _plane_blocking(nc)
    Hp, Wp = H + KH - 1, W + KW - 1
    n_elem = float(N * C * H * W)         # MSELoss(reduction='mean') denominator
    blk = pl.BlockSpec((bp, H, W), lambda i: (i, 0, 0))
    outs = pl.pallas_call(
        functools.partial(_attacker_kernel, H=H, W=W, KH=KH, KW=KW,
                          eps=float(eps), step_size=float(step_size),
                          iterations=int(iterations),
                          neg_two_over_n=-2.0 / n_elem),
        out_shape=tuple(jax.ShapeDtypeStruct((nc, H, W), jnp.float32)
                        for _ in range(4)),
        grid=(g,),
        in_specs=[pl.BlockSpec(memory_space=pltpu.MemorySpace.SMEM),
                  pl.BlockSpec(memory_space=pltpu.MemorySpace.SMEM),
                  blk, blk],
        out_specs=(blk, blk, blk, blk),
        scratch_shapes=[pltpu.VMEM((bp, Hp, Wp), jnp.float32)],
        compiler_params=pltpu.CompilerParams(dimension_semantics=("parallel",)),
    )(kernel.astype(jnp.float32), kernel_T.astype(jnp.float32),
      x.reshape(nc, H, W).astype(jnp.float32),
      adv0.reshape(nc, H, W).astype(jnp.float32))
    y1c, y2c, y1a, y2a = outs
    rs = lambda a: a.reshape(N, C, H, W)
    return (rs(y1c), rs(y2c)), (rs(y1a), rs(y2a))


def attacker_model_forward(x, kernel, kernel_T, *, make_adv=False, constraint='inf',
                           eps=0.3, step_size=0.1, iterations=2,
                           random_start=False, rng=None):
    """AttackerModel.forward: returns (model(x), model(inp)), where inp is the
    Linf-PGD adversarial example when make_adv=True (note: the reference
    LinfStep.project only clips the eps-ball; no [0,1] clamp, matched here)."""
    if not make_adv:
        out = rgdn_model(x, kernel, kernel_T)
        return (out, out)
    if constraint != 'inf':
        # TODO(synk): L2Step (renorm projection / normalized-gradient step) not implemented.
        raise NotImplementedError("only constraint='inf' (LinfStep) is implemented")
    adv0 = x
    if random_start:
        # LinfStep.random_perturb: x + 2*(rand_like(x)-0.5)*eps
        adv0 = x + 2.0 * (jax.random.uniform(rng, x.shape, jnp.float32) - 0.5) * eps
    return _fused_linf_attack(x, adv0, kernel, kernel_T,
                              eps=eps, step_size=step_size, iterations=iterations)


if __name__ == "__main__":
    N, C, H, W = 2, 4, 16, 16
    KH = KW = 5

    key = jax.random.PRNGKey(0)
    kx, kk, kr = jax.random.split(key, 3)
    x = jax.random.normal(kx, (N, C, H, W), jnp.float32)
    kraw = jax.random.uniform(kk, (KH, KW), jnp.float32)
    kernel = kraw / jnp.sum(kraw)                 # normalized blur kernel
    kernel_T = jnp.flip(kernel, axis=(0, 1))      # spatially flipped kernel

    # make_adv=False path (single fused model pallas_call)
    out_clean = attacker_model_forward(x, kernel, kernel_T, make_adv=False)
    # make_adv=True path (entire Linf PGD attack + both model evals = one pallas_call)
    out_adv = attacker_model_forward(
        x, kernel, kernel_T, make_adv=True, constraint='inf',
        eps=0.3, step_size=0.1, iterations=2, random_start=True, rng=kr)

    jax.block_until_ready((out_clean, out_adv))
    print("KERNEL_OK")
</pallas_src>

<mosaic_0001>
module attributes {stable_mosaic.version = 11 : i64} {
  func.func @_model_kernel(%arg0: i32, %arg1: memref<5x5xf32, #tpu.memory_space<smem>>, %arg2: memref<5x5xf32, #tpu.memory_space<smem>>, %arg3: memref<4x16x16xf32, #tpu.memory_space<vmem>>, %arg4: memref<4x16x16xf32, #tpu.memory_space<vmem>>, %arg5: memref<4x16x16xf32, #tpu.memory_space<vmem>>, %arg6: memref<4x20x20xf32, #tpu.memory_space<vmem>>) attributes {dimension_semantics = [#tpu.dimension_semantics<parallel>], iteration_bounds = array<i64: 2>, scalar_prefetch = 0 : i64, scratch_operands = 1 : i64, tpu.core_type = #tpu.core_type<tc>, window_params = [{transform_indices = @transform_0, window_bounds = array<i64: 5, 5>}, {transform_indices = @transform_1, window_bounds = array<i64: 5, 5>}, {transform_indices = @transform_2, window_bounds = array<i64: 4, 16, 16>}, {transform_indices = @transform_3, window_bounds = array<i64: 4, 16, 16>}, {transform_indices = @transform_4, window_bounds = array<i64: 4, 16, 16>}]} {
    %c0_i32 = arith.constant 0 : i32
    %0 = arith.cmpi eq, %arg0, %c0_i32 : i32
    %1 = arith.extui %0 : i1 to i32
    %c0_i32_0 = arith.constant 0 : i32
    %2 = arith.cmpi ne, %1, %c0_i32_0 : i32
    scf.if %2 {
      %cst_264 = arith.constant 0.000000e+00 : f32
      %264 = vector.broadcast %cst_264 : f32 to vector<4x20x20xf32>
      %c0_265 = arith.constant 0 : index
      %c0_266 = arith.constant 0 : index
      %c0_267 = arith.constant 0 : index
      %265 = vector.load %arg6[%c0_265, %c0_266, %c0_267] : memref<4x20x20xf32, #tpu.memory_space<vmem>>, vector<4x20x20xf32>
      tpu.vector_store %arg6[%c0_265, %c0_266, %c0_267], %264 {strides = array<i32>} : memref<4x20x20xf32, #tpu.memory_space<vmem>>, vector<4x20x20xf32>,
    } else {
    }
    %c0 = arith.constant 0 : index
    %c0_1 = arith.constant 0 : index
    %c0_2 = arith.constant 0 : index
    %3 = vector.load %arg3[%c0, %c0_1, %c0_2] : memref<4x16x16xf32, #tpu.memory_space<vmem>>, vector<4x16x16xf32>
    %c0_3 = arith.constant 0 : index
    %c2 = arith.constant 2 : index
    %c2_4 = arith.constant 2 : index
    %4 = vector.load %arg6[%c0_3, %c2, %c2_4] : memref<4x20x20xf32, #tpu.memory_space<vmem>>, vector<4x16x16xf32>
    tpu.vector_store %arg6[%c0_3, %c2, %c2_4], %3 {strides = array<i32>} : memref<4x20x20xf32, #tpu.memory_space<vmem>>, vector<4x16x16xf32>,
    %cst = arith.constant 0.000000e+00 : f32
    %5 = vector.broadcast %cst : f32 to vector<4x16x16xf32>
    %cst_5 = arith.constant 0.000000e+00 : f32
    %6 = vector.broadcast %cst_5 : f32 to vector<4x16x16xf32>
    %c0_6 = arith.constant 0 : index
    %c0_7 = arith.constant 0 : index
    %c0_8 = arith.constant 0 : index
    %7 = vector.load %arg6[%c0_6, %c0_7, %c0_8] : memref<4x20x20xf32, #tpu.memory_space<vmem>>, vector<4x16x16xf32>
    %c0_9 = arith.constant 0 : index
    %c0_10 = arith.constant 0 : index
    %8 = memref.load %arg1[%c0_9, %c0_10] : memref<5x5xf32, #tpu.memory_space<smem>>
    %9 = vector.broadcast %8 : f32 to vector<4x16x16xf32>
    %10 = arith.mulf %7, %9 : vector<4x16x16xf32>
    %11 = arith.addf %5, %10 : vector<4x16x16xf32>
    %c0_11 = arith.constant 0 : index
    %c0_12 = arith.constant 0 : index
    %c1 = arith.constant 1 : index
    %12 = vector.load %arg6[%c0_11, %c0_12, %c1] : memref<4x20x20xf32, #tpu.memory_space<vmem>>, vector<4x16x16xf32>
    %c0_13 = arith.constant 0 : index
    %c1_14 = arith.constant 1 : index
    %13 = memref.load %arg1[%c0_13, %c1_14] : memref<5x5xf32, #tpu.memory_space<smem>>
    %14 = vector.broadcast %13 : f32 to vector<4x16x16xf32>
    %15 = arith.mulf %12, %14 : vector<4x16x16xf32>
    %16 = arith.addf %6, %15 : vector<4x16x16xf32>
    %c0_15 = arith.constant 0 : index
    %c0_16 = arith.constant 0 : index
    %c2_17 = arith.constant 2 : index
    %17 = vector.load %arg6[%c0_15, %c0_16, %c2_17] : memref<4x20x20xf32, #tpu.memory_space<vmem>>, vector<4x16x16xf32>
    %c0_18 = arith.constant 0 : index
    %c2_19 = arith.constant 2 : index
    %18 = memref.load %arg1[%c0_18, %c2_19] : memref<5x5xf32, #tpu.memory_space<smem>>
    %19 = vector.broadcast %18 : f32 to vector<4x16x16xf32>
    %20 = arith.mulf %17, %19 : vector<4x16x16xf32>
    %21 = arith.addf %11, %20 : vector<4x16x16xf32>
    %c0_20 = arith.constant 0 : index
    %c0_21 = arith.constant 0 : index
    %c3 = arith.constant 3 : index
    %22 = vector.load %arg6[%c0_20, %c0_21, %c3] : memref<4x20x20xf32, #tpu.memory_space<vmem>>, vector<4x16x16xf32>
    %c0_22 = arith.constant 0 : index
    %c3_23 = arith.constant 3 : index
    %23 = memref.load %arg1[%c0_22, %c3_23] : memref<5x5xf32, #tpu.memory_space<smem>>
    %24 = vector.broadcast %23 : f32 to vector<4x16x16xf32>
    %25 = arith.mulf %22, %24 : vector<4x16x16xf32>
    %26 = arith.addf %16, %25 : vector<4x16x16xf32>
    %c0_24 = arith.constant 0 : index
    %c0_25 = arith.constant 0 : index
    %c4 = arith.constant 4 : index
    %27 = vector.load %arg6[%c0_24, %c0_25, %c4] : memref<4x20x20xf32, #tpu.memory_space<vmem>>, vector<4x16x16xf32>
    %c0_26 = arith.constant 0 : index
    %c4_27 = arith.constant 4 : index
    %28 = memref.load %arg1[%c0_26, %c4_27] : memref<5x5xf32, #tpu.memory_space<smem>>
    %29 = vector.broadcast %28 : f32 to vector<4x16x16xf32>
    %30 = arith.mulf %27, %29 : vector<4x16x16xf32>
    %31 = arith.addf %21, %30 : vector<4x16x16xf32>
    %c0_28 = arith.constant 0 : index
    %c1_29 = arith.constant 1 : index
    %c0_30 = arith.constant 0 : index
    %32 = vector.load %arg6[%c0_28, %c1_29, %c0_30] : memref<4x20x20xf32, #tpu.memory_space<vmem>>, vector<4x16x16xf32>
    %c1_31 = arith.constant 1 : index
    %c0_32 = arith.constant 0 : index
    %33 = memref.load %arg1[%c1_31, %c0_32] : memref<5x5xf32, #tpu.memory_space<smem>>
    %34 = vector.broadcast %33 : f32 to vector<4x16x16xf32>
    %35 = arith.mulf %32, %34 : vector<4x16x16xf32>
    %36 = arith.addf %26, %35 : vector<4x16x16xf32>
    %c0_33 = arith.constant 0 : index
    %c1_34 = arith.constant 1 : index
    %c1_35 = arith.constant 1 : index
    %37 = vector.load %arg6[%c0_33, %c1_34, %c1_35] : memref<4x20x20xf32, #tpu.memory_space<vmem>>, vector<4x16x16xf32>
    %c1_36 = arith.constant 1 : index
    %c1_37 = arith.constant 1 : index
    %38 = memref.load %arg1[%c1_36, %c1_37] : memref<5x5xf32, #tpu.memory_space<smem>>
    %39 = vector.broadcast %38 : f32 to vector<4x16x16xf32>
    %40 = arith.mulf %37, %39 : vector<4x16x16xf32>
    %41 = arith.addf %31, %40 : vector<4x16x16xf32>
    %c0_38 = arith.constant 0 : index
    %c1_39 = arith.constant 1 : index
    %c2_40 = arith.constant 2 : index
    %42 = vector.load %arg6[%c0_38, %c1_39, %c2_40] : memref<4x20x20xf32, #tpu.memory_space<vmem>>, vector<4x16x16xf32>
    %c1_41 = arith.constant 1 : index
    %c2_42 = arith.constant 2 : index
    %43 = memref.load %arg1[%c1_41, %c2_42] : memref<5x5xf32, #tpu.memory_space<smem>>
    %44 = vector.broadcast %43 : f32 to vector<4x16x16xf32>
    %45 = arith.mulf %42, %44 : vector<4x16x16xf32>
    %46 = arith.addf %36, %45 : vector<4x16x16xf32>
    %c0_43 = arith.constant 0 : index
    %c1_44 = arith.constant 1 : index
    %c3_45 = arith.constant 3 : index
    %47 = vector.load %arg6[%c0_43, %c1_44, %c3_45] : memref<4x20x20xf32, #tpu.memory_space<vmem>>, vector<4x16x16xf32>
    %c1_46 = arith.constant 1 : index
    %c3_47 = arith.constant 3 : index
    %48 = memref.load %arg1[%c1_46, %c3_47] : memref<5x5xf32, #tpu.memory_space<smem>>
    %49 = vector.broadcast %48 : f32 to vector<4x16x16xf32>
    %50 = arith.mulf %47, %49 : vector<4x16x16xf32>
    %51 = arith.addf %41, %50 : vector<4x16x16xf32>
    %c0_48 = arith.constant 0 : index
    %c1_49 = arith.constant 1 : index
    %c4_50 = arith.constant 4 : index
    %52 = vector.load %arg6[%c0_48, %c1_49, %c4_50] : memref<4x20x20xf32, #tpu.memory_space<vmem>>, vector<4x16x16xf32>
    %c1_51 = arith.constant 1 : index
    %c4_52 = arith.constant 4 : index
    %53 = memref.load %arg1[%c1_51, %c4_52] : memref<5x5xf32, #tpu.memory_space<smem>>
    %54 = vector.broadcast %53 : f32 to vector<4x16x16xf32>
    %55 = arith.mulf %52, %54 : vector<4x16x16xf32>
    %56 = arith.addf %46, %55 : vector<4x16x16xf32>
    %c0_53 = arith.constant 0 : index
    %c2_54 = arith.constant 2 : index
    %c0_55 = arith.constant 0 : index
    %57 = vector.load %arg6[%c0_53, %c2_54, %c0_55] : memref<4x20x20xf32, #tpu.memory_space<vmem>>, vector<4x16x16xf32>
    %c2_56 = arith.constant 2 : index
    %c0_57 = arith.constant 0 : index
    %58 = memref.load %arg1[%c2_56, %c0_57] : memref<5x5xf32, #tpu.memory_space<smem>>
    %59 = vector.broadcast %58 : f32 to vector<4x16x16xf32>
    %60 = arith.mulf %57, %59 : vector<4x16x16xf32>
    %61 = arith.addf %51, %60 : vector<4x16x16xf32>
    %c0_58 = arith.constant 0 : index
    %c2_59 = arith.constant 2 : index
    %c1_60 = arith.constant 1 : index
    %62 = vector.load %arg6[%c0_58, %c2_59, %c1_60] : memref<4x20x20xf32, #tpu.memory_space<vmem>>, vector<4x16x16xf32>
    %c2_61 = arith.constant 2 : index
    %c1_62 = arith.constant 1 : index
    %63 = memref.load %arg1[%c2_61, %c1_62] : memref<5x5xf32, #tpu.memory_space<smem>>
    %64 = vector.broadcast %63 : f32 to vector<4x16x16xf32>
    %65 = arith.mulf %62, %64 : vector<4x16x16xf32>
    %66 = arith.addf %56, %65 : vector<4x16x16xf32>
    %c0_63 = arith.constant 0 : index
    %c2_64 = arith.constant 2 : index
    %c2_65 = arith.constant 2 : index
    %67 = vector.load %arg6[%c0_63, %c2_64, %c2_65] : memref<4x20x20xf32, #tpu.memory_space<vmem>>, vector<4x16x16xf32>
    %c2_66 = arith.constant 2 : index
    %c2_67 = arith.constant 2 : index
    %68 = memref.load %arg1[%c2_66, %c2_67] : memref<5x5xf32, #tpu.memory_space<smem>>
    %69 = vector.broadcast %68 : f32 to vector<4x16x16xf32>
    %70 = arith.mulf %67, %69 : vector<4x16x16xf32>
    %71 = arith.addf %61, %70 : vector<4x16x16xf32>
    %c0_68 = arith.constant 0 : index
    %c2_69 = arith.constant 2 : index
    %c3_70 = arith.constant 3 : index
    %72 = vector.load %arg6[%c0_68, %c2_69, %c3_70] : memref<4x20x20xf32, #tpu.memory_space<vmem>>, vector<4x16x16xf32>
    %c2_71 = arith.constant 2 : index
    %c3_72 = arith.constant 3 : index
    %73 = memref.load %arg1[%c2_71, %c3_72] : memref<5x5xf32, #tpu.memory_space<smem>>
    %74 = vector.broadcast %73 : f32 to vector<4x16x16xf32>
    %75 = arith.mulf %72, %74 : vector<4x16x16xf32>
    %76 = arith.addf %66, %75 : vector<4x16x16xf32>
    %c0_73 = arith.constant 0 : index
    %c2_74 = arith.constant 2 : index
    %c4_75 = arith.constant 4 : index
    %77 = vector.load %arg6[%c0_73, %c2_74, %c4_75] : memref<4x20x20xf32, #tpu.memory_space<vmem>>, vector<4x16x16xf32>
    %c2_76 = arith.constant 2 : index
    %c4_77 = arith.constant 4 : index
    %78 = memref.load %arg1[%c2_76, %c4_77] : memref<5x5xf32, #tpu.memory_space<smem>>
    %79 = vector.broadcast %78 : f32 to vector<4x16x16xf32>
    %80 = arith.mulf %77, %79 : vector<4x16x16xf32>
    %81 = arith.addf %71, %80 : vector<4x16x16xf32>
    %c0_78 = arith.constant 0 : index
    %c3_79 = arith.constant 3 : index
    %c0_80 = arith.constant 0 : index
    %82 = vector.load %arg6[%c0_78, %c3_79, %c0_80] : memref<4x20x20xf32, #tpu.memory_space<vmem>>, vector<4x16x16xf32>
    %c3_81 = arith.constant 3 : index
    %c0_82 = arith.constant 0 : index
    %83 = memref.load %arg1[%c3_81, %c0_82] : memref<5x5xf32, #tpu.memory_space<smem>>
    %84 = vector.broadcast %83 : f32 to vector<4x16x16xf32>
    %85 = arith.mulf %82, %84 : vector<4x16x16xf32>
    %86 = arith.addf %76, %85 : vector<4x16x16xf32>
    %c0_83 = arith.constant 0 : index
    %c3_84 = arith.constant 3 : index
    %c1_85 = arith.constant 1 : index
    %87 = vector.load %arg6[%c0_83, %c3_84, %c1_85] : memref<4x20x20xf32, #tpu.memory_space<vmem>>, vector<4x16x16xf32>
    %c3_86 = arith.constant 3 : index
    %c1_87 = arith.constant 1 : index
    %88 = memref.load %arg1[%c3_86, %c1_87] : memref<5x5xf32, #tpu.memory_space<smem>>
    %89 = vector.broadcast %88 : f32 to vector<4x16x16xf32>
    %90 = arith.mulf %87, %89 : vector<4x16x16xf32>
    %91 = arith.addf %81, %90 : vector<4x16x16xf32>
    %c0_88 = arith.constant 0 : index
    %c3_89 = arith.constant 3 : index
    %c2_90 = arith.constant 2 : index
    %92 = vector.load %arg6[%c0_88, %c3_89, %c2_90] : memref<4x20x20xf32, #tpu.memory_space<vmem>>, vector<4x16x16xf32>
    %c3_91 = arith.constant 3 : index
    %c2_92 = arith.constant 2 : index
    %93 = memref.load %arg1[%c3_91, %c2_92] : memref<5x5xf32, #tpu.memory_space<smem>>
    %94 = vector.broadcast %93 : f32 to vector<4x16x16xf32>
    %95 = arith.mulf %92, %94 : vector<4x16x16xf32>
    %96 = arith.addf %86, %95 : vector<4x16x16xf32>
    %c0_93 = arith.constant 0 : index
    %c3_94 = arith.constant 3 : index
    %c3_95 = arith.constant 3 : index
    %97 = vector.load %arg6[%c0_93, %c3_94, %c3_95] : memref<4x20x20xf32, #tpu.memory_space<vmem>>, vector<4x16x16xf32>
    %c3_96 = arith.constant 3 : index
    %c3_97 = arith.constant 3 : index
    %98 = memref.load %arg1[%c3_96, %c3_97] : memref<5x5xf32, #tpu.memory_space<smem>>
    %99 = vector.broadcast %98 : f32 to vector<4x16x16xf32>
    %100 = arith.mulf %97, %99 : vector<4x16x16xf32>
    %101 = arith.addf %91, %100 : vector<4x16x16xf32>
    %c0_98 = arith.constant 0 : index
    %c3_99 = arith.constant 3 : index
    %c4_100 = arith.constant 4 : index
    %102 = vector.load %arg6[%c0_98, %c3_99, %c4_100] : memref<4x20x20xf32, #tpu.memory_space<vmem>>, vector<4x16x16xf32>
    %c3_101 = arith.constant 3 : index
    %c4_102 = arith.constant 4 : index
    %103 = memref.load %arg1[%c3_101, %c4_102] : memref<5x5xf32, #tpu.memory_space<smem>>
    %104 = vector.broadcast %103 : f32 to vector<4x16x16xf32>
    %105 = arith.mulf %102, %104 : vector<4x16x16xf32>
    %106 = arith.addf %96, %105 : vector<4x16x16xf32>
    %c0_103 = arith.constant 0 : index
    %c4_104 = arith.constant 4 : index
    %c0_105 = arith.constant 0 : index
    %107 = vector.load %arg6[%c0_103, %c4_104, %c0_105] : memref<4x20x20xf32, #tpu.memory_space<vmem>>, vector<4x16x16xf32>
    %c4_106 = arith.constant 4 : index
    %c0_107 = arith.constant 0 : index
    %108 = memref.load %arg1[%c4_106, %c0_107] : memref<5x5xf32, #tpu.memory_space<smem>>
    %109 = vector.broadcast %108 : f32 to vector<4x16x16xf32>
    %110 = arith.mulf %107, %109 : vector<4x16x16xf32>
    %111 = arith.addf %101, %110 : vector<4x16x16xf32>
    %c0_108 = arith.constant 0 : index
    %c4_109 = arith.constant 4 : index
    %c1_110 = arith.constant 1 : index
    %112 = vector.load %arg6[%c0_108, %c4_109, %c1_110] : memref<4x20x20xf32, #tpu.memory_space<vmem>>, vector<4x16x16xf32>
    %c4_111 = arith.constant 4 : index
    %c1_112 = arith.constant 1 : index
    %113 = memref.load %arg1[%c4_111, %c1_112] : memref<5x5xf32, #tpu.memory_space<smem>>
    %114 = vector.broadcast %113 : f32 to vector<4x16x16xf32>
    %115 = arith.mulf %112, %114 : vector<4x16x16xf32>
    %116 = arith.addf %106, %115 : vector<4x16x16xf32>
    %c0_113 = arith.constant 0 : index
    %c4_114 = arith.constant 4 : index
    %c2_115 = arith.constant 2 : index
    %117 = vector.load %arg6[%c0_113, %c4_114, %c2_115] : memref<4x20x20xf32, #tpu.memory_space<vmem>>, vector<4x16x16xf32>
    %c4_116 = arith.constant 4 : index
    %c2_117 = arith.constant 2 : index
    %118 = memref.load %arg1[%c4_116, %c2_117] : memref<5x5xf32, #tpu.memory_space<smem>>
    %119 = vector.broadcast %118 : f32 to vector<4x16x16xf32>
    %120 = arith.mulf %117, %119 : vector<4x16x16xf32>
    %121 = arith.addf %111, %120 : vector<4x16x16xf32>
    %c0_118 = arith.constant 0 : index
    %c4_119 = arith.constant 4 : index
    %c3_120 = arith.constant 3 : index
    %122 = vector.load %arg6[%c0_118, %c4_119, %c3_120] : memref<4x20x20xf32, #tpu.memory_space<vmem>>, vector<4x16x16xf32>
    %c4_121 = arith.constant 4 : index
    %c3_122 = arith.constant 3 : index
    %123 = memref.load %arg1[%c4_121, %c3_122] : memref<5x5xf32, #tpu.memory_space<smem>>
    %124 = vector.broadcast %123 : f32 to vector<4x16x16xf32>
    %125 = arith.mulf %122, %124 : vector<4x16x16xf32>
    %126 = arith.addf %116, %125 : vector<4x16x16xf32>
    %c0_123 = arith.constant 0 : index
    %c4_124 = arith.constant 4 : index
    %c4_125 = arith.constant 4 : index
    %127 = vector.load %arg6[%c0_123, %c4_124, %c4_125] : memref<4x20x20xf32, #tpu.memory_space<vmem>>, vector<4x16x16xf32>
    %c4_126 = arith.constant 4 : index
    %c4_127 = arith.constant 4 : index
    %128 = memref.load %arg1[%c4_126, %c4_127] : memref<5x5xf32, #tpu.memory_space<smem>>
    %129 = vector.broadcast %128 : f32 to vector<4x16x16xf32>
    %130 = arith.mulf %127, %129 : vector<4x16x16xf32>
    %131 = arith.addf %121, %130 : vector<4x16x16xf32>
    %132 = arith.addf %131, %126 : vector<4x16x16xf32>
    %c0_128 = arith.constant 0 : index
    %c0_129 = arith.constant 0 : index
    %c0_130 = arith.constant 0 : index
    %133 = vector.load %arg4[%c0_128, %c0_129, %c0_130] : memref<4x16x16xf32, #tpu.memory_space<vmem>>, vector<4x16x16xf32>
    tpu.vector_store %arg4[%c0_128, %c0_129, %c0_130], %132 {strides = array<i32>} : memref<4x16x16xf32, #tpu.memory_space<vmem>>, vector<4x16x16xf32>,
    %c0_131 = arith.constant 0 : index
    %c2_132 = arith.constant 2 : index
    %c2_133 = arith.constant 2 : index
    %134 = vector.load %arg6[%c0_131, %c2_132, %c2_133] : memref<4x20x20xf32, #tpu.memory_space<vmem>>, vector<4x16x16xf32>
    tpu.vector_store %arg6[%c0_131, %c2_132, %c2_133], %132 {strides = array<i32>} : memref<4x20x20xf32, #tpu.memory_space<vmem>>, vector<4x16x16xf32>,
    %cst_134 = arith.constant 0.000000e+00 : f32
    %135 = vector.broadcast %cst_134 : f32 to vector<4x16x16xf32>
    %cst_135 = arith.constant 0.000000e+00 : f32
    %136 = vector.broadcast %cst_135 : f32 to vector<4x16x16xf32>
    %c0_136 = arith.constant 0 : index
    %c0_137 = arith.constant 0 : index
    %c0_138 = arith.constant 0 : index
    %137 = vector.load %arg6[%c0_136, %c0_137, %c0_138] : memref<4x20x20xf32, #tpu.memory_space<vmem>>, vector<4x16x16xf32>
    %c0_139 = arith.constant 0 : index
    %c0_140 = arith.constant 0 : index
    %138 = memref.load %arg2[%c0_139, %c0_140] : memref<5x5xf32, #tpu.memory_space<smem>>
    %139 = vector.broadcast %138 : f32 to vector<4x16x16xf32>
    %140 = arith.mulf %137, %139 : vector<4x16x16xf32>
    %141 = arith.addf %135, %140 : vector<4x16x16xf32>
    %c0_141 = arith.constant 0 : index
    %c0_142 = arith.constant 0 : index
    %c1_143 = arith.constant 1 : index
    %142 = vector.load %arg6[%c0_141, %c0_142, %c1_143] : memref<4x20x20xf32, #tpu.memory_space<vmem>>, vector<4x16x16xf32>
    %c0_144 = arith.constant 0 : index
    %c1_145 = arith.constant 1 : index
    %143 = memref.load %arg2[%c0_144, %c1_145] : memref<5x5xf32, #tpu.memory_space<smem>>
    %144 = vector.broadcast %143 : f32 to vector<4x16x16xf32>
    %145 = arith.mulf %142, %144 : vector<4x16x16xf32>
    %146 = arith.addf %136, %145 : vector<4x16x16xf32>
    %c0_146 = arith.constant 0 : index
    %c0_147 = arith.constant 0 : index
    %c2_148 = arith.constant 2 : index
    %147 = vector.load %arg6[%c0_146, %c0_147, %c2_148] : memref<4x20x20xf32, #tpu.memory_space<vmem>>, vector<4x16x16xf32>
    %c0_149 = arith.constant 0 : index
    %c2_150 = arith.constant 2 : index
    %148 = memref.load %arg2[%c0_149, %c2_150] : memref<5x5xf32, #tpu.memory_space<smem>>
    %149 = vector.broadcast %148 : f32 to vector<4x16x16xf32>
    %150 = arith.mulf %147, %149 : vector<4x16x16xf32>
    %151 = arith.addf %141, %150 : vector<4x16x16xf32>
    %c0_151 = arith.constant 0 : index
    %c0_152 = arith.constant 0 : index
    %c3_153 = arith.constant 3 : index
    %152 = vector.load %arg6[%c0_151, %c0_152, %c3_153] : memref<4x20x20xf32, #tpu.memory_space<vmem>>, vector<4x16x16xf32>
    %c0_154 = arith.constant 0 : index
    %c3_155 = arith.constant 3 : index
    %153 = memref.load %arg2[%c0_154, %c3_155] : memref<5x5xf32, #tpu.memory_space<smem>>
    %154 = vector.broadcast %153 : f32 to vector<4x16x16xf32>
    %155 = arith.mulf %152, %154 : vector<4x16x16xf32>
    %156 = arith.addf %146, %155 : vector<4x16x16xf32>
    %c0_156 = arith.constant 0 : index
    %c0_157 = arith.constant 0 : index
    %c4_158 = arith.constant 4 : index
    %157 = vector.load %arg6[%c0_156, %c0_157, %c4_158] : memref<4x20x20xf32, #tpu.memory_space<vmem>>, vector<4x16x16xf32>
    %c0_159 = arith.constant 0 : index
    %c4_160 = arith.constant 4 : index
    %158 = memref.load %arg2[%c0_159, %c4_160] : memref<5x5xf32, #tpu.memory_space<smem>>
    %159 = vector.broadcast %158 : f32 to vector<4x16x16xf32>
    %160 = arith.mulf %157, %159 : vector<4x16x16xf32>
    %161 = arith.addf %151, %160 : vector<4x16x16xf32>
    %c0_161 = arith.constant 0 : index
    %c1_162 = arith.constant 1 : index
    %c0_163 = arith.constant 0 : index
    %162 = vector.load %arg6[%c0_161, %c1_162, %c0_163] : memref<4x20x20xf32, #tpu.memory_space<vmem>>, vector<4x16x16xf32>
    %c1_164 = arith.constant 1 : index
    %c0_165 = arith.constant 0 : index
    %163 = memref.load %arg2[%c1_164, %c0_165] : memref<5x5xf32, #tpu.memory_space<smem>>
    %164 = vector.broadcast %163 : f32 to vector<4x16x16xf32>
    %165 = arith.mulf %162, %164 : vector<4x16x16xf32>
    %166 = arith.addf %156, %165 : vector<4x16x16xf32>
    %c0_166 = arith.constant 0 : index
    %c1_167 = arith.constant 1 : index
    %c1_168 = arith.constant 1 : index
    %167 = vector.load %arg6[%c0_166, %c1_167, %c1_168] : memref<4x20x20xf32, #tpu.memory_space<vmem>>, vector<4x16x16xf32>
    %c1_169 = arith.constant 1 : index
    %c1_170 = arith.constant 1 : index
    %168 = memref.load %arg2[%c1_169, %c1_170] : memref<5x5xf32, #tpu.memory_space<smem>>
    %169 = vector.broadcast %168 : f32 to vector<4x16x16xf32>
    %170 = arith.mulf %167, %169 : vector<4x16x16xf32>
    %171 = arith.addf %161, %170 : vector<4x16x16xf32>
    %c0_171 = arith.constant 0 : index
    %c1_172 = arith.constant 1 : index
    %c2_173 = arith.constant 2 : index
    %172 = vector.load %arg6[%c0_171, %c1_172, %c2_173] : memref<4x20x20xf32, #tpu.memory_space<vmem>>, vector<4x16x16xf32>
    %c1_174 = arith.constant 1 : index
    %c2_175 = arith.constant 2 : index
    %173 = memref.load %arg2[%c1_174, %c2_175] : memref<5x5xf32, #tpu.memory_space<smem>>
    %174 = vector.broadcast %173 : f32 to vector<4x16x16xf32>
    %175 = arith.mulf %172, %174 : vector<4x16x16xf32>
    %176 = arith.addf %166, %175 : vector<4x16x16xf32>
    %c0_176 = arith.constant 0 : index
    %c1_177 = arith.constant 1 : index
    %c3_178 = arith.constant 3 : index
    %177 = vector.load %arg6[%c0_176, %c1_177, %c3_178] : memref<4x20x20xf32, #tpu.memory_space<vmem>>, vector<4x16x16xf32>
    %c1_179 = arith.constant 1 : index
    %c3_180 = arith.constant 3 : index
    %178 = memref.load %arg2[%c1_179, %c3_180] : memref<5x5xf32, #tpu.memory_space<smem>>
    %179 = vector.broadcast %178 : f32 to vector<4x16x16xf32>
    %180 = arith.mulf %177, %179 : vector<4x16x16xf32>
    %181 = arith.addf %171, %180 : vector<4x16x16xf32>
    %c0_181 = arith.constant 0 : index
    %c1_182 = arith.constant 1 : index
    %c4_183 = arith.constant 4 : index
    %182 = vector.load %arg6[%c0_181, %c1_182, %c4_183] : memref<4x20x20xf32, #tpu.memory_space<vmem>>, vector<4x16x16xf32>
    %c1_184 = arith.constant 1 : index
    %c4_185 = arith.constant 4 : index
    %183 = memref.load %arg2[%c1_184, %c4_185] : memref<5x5xf32, #tpu.memory_space<smem>>
    %184 = vector.broadcast %183 : f32 to vector<4x16x16xf32>
    %185 = arith.mulf %182, %184 : vector<4x16x16xf32>
    %186 = arith.addf %176, %185 : vector<4x16x16xf32>
    %c0_186 = arith.constant 0 : index
    %c2_187 = arith.constant 2 : index
    %c0_188 = arith.constant 0 : index
    %187 = vector.load %arg6[%c0_186, %c2_187, %c0_188] : memref<4x20x20xf32, #tpu.memory_space<vmem>>, vector<4x16x16xf32>
    %c2_189 = arith.constant 2 : index
    %c0_190 = arith.constant 0 : index
    %188 = memref.load %arg2[%c2_189, %c0_190] : memref<5x5xf32, #tpu.memory_space<smem>>
    %189 = vector.broadcast %188 : f32 to vector<4x16x16xf32>
    %190 = arith.mulf %187, %189 : vector<4x16x16xf32>
    %191 = arith.addf %181, %190 : vector<4x16x16xf32>
    %c0_191 = arith.constant 0 : index
    %c2_192 = arith.constant 2 : index
    %c1_193 = arith.constant 1 : index
    %192 = vector.load %arg6[%c0_191, %c2_192, %c1_193] : memref<4x20x20xf32, #tpu.memory_space<vmem>>, vector<4x16x16xf32>
    %c2_194 = arith.constant 2 : index
    %c1_195 = arith.constant 1 : index
    %193 = memref.load %arg2[%c2_194, %c1_195] : memref<5x5xf32, #tpu.memory_space<smem>>
    %194 = vector.broadcast %193 : f32 to vector<4x16x16xf32>
    %195 = arith.mulf %192, %194 : vector<4x16x16xf32>
    %196 = arith.addf %186, %195 : vector<4x16x16xf32>
    %c0_196 = arith.constant 0 : index
    %c2_197 = arith.constant 2 : index
    %c2_198 = arith.constant 2 : index
    %197 = vector.load %arg6[%c0_196, %c2_197, %c2_198] : memref<4x20x20xf32, #tpu.memory_space<vmem>>, vector<4x16x16xf32>
    %c2_199 = arith.constant 2 : index
    %c2_200 = arith.constant 2 : index
    %198 = memref.load %arg2[%c2_199, %c2_200] : memref<5x5xf32, #tpu.memory_space<smem>>
    %199 = vector.broadcast %198 : f32 to vector<4x16x16xf32>
    %200 = arith.mulf %197, %199 : vector<4x16x16xf32>
    %201 = arith.addf %191, %200 : vector<4x16x16xf32>
    %c0_201 = arith.constant 0 : index
    %c2_202 = arith.constant 2 : index
    %c3_203 = arith.constant 3 : index
    %202 = vector.load %arg6[%c0_201, %c2_202, %c3_203] : memref<4x20x20xf32, #tpu.memory_space<vmem>>, vector<4x16x16xf32>
    %c2_204 = arith.constant 2 : index
    %c3_205 = arith.constant 3 : index
    %203 = memref.load %arg2[%c2_204, %c3_205] : memref<5x5xf32, #tpu.memory_space<smem>>
    %204 = vector.broadcast %203 : f32 to vector<4x16x16xf32>
    %205 = arith.mulf %202, %204 : vector<4x16x16xf32>
    %206 = arith.addf %196, %205 : vector<4x16x16xf32>
    %c0_206 = arith.constant 0 : index
    %c2_207 = arith.constant 2 : index
    %c4_208 = arith.constant 4 : index
    %207 = vector.load %arg6[%c0_206, %c2_207, %c4_208] : memref<4x20x20xf32, #tpu.memory_space<vmem>>, vector<4x16x16xf32>
    %c2_209 = arith.constant 2 : index
    %c4_210 = arith.constant 4 : index
    %208 = memref.load %arg2[%c2_209, %c4_210] : memref<5x5xf32, #tpu.memory_space<smem>>
    %209 = vector.broadcast %208 : f32 to vector<4x16x16xf32>
    %210 = arith.mulf %207, %209 : vector<4x16x16xf32>
    %211 = arith.addf %201, %210 : vector<4x16x16xf32>
    %c0_211 = arith.constant 0 : index
    %c3_212 = arith.constant 3 : index
    %c0_213 = arith.constant 0 : index
    %212 = vector.load %arg6[%c0_211, %c3_212, %c0_213] : memref<4x20x20xf32, #tpu.memory_space<vmem>>, vector<4x16x16xf32>
    %c3_214 = arith.constant 3 : index
    %c0_215 = arith.constant 0 : index
    %213 = memref.load %arg2[%c3_214, %c0_215] : memref<5x5xf32, #tpu.memory_space<smem>>
    %214 = vector.broadcast %213 : f32 to vector<4x16x16xf32>
    %215 = arith.mulf %212, %214 : vector<4x16x16xf32>
    %216 = arith.addf %206, %215 : vector<4x16x16xf32>
    %c0_216 = arith.constant 0 : index
    %c3_217 = arith.constant 3 : index
    %c1_218 = arith.constant 1 : index
    %217 = vector.load %arg6[%c0_216, %c3_217, %c1_218] : memref<4x20x20xf32, #tpu.memory_space<vmem>>, vector<4x16x16xf32>
    %c3_219 = arith.constant 3 : index
    %c1_220 = arith.constant 1 : index
    %218 = memref.load %arg2[%c3_219, %c1_220] : memref<5x5xf32, #tpu.memory_space<smem>>
    %219 = vector.broadcast %218 : f32 to vector<4x16x16xf32>
    %220 = arith.mulf %217, %219 : vector<4x16x16xf32>
    %221 = arith.addf %211, %220 : vector<4x16x16xf32>
    %c0_221 = arith.constant 0 : index
    %c3_222 = arith.constant 3 : index
    %c2_223 = arith.constant 2 : index
    %222 = vector.load %arg6[%c0_221, %c3_222, %c2_223] : memref<4x20x20xf32, #tpu.memory_space<vmem>>, vector<4x16x16xf32>
    %c3_224 = arith.constant 3 : index
    %c2_225 = arith.constant 2 : index
    %223 = memref.load %arg2[%c3_224, %c2_225] : memref<5x5xf32, #tpu.memory_space<smem>>
    %224 = vector.broadcast %223 : f32 to vector<4x16x16xf32>
    %225 = arith.mulf %222, %224 : vector<4x16x16xf32>
    %226 = arith.addf %216, %225 : vector<4x16x16xf32>
    %c0_226 = arith.constant 0 : index
    %c3_227 = arith.constant 3 : index
    %c3_228 = arith.constant 3 : index
    %227 = vector.load %arg6[%c0_226, %c3_227, %c3_228] : memref<4x20x20xf32, #tpu.memory_space<vmem>>, vector<4x16x16xf32>
    %c3_229 = arith.constant 3 : index
    %c3_230 = arith.constant 3 : index
    %228 = memref.load %arg2[%c3_229, %c3_230] : memref<5x5xf32, #tpu.memory_space<smem>>
    %229 = vector.broadcast %228 : f32 to vector<4x16x16xf32>
    %230 = arith.mulf %227, %229 : vector<4x16x16xf32>
    %231 = arith.addf %221, %230 : vector<4x16x16xf32>
    %c0_231 = arith.constant 0 : index
    %c3_232 = arith.constant 3 : index
    %c4_233 = arith.constant 4 : index
    %232 = vector.load %arg6[%c0_231, %c3_232, %c4_233] : memref<4x20x20xf32, #tpu.memory_space<vmem>>, vector<4x16x16xf32>
    %c3_234 = arith.constant 3 : index
    %c4_235 = arith.constant 4 : index
    %233 = memref.load %arg2[%c3_234, %c4_235] : memref<5x5xf32, #tpu.memory_space<smem>>
    %234 = vector.broadcast %233 : f32 to vector<4x16x16xf32>
    %235 = arith.mulf %232, %234 : vector<4x16x16xf32>
    %236 = arith.addf %226, %235 : vector<4x16x16xf32>
    %c0_236 = arith.constant 0 : index
    %c4_237 = arith.constant 4 : index
    %c0_238 = arith.constant 0 : index
    %237 = vector.load %arg6[%c0_236, %c4_237, %c0_238] : memref<4x20x20xf32, #tpu.memory_space<vmem>>, vector<4x16x16xf32>
    %c4_239 = arith.constant 4 : index
    %c0_240 = arith.constant 0 : index
    %238 = memref.load %arg2[%c4_239, %c0_240] : memref<5x5xf32, #tpu.memory_space<smem>>
    %239 = vector.broadcast %238 : f32 to vector<4x16x16xf32>
    %240 = arith.mulf %237, %239 : vector<4x16x16xf32>
    %241 = arith.addf %231, %240 : vector<4x16x16xf32>
    %c0_241 = arith.constant 0 : index
    %c4_242 = arith.constant 4 : index
    %c1_243 = arith.constant 1 : index
    %242 = vector.load %arg6[%c0_241, %c4_242, %c1_243] : memref<4x20x20xf32, #tpu.memory_space<vmem>>, vector<4x16x16xf32>
    %c4_244 = arith.constant 4 : index
    %c1_245 = arith.constant 1 : index
    %243 = memref.load %arg2[%c4_244, %c1_245] : memref<5x5xf32, #tpu.memory_space<smem>>
    %244 = vector.broadcast %243 : f32 to vector<4x16x16xf32>
    %245 = arith.mulf %242, %244 : vector<4x16x16xf32>
    %246 = arith.addf %236, %245 : vector<4x16x16xf32>
    %c0_246 = arith.constant 0 : index
    %c4_247 = arith.constant 4 : index
    %c2_248 = arith.constant 2 : index
    %247 = vector.load %arg6[%c0_246, %c4_247, %c2_248] : memref<4x20x20xf32, #tpu.memory_space<vmem>>, vector<4x16x16xf32>
    %c4_249 = arith.constant 4 : index
    %c2_250 = arith.constant 2 : index
    %248 = memref.load %arg2[%c4_249, %c2_250] : memref<5x5xf32, #tpu.memory_space<smem>>
    %249 = vector.broadcast %248 : f32 to vector<4x16x16xf32>
    %250 = arith.mulf %247, %249 : vector<4x16x16xf32>
    %251 = arith.addf %241, %250 : vector<4x16x16xf32>
    %c0_251 = arith.constant 0 : index
    %c4_252 = arith.constant 4 : index
    %c3_253 = arith.constant 3 : index
    %252 = vector.load %arg6[%c0_251, %c4_252, %c3_253] : memref<4x20x20xf32, #tpu.memory_space<vmem>>, vector<4x16x16xf32>
    %c4_254 = arith.constant 4 : index
    %c3_255 = arith.constant 3 : index
    %253 = memref.load %arg2[%c4_254, %c3_255] : memref<5x5xf32, #tpu.memory_space<smem>>
    %254 = vector.broadcast %253 : f32 to vector<4x16x16xf32>
    %255 = arith.mulf %252, %254 : vector<4x16x16xf32>
    %256 = arith.addf %246, %255 : vector<4x16x16xf32>
    %c0_256 = arith.constant 0 : index
    %c4_257 = arith.constant 4 : index
    %c4_258 = arith.constant 4 : index
    %257 = vector.load %arg6[%c0_256, %c4_257, %c4_258] : memref<4x20x20xf32, #tpu.memory_space<vmem>>, vector<4x16x16xf32>
    %c4_259 = arith.constant 4 : index
    %c4_260 = arith.constant 4 : index
    %258 = memref.load %arg2[%c4_259, %c4_260] : memref<5x5xf32, #tpu.memory_space<smem>>
    %259 = vector.broadcast %258 : f32 to vector<4x16x16xf32>
    %260 = arith.mulf %257, %259 : vector<4x16x16xf32>
    %261 = arith.addf %251, %260 : vector<4x16x16xf32>
    %262 = arith.addf %261, %256 : vector<4x16x16xf32>
    %c0_261 = arith.constant 0 : index
    %c0_262 = arith.constant 0 : index
    %c0_263 = arith.constant 0 : index
    %263 = vector.load %arg5[%c0_261, %c0_262, %c0_263] : memref<4x16x16xf32, #tpu.memory_space<vmem>>, vector<4x16x16xf32>
    tpu.vector_store %arg5[%c0_261, %c0_262, %c0_263], %262 {strides = array<i32>} : memref<4x16x16xf32, #tpu.memory_space<vmem>>, vector<4x16x16xf32>,
    return
  }
  func.func @transform_0(%arg0: i32) -> (i32, i32) {
    %c0_i32 = arith.constant 0 : i32
    %c0_i32_0 = arith.constant 0 : i32
    %c0_i32_1 = arith.constant 0 : i32
    return %c0_i32, %c0_i32_0 : i32, i32
  }
  func.func @transform_1(%arg0: i32) -> (i32, i32) {
    %c0_i32 = arith.constant 0 : i32
    %c0_i32_0 = arith.constant 0 : i32
    %c0_i32_1 = arith.constant 0 : i32
    return %c0_i32, %c0_i32_0 : i32, i32
  }
  func.func @transform_2(%arg0: i32) -> (i32, i32, i32) {
    %c0_i32 = arith.constant 0 : i32
    %c0_i32_0 = arith.constant 0 : i32
    %c0_i32_1 = arith.constant 0 : i32
    return %arg0, %c0_i32, %c0_i32_0 : i32, i32, i32
  }
  func.func @transform_3(%arg0: i32) -> (i32, i32, i32) {
    %c0_i32 = arith.constant 0 : i32
    %c0_i32_0 = arith.constant 0 : i32
    %c0_i32_1 = arith.constant 0 : i32
    return %arg0, %c0_i32, %c0_i32_0 : i32, i32, i32
  }
  func.func @transform_4(%arg0: i32) -> (i32, i32, i32) {
    %c0_i32 = arith.constant 0 : i32
    %c0_i32_0 = arith.constant 0 : i32
    %c0_i32_1 = arith.constant 0 : i32
    return %arg0, %c0_i32, %c0_i32_0 : i32, i32, i32
  }
}

</mosaic_0001>

<bundles_post_ra>
// kernel: tpu_custom_call.1
= control target key start
LH: loop header
LB: loop body
LE: loop exit
PB: predicated region body
PF: predicated region fallthrough
CT: control target
= control target key end

     0   :  { %10 = vsyncpa [#allocation6], 0  ;;  %s5194_s0 = inlined_call_operand.hbm [shape: f32[5,5], index: 0, kind: input, shape index: {}]   ;;  %s5195_s1 = inlined_call_operand.hbm [shape: f32[5,5], index: 1, kind: input, shape index: {}]   ;;  %s5196_s2 = inlined_call_operand.hbm [shape: f32[8,16,16], index: 2, kind: input, shape index: {}]   ;;  %s5197_s3 = inlined_call_operand.hbm [shape: f32[8,16,16], index: 3, kind: output, shape index: {0}]   ;;  %s5198_s4 = inlined_call_operand.hbm [shape: f32[8,16,16], index: 4, kind: output, shape index: {1}]  }
   0x1   :  { %11 = vsyncpa [#allocation8], 0 }
   0x2   :  { %12 = vsyncpa [#allocation4], 0 }
   0x3   :  { %14 = vsyncpa [#allocation4 + $0x1], 0 }
   0x4   :  { %15 = vsyncpa [#allocation5], 0 }
   0x5   :  { %17 = vsyncpa [#allocation5 + $0x1], 0 }
   0x6   :  { %18 = vsyncpa [#allocation12], 0 }
   0x7   :  { %20 = vsyncpa [#allocation12 + $0x1], 0  ;;  %s3202_s15 = smov 0   ;;  %s3204_s16 = smov 0  }
   0x8   :  { %s3206_s17 = smov 0   ;;  %s3208_s18 = smov 0  }
   0x9 LB: > { %s3223_s19 = sadd.s32 4294967295, %s3159_s18   ;;  %s2818_s20 = sadd.s32 4294967294, %s3159_s18   ;;  %s3159_s18 = sphi %s3208_s18, %s5492_s18   ;;  %s3155_s17 = sphi %s3206_s17, %s5491_s17   ;;  %s3151_s16 = sphi %s3204_s16, %s5490_s16   ;;  %s3147_s15 = sphi %s3202_s15, %s5489_s15  }
   0xa   : > { %s3227_s21 = sadd.s32 1, %s3159_s18   ;;  %s75_s22 = sadd.s32 1, %s3155_s17 }
   0xb   : > { %s72_s23 = ssub.s32 %s3159_s18, %s3227_s21  ;;  %p82_p0 = scmp.ne.s32.totalorder %s3155_s17, %s3151_s16 }
   0xc   : > { %p73_p1 = scmp.eq.s32.totalorder %s72_s23, 0  ;;  %p83_p2 = scmp.eq.s32.totalorder %s3159_s18, 0 }
   0xd   : > { %p88_p3 = scmp.ne.s32.totalorder %s3151_s16, %s3147_s15  ;;  %p5199_p4 = scmp.eq.s32.totalorder %s3223_s19, 0 }
   0xe   : > { %s3239_s24 = scalar_select %p73_p1, %s3155_s17, %s75_s22  }
   0xf   : > { %p3241_p5 = por %p83_p2, %p82_p0  ;;  %p3247_p6 = por %p5199_p4, %p88_p3 }
  0x10   : > { %p112_p7 = scmp.eq.s32.totalorder %s3223_s19, 1  ;;  %p118_p8 = scmp.eq.s32.totalorder %s2818_s20, 1 }
  0x11   : > { %s5225_s25 = scalar_select %p3241_p5, 1, 0 }
  0x12   : > { %s5226_s26 = scalar_select %p3247_p6, 1, 0 }
  0x13   : > { %p2819_p9 = scmp.ge.s32.totalorder %s3159_s18, 1  ;;  %p151_p10 = scmp.lt.s32.totalorder %s3159_s18, 3 }
  0x14   : > { %p3254_p11 = por %p112_p7, %p82_p0  ;;  %p3258_p12 = por %p118_p8, %p88_p3 }
  0x15   : > { %p3262_p13 = pnand %p2819_p9, %p151_p10  ;;  %p2932_p6 = scmp.lt.s32.totalorder %s3159_s18, 2 }
  0x16   : > { %s5227_s27 = scalar_select %p3254_p11, 1, 0 }
  0x17   : > { %s5228_s28 = scalar_select %p3258_p12, 1, 0 }
  0x18   : > { %p2912_p4 = pneg %p3262_p13  ;;  %s182_s30 = sand.u32 1, %s3155_s17  }
  0x19   : > { %p5230_p5 = scmp.eq.s32.totalorder %s3223_s19, 0  ;;  %p5232_p3 = scmp.ne.s32.totalorder %s5225_s25, 0 }
  0x1a   : > { %s2823_s7 = sshll.u32 %s182_s30, 6  ;;  %s2997_s10 = scalar_lea.hbm %s5194_s0, 128 }
  0x1b   : > { %p3274_p0 = pnand %p2912_p4, %p5230_p5  ;;  %p3280_p7 = pnand %p2932_p6, %p5232_p3 }
  0x1c   : > { %p2998_p8 = scmp.ne.s32.totalorder %s5194_s0, %s2997_s10  ;;  %p3004_p6 = scmp.lt.u32.totalorder %s2997_s10, %s5194_s0 }
  0x1d   : > { %p2999_p4 = pneg %p3274_p0 }
  0x1f   : > { %p3000_p5 = pnand %p2999_p4, %p2998_p8 }
  0x21   : > { %p3001_p9 = pneg %p3000_p5 }
  0x23   : > { %p3006_p10 = pnand %p3004_p6, %p3001_p9 }
  0x25   : > { %3009 = shalt.err (!%p3006_p10)
}
  0x26   : > { %s3161_s20 = smov [#allocation3]   ;;  %s3010_s9 = scalar_lea.hbm %s5195_s1, 128 }
  0x27   : > { %2915 = dma.hbm_to_smem (!%p3274_p0), %s5194_s0, 128, %s3161_s20, [#allocation6]  }
  0x28   : > { %p3011_p3 = scmp.ne.s32.totalorder %s5195_s1, %s3010_s9  ;;  %p3017_p9 = scmp.lt.u32.totalorder %s3010_s9, %s5195_s1 }
  0x2a   : > { %p3013_p8 = pnand %p3011_p3, %p2999_p4 }
  0x2c   : > { %p3014_p5 = pneg %p3013_p8 }
  0x2e   : > { %p3019_p6 = pnand %p3017_p9, %p3014_p5 }
  0x30   : > { %3022 = shalt.err (!%p3019_p6)
}
  0x31   : > { %s3162_s14 = smov [#allocation7]   ;;  %s2893_s23 = sshll.u32 %s3159_s18, 10 }
  0x32   : > { %2918 = dma.hbm_to_smem (!%p3274_p0), %s5195_s1, 128, %s3162_s14, [#allocation8]  }
  0x33   : > { %s3318_s11 = scalar_lea.hbm %s5196_s2, %s2893_s23  ;;  %s186_s9 = scalar_lea.vmem [#allocation9], %s2823_s7 }
  0x34   : > { %s194_s12 = sshll.u32 %s186_s9, 4  ;;  %s3322_s5 = scalar_lea.sflag [#allocation4], %s182_s30  ;;  %s3320_s12 = int_to_ptr.vmem [resolvable:$true] %s194_s12 }
  0x35   : > { %s3023_s10 = scalar_lea.hbm %s3318_s11, 1024  ;;  %p3025_p0 = pneg %p3280_p7 }
  0x36   : > { %p3024_p4 = scmp.ne.s32.totalorder %s3318_s11, %s3023_s10  ;;  %s3028_s20 = scalar_lea.hbm %s5196_s2, 2048 }
  0x37   : > { %p3029_p8 = scmp.lt.u32.totalorder %s3318_s11, %s5196_s2  ;;  %p3030_p5 = scmp.lt.u32.totalorder %s3028_s20, %s3023_s10 }
  0x38   : > { %p3026_p10 = pnand %p3025_p0, %p3024_p4  ;;  %p3032_p6 = scmp.lt.u32.totalorder %s3023_s10, %s3318_s11 }
  0x39   : > { %p3031_p9 = por %p3030_p5, %p3029_p8 }
  0x3a   : > { %p3027_p3 = pneg %p3026_p10 }
  0x3b   : > { %p3033_p2 = por %p3032_p6, %p3031_p9 }
  0x3d   : > { %p3034_p1 = pnand %p3033_p2, %p3027_p3 }
  0x3f   : > { %3037 = shalt.err (!%p3034_p1)
}
  0x40   : > { %s3038_s30 = scalar_lea.vmem %s3320_s12, 1024  ;;  %s3163_s7 = smov [#allocation9]  }
  0x41   : > { %p3039_p4 = scmp.ne.s32.totalorder %s3320_s12, %s3038_s30  ;;  %s3043_s25 = sshll.u32 %s3163_s7, 4  ;;  %s3044_s25 = int_to_ptr.vmem [resolvable:$false] %s3043_s25 }
  0x42   : > { %s3045_s8 = scalar_lea.vmem %s3044_s25, 2048  ;;  %p3046_p11 = scmp.lt.s32.totalorder %s3320_s12, %s3044_s25 }
  0x43   : > { %p3041_p10 = pnand %p3039_p4, %p3025_p0  ;;  %p3047_p8 = scmp.lt.s32.totalorder %s3045_s8, %s3038_s30 }
  0x45   : > { %p3042_p12 = pneg %p3041_p10  ;;  %p3048_p5 = por %p3047_p8, %p3046_p11 }
  0x47   : > { %p3049_p9 = pnand %p3048_p5, %p3042_p12 }
  0x49   : > { %3052 = shalt.err (!%p3049_p9)
}
  0x4a   : > { %s3164_s9 = smov 128   ;;  %s3165_s10 = smov 8  }
  0x4b   : > { %2922 = dma.hbm_to_vmem [thread:$0]  (!%p3280_p7), %s3318_s11, 1024, %s3320_s12, %s3322_s5, %s3164_s9, %s3164_s9, %s3165_s10  }
  0x4c   : > { %206 = sbr.rel (%p3262_p13) target bundleno = 1362 (0x552), region = 32 }
  0x53   : > { %p5234_p1 = scmp.eq.s32.totalorder %s3223_s19, 0 }
  0x55   : > { %3126 = dma.done.wait (%p5234_p1), [#allocation6], 128   ;;  %p5235_p2 = pmov %p5234_p1 }
  0x56   : > { %p5236_p11 = pmov %p5234_p1 }
  0x57   : > { %3128 = vsyncadd (%p5235_p2), [#allocation6], 4294967168 }
  0x58   : > { %3130 = dma.done.wait (%p5236_p11), [#allocation8], 128   ;;  %p5237_p12 = pmov %p5234_p1 }
  0x59   : > { %s3361_s13 = sand.u32 1, %s3151_s16   ;;  %p5238_p13 = scmp.ne.s32.totalorder %s5226_s26, 0 }
  0x5a   : > { %3132 = vsyncadd (%p5237_p12), [#allocation8], 4294967168  ;;  %s2830_s29 = sshll.u32 %s3361_s13, 6  ;;  %s217_s6 = scalar_lea.sflag [#allocation4], %s3361_s13 }
  0x5b   : > { %s3365_s11 = scalar_lea.vmem [#allocation9], %s2830_s29 }
  0x5c   : > { %3134 = dma.done.wait (%p5238_p13), %s217_s6, 1024  }
  0x5d   : > { %3136 = vsyncadd (%p5238_p13), %s217_s6, 4294966272 }
  0x5e   : > { %225 = sfence }
  0x5f   : > { %s3371_s12 = scalar_lea.vmem [#allocation10], %s2830_s29  ;;  %s3373_s5 = scalar_lea.vmem [#allocation11], %s2830_s29 }
  0x60   : > { %p5239_p7 = scmp.ne.s32.totalorder %s3223_s19, 0 }
  0x61   : > { %vm258_vm0 = vcmask (!%p5239_p7), 162816   ;;  %vm261_vm1 = vcmask (!%p5239_p7), 158720   ;;  %v3166_v0 = vmov (!%p5239_p7), 0.0  }
  0x62   : > { %257 = sbr.rel (%p5239_p7) target bundleno = 105 (0x69), region = 48  ;;  %259 = vst.msk [vmem:[#allocation2] sm:$0xff] (!%p5239_p7), %vm258_vm0, %v3166_v0  ;;  %260 = vst.msk [vmem:[#allocation2 + $0x8] sm:$0xff] (!%p5239_p7), %vm258_vm0, %v3166_v0 }
  0x63   : > { %263 = vst.msk [vmem:[#allocation2 + $0x18] sm:$0xff] (!%p5239_p7), %vm258_vm0, %v3166_v0  ;;  %264 = vst.msk [vmem:[#allocation2 + $0x20] sm:$0xff] (!%p5239_p7), %vm258_vm0, %v3166_v0 }
  0x64   : > { %266 = vst.msk [vmem:[#allocation2 + $0x30] sm:$0xff] (!%p5239_p7), %vm258_vm0, %v3166_v0  ;;  %267 = vst.msk [vmem:[#allocation2 + $0x38] sm:$0xff] (!%p5239_p7), %vm258_vm0, %v3166_v0 }
  0x65   : > { %269 = vst.msk [vmem:[#allocation2 + $0x48] sm:$0xff] (!%p5239_p7), %vm258_vm0, %v3166_v0  ;;  %270 = vst.msk [vmem:[#allocation2 + $0x50] sm:$0xff] (!%p5239_p7), %vm258_vm0, %v3166_v0 }
  0x66   : > { %262 = vst.msk [vmem:[#allocation2 + $0x10] sm:$0xf] (!%p5239_p7), %vm261_vm1, %v3166_v0  ;;  %265 = vst.msk [vmem:[#allocation2 + $0x28] sm:$0xf] (!%p5239_p7), %vm261_vm1, %v3166_v0 }
  0x67   : > { %268 = vst.msk [vmem:[#allocation2 + $0x40] sm:$0xf] (!%p5239_p7), %vm261_vm1, %v3166_v0  ;;  %271 = vst.msk [vmem:[#allocation2 + $0x58] sm:$0xf] (!%p5239_p7), %vm261_vm1, %v3166_v0 }
  0x69 PF: > { %v274_v1 = vld [vmem:[%s3365_s11 + $0x10] sm:$0xff]  ;;  %v272_v2 = vld [vmem:[%s3365_s11] sm:$0xff]  ;;  %s3167_s26 = smov 2   ;;  %v275_v3 = vld [vmem:[%s3365_s11 + $0x18] sm:$0xff]  ;;  %vm312_vm2 = vcmask 146448   ;;  %s2835_s14 = sld [smem:[#allocation3 + $0x2]] }
  0x6a   : > { %292 = vrot.lane.b32.xlu1 %v274_v1, %s3167_s26  ;;  %288 = vrot.lane.b32.xlu0 %v272_v2, %s3167_s26  ;;  %v273_v4 = vld [vmem:[%s3365_s11 + $0x8] sm:$0xff]  ;;  %v276_v6 = vld [vmem:[%s3365_s11 + $0x20] sm:$0xff]  ;;  %s3168_s20 = smov 126   ;;  %s2836_s22 = sld [smem:[#allocation3 + $0x3]]  ;;  %vm1459_vm3 = vcmask 130048  }
  0x6b   : > { %v277_v5 = vld [vmem:[%s3365_s11 + $0x28] sm:$0xff]  ;;  %v279_v7 = vld [vmem:[%s3365_s11 + $0x38] sm:$0xff]  ;;  %v278_v8 = vld [vmem:[%s3365_s11 + $0x30] sm:$0xff]  ;;  %s2837_s23 = sld [smem:[#allocation3 + $0x4]]  ;;  %s3169_s30 = smov 124  }
  0x6c   : > { %s2838_s7 = sld [smem:[#allocation3 + $0x80]]  ;;  %s3170_s25 = smov 1  }
  0x6d   : > { %s2839_s8 = sld [smem:[#allocation3 + $0x81]]  ;;  %s3171_s9 = smov 127  }
  0x6e   : > { %294 = vrot.lane.b32.xlu1 %v275_v3, %s3167_s26  ;;  %290 = vrot.lane.b32.xlu0 %v273_v4, %s3167_s26  ;;  %s2840_s10 = sld [smem:[#allocation3 + $0x82]]  ;;  %s2841_s29 = sld [smem:[#allocation3 + $0x83]] }
  0x6f   : > { %v366_v13 = vstv %s2835_s14  ;;  %s3172_s6 = smov 125   ;;  %s2842_s11 = sld [smem:[#allocation3 + $0x84]] }
  0x70   : > { %v416_v33 = vstv %s2836_s22  ;;  %s2845_s14 = sld [smem:[#allocation3 + $0x102]]  ;;  %s2846_s22 = sld [smem:[#allocation3 + $0x103]] }
  0x71   : > { %v466_v42 = vstv %s2837_s23  ;;  %s2847_s23 = sld [smem:[#allocation3 + $0x104]]  ;;  %p5486_p3 = scmp.ne.s32.totalorder %s5227_s27, 0 }
  0x72   : > { %298 = vrot.lane.b32.xlu1 %v277_v5, %s3167_s26  ;;  %296 = vrot.lane.b32.xlu0 %v276_v6, %s3167_s26  ;;  %v524_v52 = vstv %s2838_s7  ;;  %s2848_s7 = sld [smem:[#allocation3 + $0x180]] }
  0x73   : > { %v574_v4 = vstv %s2839_s8  ;;  %s2849_s8 = sld [smem:[#allocation3 + $0x181]] }
  0x76   : > { %302 = vrot.lane.b32.xlu1 %v279_v7, %s3167_s26  ;;  %300 = vrot.lane.b32.xlu0 %v278_v8, %s3167_s26 }
  0xdc   : > { %v293_v9 = vpop.permute.xlu1 %292  ;;  %v289_v10 = vpop.permute.xlu0 %288 }
  0xdd   : > { %315 = vst.msk [vmem:[#allocation2 + $0x1a] sm:$0xff] %vm312_vm2, %v293_v9  ;;  %313 = vst.msk [vmem:[#allocation2 + $0x2] sm:$0xff] %vm312_vm2, %v289_v10 }
  0xe0   : > { %v295_v11 = vpop.permute.xlu1 %294  ;;  %v291_v12 = vpop.permute.xlu0 %290 }
  0xe1   : > { %316 = vst.msk [vmem:[#allocation2 + $0x22] sm:$0xff] %vm312_vm2, %v295_v11  ;;  %314 = vst.msk [vmem:[#allocation2 + $0xa] sm:$0xff] %vm312_vm2, %v291_v12 }
  0xe4   : > { %v299_v14 = vpop.permute.xlu1 %298  ;;  %v297_v15 = vpop.permute.xlu0 %296  ;;  %v321_v16 = vld [vmem:[#allocation2] sm:$0xff]  ;;  %v323_v17 = vld [vmem:[#allocation2 + $0x18] sm:$0xff] }
  0xe5   : > { %318 = vst.msk [vmem:[#allocation2 + $0x3a] sm:$0xff] %vm312_vm2, %v299_v14  ;;  %317 = vst.msk [vmem:[#allocation2 + $0x32] sm:$0xff] %vm312_vm2, %v297_v15  ;;  %v367_v18 = vmul.f32 %v366_v13, %v321_v16  ;;  %v369_v19 = vmul.f32 %v366_v13, %v323_v17  ;;  %v417_v35 = vmul.f32 %v416_v33, %v321_v16  ;;  %v3427_v51 = vld [vmem:[#allocation2 + $0x1] sm:$0xff]  ;;  %v3434_v56 = vld [vmem:[#allocation2 + $0x19] sm:$0xff] }
  0xe6   : > { %v419_v37 = vmul.f32 %v416_v33, %v323_v17  ;;  %v467_v44 = vmul.f32 %v466_v42, %v321_v16  ;;  %v469_v46 = vmul.f32 %v466_v42, %v323_v17  ;;  %v525_v54 = vmul.f32 %v524_v52, %v3427_v51 }
  0xe7   : > { %383 = vrot.lane.b32.xlu0 %v367_v18, %s3168_s20  ;;  %v527_v58 = vmul.f32 %v524_v52, %v3434_v56  ;;  %v575_v6 = vmul.f32 %v574_v4, %v3427_v51  ;;  %v577_v8 = vmul.f32 %v574_v4, %v3434_v56 }
  0xe8   : > { %v303_v20 = vpop.permute.xlu1 %302  ;;  %v301_v21 = vpop.permute.xlu0 %300  ;;  %v3400_v22 = vld [vmem:[#allocation2 + $0x8] sm:$0xff]  ;;  %v324_v24 = vld [vmem:[#allocation2 + $0x20] sm:$0xff] }
  0xe9   : > { %320 = vst.msk [vmem:[#allocation2 + $0x52] sm:$0xff] %vm312_vm2, %v303_v20  ;;  %319 = vst.msk [vmem:[#allocation2 + $0x4a] sm:$0xff] %vm312_vm2, %v301_v21  ;;  %v368_v23 = vmul.f32 %v366_v13, %v3400_v22  ;;  %v370_v26 = vmul.f32 %v366_v13, %v324_v24  ;;  %v418_v36 = vmul.f32 %v416_v33, %v3400_v22  ;;  %v3432_v55 = vld [vmem:[#allocation2 + $0x9] sm:$0xff]  ;;  %v3440_v59 = vld [vmem:[#allocation2 + $0x21] sm:$0xff] }
  0xea   : > { %v420_v38 = vmul.f32 %v416_v33, %v324_v24  ;;  %v468_v45 = vmul.f32 %v466_v42, %v3400_v22  ;;  %v470_v47 = vmul.f32 %v466_v42, %v324_v24  ;;  %v526_v57 = vmul.f32 %v524_v52, %v3432_v55 }
  0xeb   : > { %387 = vrot.lane.b32.xlu0 %v369_v19, %s3168_s20  ;;  %385 = vrot.lane.b32.xlu1 %v368_v23, %s3168_s20  ;;  %v528_v61 = vmul.f32 %v524_v52, %v3440_v59  ;;  %v576_v7 = vmul.f32 %v574_v4, %v3432_v55  ;;  %v578_v9 = vmul.f32 %v574_v4, %v3440_v59  ;;  %v674_v23 = vstv %s2841_s29  ;;  %s2851_s29 = sld [smem:[#allocation3 + $0x183]] }
  0xec   : > { %v325_v25 = vld [vmem:[#allocation2 + $0x30] sm:$0xff]  ;;  %v326_v28 = vld [vmem:[#allocation2 + $0x38] sm:$0xff] }
  0xed   : > { %v371_v27 = vmul.f32 %v366_v13, %v325_v25  ;;  %v372_v30 = vmul.f32 %v366_v13, %v326_v28  ;;  %v421_v39 = vmul.f32 %v416_v33, %v325_v25  ;;  %v422_v40 = vmul.f32 %v416_v33, %v326_v28  ;;  %v3442_v60 = vld [vmem:[#allocation2 + $0x31] sm:$0xff]  ;;  %v3448_v63 = vld [vmem:[#allocation2 + $0x39] sm:$0xff] }
  0xee   : > { %v471_v48 = vmul.f32 %v466_v42, %v325_v25  ;;  %v472_v49 = vmul.f32 %v466_v42, %v326_v28  ;;  %v529_v62 = vmul.f32 %v524_v52, %v3442_v60  ;;  %v530_v1 = vmul.f32 %v524_v52, %v3448_v63 }
  0xef   : > { %389 = vrot.lane.b32.xlu1 %v370_v26, %s3168_s20  ;;  %391 = vrot.lane.b32.xlu0 %v371_v27, %s3168_s20  ;;  %v579_v10 = vmul.f32 %v574_v4, %v3442_v60  ;;  %v580_v11 = vmul.f32 %v574_v4, %v3448_v63  ;;  %v675_v25 = vmul.f32 %v674_v23, %v3427_v51 }
  0xf0   : > { %v327_v29 = vld [vmem:[#allocation2 + $0x48] sm:$0xff]  ;;  %v328_v32 = vld [vmem:[#allocation2 + $0x50] sm:$0xff]  ;;  %v676_v26 = vmul.f32 %v674_v23, %v3432_v55  ;;  %v677_v27 = vmul.f32 %v674_v23, %v3434_v56  ;;  %v678_v28 = vmul.f32 %v674_v23, %v3440_v59 }
  0xf1   : > { %v373_v31 = vmul.f32 %v366_v13, %v327_v29  ;;  %v374_v34 = vmul.f32 %v366_v13, %v328_v32  ;;  %v423_v41 = vmul.f32 %v416_v33, %v327_v29  ;;  %v424_v43 = vmul.f32 %v416_v33, %v328_v32  ;;  %v3450_v0 = vld [vmem:[#allocation2 + $0x49] sm:$0xff]  ;;  %v3456_v3 = vld [vmem:[#allocation2 + $0x51] sm:$0xff] }
  0xf2   : > { %v473_v50 = vmul.f32 %v466_v42, %v327_v29  ;;  %v474_v53 = vmul.f32 %v466_v42, %v328_v32  ;;  %v531_v2 = vmul.f32 %v524_v52, %v3450_v0  ;;  %v532_v5 = vmul.f32 %v524_v52, %v3456_v3  ;;  %v3542_v52 = vld [vmem:[#allocation2 + $0xa] sm:$0xff] }
  0xf3   : > { %393 = vrot.lane.b32.xlu1 %v372_v30, %s3168_s20  ;;  %395 = vrot.lane.b32.xlu0 %v373_v31, %s3168_s20  ;;  %v581_v12 = vmul.f32 %v574_v4, %v3450_v0  ;;  %v624_v13 = vstv %s2840_s10  ;;  %v582_v14 = vmul.f32 %v574_v4, %v3456_v3  ;;  %v679_v29 = vmul.f32 %v674_v23, %v3442_v60  ;;  %s2850_s10 = sld [smem:[#allocation3 + $0x182]] }
  0xf4   : > { %v625_v15 = vmul.f32 %v624_v13, %v3427_v51  ;;  %v626_v16 = vmul.f32 %v624_v13, %v3432_v55  ;;  %v627_v17 = vmul.f32 %v624_v13, %v3434_v56  ;;  %v628_v18 = vmul.f32 %v624_v13, %v3440_v59 }
  0xf5   : > { %v629_v19 = vmul.f32 %v624_v13, %v3442_v60  ;;  %v630_v20 = vmul.f32 %v624_v13, %v3448_v63  ;;  %v631_v21 = vmul.f32 %v624_v13, %v3450_v0  ;;  %v632_v24 = vmul.f32 %v624_v13, %v3456_v3 }
  0xf6   : > { %v680_v30 = vmul.f32 %v674_v23, %v3448_v63  ;;  %v681_v31 = vmul.f32 %v674_v23, %v3450_v0  ;;  %v724_v32 = vstv %s2842_s11  ;;  %v682_v33 = vmul.f32 %v674_v23, %v3456_v3  ;;  %s2852_s11 = sld [smem:[#allocation3 + $0x184]] }
  0xf7   : > { %397 = vrot.lane.b32.xlu1 %v374_v34, %s3168_s20  ;;  %433 = vrot.lane.b32.xlu0 %v417_v35, %s3168_s20  ;;  %v725_v34 = vmul.f32 %v724_v32, %v3427_v51 }
  0xfb   : > { %435 = vrot.lane.b32.xlu1 %v418_v36, %s3168_s20  ;;  %437 = vrot.lane.b32.xlu0 %v419_v37, %s3168_s20  ;;  %v726_v36 = vmul.f32 %v724_v32, %v3432_v55  ;;  %v727_v37 = vmul.f32 %v724_v32, %v3434_v56 }
  0xff   : > { %439 = vrot.lane.b32.xlu1 %v420_v38, %s3168_s20  ;;  %441 = vrot.lane.b32.xlu0 %v421_v39, %s3168_s20 }
 0x103   : > { %443 = vrot.lane.b32.xlu1 %v422_v40, %s3168_s20  ;;  %445 = vrot.lane.b32.xlu0 %v423_v41, %s3168_s20  ;;  %v728_v40 = vmul.f32 %v724_v32, %v3440_v59  ;;  %v729_v41 = vmul.f32 %v724_v32, %v3442_v60  ;;  %v3556_v59 = vld [vmem:[#allocation2 + $0x32] sm:$0xff] }
 0x107   : > { %447 = vrot.lane.b32.xlu1 %v424_v43, %s3168_s20  ;;  %483 = vrot.lane.b32.xlu0 %v467_v44, %s3169_s30  ;;  %v730_v44 = vmul.f32 %v724_v32, %v3448_v63 }
 0x10b   : > { %485 = vrot.lane.b32.xlu1 %v468_v45, %s3169_s30  ;;  %487 = vrot.lane.b32.xlu0 %v469_v46, %s3169_s30  ;;  %v731_v45 = vmul.f32 %v724_v32, %v3450_v0  ;;  %v3532_v46 = vld [vmem:[#allocation2 + $0x2] sm:$0xff]  ;;  %v3566_v0 = vld [vmem:[#allocation2 + $0x3a] sm:$0xff] }
 0x10f   : > { %489 = vrot.lane.b32.xlu1 %v470_v47, %s3169_s30  ;;  %491 = vrot.lane.b32.xlu0 %v471_v48, %s3169_s30  ;;  %v818_v47 = vstv %s2845_s14  ;;  %s2855_s14 = sld [smem:[#allocation3 + $0x202]] }
 0x110   : > { %v819_v51 = vmul.f32 %v818_v47, %v3532_v46  ;;  %v820_v56 = vmul.f32 %v818_v47, %v3542_v52  ;;  %v823_v63 = vmul.f32 %v818_v47, %v3556_v59  ;;  %v824_v4 = vmul.f32 %v818_v47, %v3566_v0 }
 0x113   : > { %493 = vrot.lane.b32.xlu1 %v472_v49, %s3169_s30  ;;  %495 = vrot.lane.b32.xlu0 %v473_v50, %s3169_s30  ;;  %v732_v50 = vmul.f32 %v724_v32, %v3456_v3 }
 0x117   : > { %497 = vrot.lane.b32.xlu1 %v474_v53, %s3169_s30  ;;  %541 = vrot.lane.b32.xlu0 %v525_v54, %s3170_s25  ;;  %v3544_v53 = vld [vmem:[#allocation2 + $0x1a] sm:$0xff] }
 0x11b   : > { %543 = vrot.lane.b32.xlu1 %v526_v57, %s3170_s25  ;;  %545 = vrot.lane.b32.xlu0 %v527_v58, %s3170_s25  ;;  %v821_v57 = vmul.f32 %v818_v47, %v3544_v53  ;;  %v3554_v58 = vld [vmem:[#allocation2 + $0x22] sm:$0xff] }
 0x11f   : > { %547 = vrot.lane.b32.xlu1 %v528_v61, %s3170_s25  ;;  %549 = vrot.lane.b32.xlu0 %v529_v62, %s3170_s25  ;;  %v822_v62 = vmul.f32 %v818_v47, %v3554_v58 }
 0x123   : > { %551 = vrot.lane.b32.xlu1 %v530_v1, %s3170_s25  ;;  %553 = vrot.lane.b32.xlu0 %v531_v2, %s3170_s25  ;;  %v3568_v1 = vld [vmem:[#allocation2 + $0x4a] sm:$0xff] }
 0x127   : > { %555 = vrot.lane.b32.xlu1 %v532_v5, %s3170_s25  ;;  %591 = vrot.lane.b32.xlu0 %v575_v6, %s3171_s9  ;;  %v825_v5 = vmul.f32 %v818_v47, %v3568_v1  ;;  %v3578_v6 = vld [vmem:[#allocation2 + $0x52] sm:$0xff] }
 0x128   : > { %5248 = vst [vmem:[#allocation26_spill] sm:$0xff] %v3578_v6 }
 0x12b   : > { %593 = vrot.lane.b32.xlu1 %v576_v7, %s3171_s9  ;;  %595 = vrot.lane.b32.xlu0 %v577_v8, %s3171_s9  ;;  %v868_v7 = vstv %s2846_s22  ;;  %s2856_s22 = sld [smem:[#allocation3 + $0x203]] }
 0x12c   : > { %v874_v23 = vmul.f32 %v868_v7, %v3566_v0 }
 0x12f   : > { %597 = vrot.lane.b32.xlu1 %v578_v9, %s3171_s9  ;;  %599 = vrot.lane.b32.xlu0 %v579_v10, %s3171_s9  ;;  %v826_v10 = vmul.f32 %v818_v47, %v3578_v6 }
 0x133   : > { %601 = vrot.lane.b32.xlu1 %v580_v11, %s3171_s9  ;;  %603 = vrot.lane.b32.xlu0 %v581_v12, %s3171_s9  ;;  %v869_v11 = vmul.f32 %v868_v7, %v3532_v46 }
 0x137   : > { %605 = vrot.lane.b32.xlu1 %v582_v14, %s3171_s9  ;;  %641 = vrot.lane.b32.xlu0 %v625_v15, %s3171_s9  ;;  %v870_v14 = vmul.f32 %v868_v7, %v3542_v52  ;;  %v871_v15 = vmul.f32 %v868_v7, %v3544_v53 }
 0x13b   : > { %643 = vrot.lane.b32.xlu1 %v626_v16, %s3171_s9  ;;  %645 = vrot.lane.b32.xlu0 %v627_v17, %s3171_s9 }
 0x13f   : > { %647 = vrot.lane.b32.xlu1 %v628_v18, %s3171_s9  ;;  %649 = vrot.lane.b32.xlu0 %v629_v19, %s3171_s9  ;;  %v872_v18 = vmul.f32 %v868_v7, %v3554_v58  ;;  %v873_v19 = vmul.f32 %v868_v7, %v3556_v59 }
 0x143   : > { %651 = vrot.lane.b32.xlu1 %v630_v20, %s3171_s9  ;;  %653 = vrot.lane.b32.xlu0 %v631_v21, %s3171_s9 }
 0x147   : > { %655 = vrot.lane.b32.xlu1 %v632_v24, %s3171_s9  ;;  %691 = vrot.lane.b32.xlu0 %v675_v25, %s3172_s6  ;;  %v875_v24 = vmul.f32 %v868_v7, %v3568_v1  ;;  %v918_v25 = vstv %s2847_s23  ;;  %s2857_s23 = sld [smem:[#allocation3 + $0x204]] }
 0x148   : > { %v920_v32 = vmul.f32 %v918_v25, %v3542_v52  ;;  %v925_v47 = vmul.f32 %v918_v25, %v3568_v1 }
 0x14b   : > { %693 = vrot.lane.b32.xlu1 %v676_v26, %s3172_s6  ;;  %695 = vrot.lane.b32.xlu0 %v677_v27, %s3172_s6 }
 0x14f   : > { %697 = vrot.lane.b32.xlu1 %v678_v28, %s3172_s6  ;;  %699 = vrot.lane.b32.xlu0 %v679_v29, %s3172_s6  ;;  %v876_v28 = vmul.f32 %v868_v7, %v3578_v6  ;;  %v919_v29 = vmul.f32 %v918_v25, %v3532_v46 }
 0x153   : > { %701 = vrot.lane.b32.xlu1 %v680_v30, %s3172_s6  ;;  %703 = vrot.lane.b32.xlu0 %v681_v31, %s3172_s6 }
 0x157   : > { %705 = vrot.lane.b32.xlu1 %v682_v33, %s3172_s6  ;;  %741 = vrot.lane.b32.xlu0 %v725_v34, %s3172_s6  ;;  %v921_v33 = vmul.f32 %v918_v25, %v3544_v53 }
 0x159   : > { %v3512_v35 = vpop.permute.xlu0 %383 }
 0x15a   : > { %5240 = vst [vmem:[#allocation18_spill] sm:$0xff] %v3512_v35 }
 0x15b   : > { %743 = vrot.lane.b32.xlu1 %v726_v36, %s3172_s6  ;;  %745 = vrot.lane.b32.xlu0 %v727_v37, %s3172_s6  ;;  %v922_v37 = vmul.f32 %v918_v25, %v3554_v58 }
 0x15d   : > { %v3518_v38 = vpop.permute.xlu1 %385  ;;  %v3520_v39 = vpop.permute.xlu0 %387 }
 0x15e   : > { %5241 = vst [vmem:[#allocation19_spill] sm:$0xff] %v3518_v38  ;;  %5242 = vst [vmem:[#allocation20_spill] sm:$0xff] %v3520_v39 }
 0x15f   : > { %747 = vrot.lane.b32.xlu1 %v728_v40, %s3172_s6  ;;  %749 = vrot.lane.b32.xlu0 %v729_v41, %s3172_s6  ;;  %v923_v40 = vmul.f32 %v918_v25, %v3556_v59 }
 0x161   : > { %v3526_v42 = vpop.permute.xlu1 %389  ;;  %v3528_v43 = vpop.permute.xlu0 %391 }
 0x162   : > { %5243 = vst [vmem:[#allocation21_spill] sm:$0xff] %v3526_v42  ;;  %5244 = vst [vmem:[#allocation22_spill] sm:$0xff] %v3528_v43 }
 0x163   : > { %751 = vrot.lane.b32.xlu1 %v730_v44, %s3172_s6  ;;  %753 = vrot.lane.b32.xlu0 %v731_v45, %s3172_s6  ;;  %v924_v45 = vmul.f32 %v918_v25, %v3566_v0 }
 0x165   : > { %v3536_v48 = vpop.permute.xlu1 %393  ;;  %v3538_v49 = vpop.permute.xlu0 %395 }
 0x166   : > { %5245 = vst [vmem:[#allocation23_spill] sm:$0xff] %v3536_v48  ;;  %5246 = vst [vmem:[#allocation24_spill] sm:$0xff] %v3538_v49 }
 0x167   : > { %755 = vrot.lane.b32.xlu1 %v732_v50, %s3172_s6  ;;  %835 = vrot.lane.b32.xlu0 %v819_v51, %s3168_s20  ;;  %v3644_v50 = vld [vmem:[#allocation2 + $0x3] sm:$0xff]  ;;  %v976_v51 = vstv %s2848_s7  ;;  %s2834_s7 = sld [smem:[#allocation3 + $0x1]] }
 0x169   : > { %v3548_v54 = vpop.permute.xlu1 %397  ;;  %v3550_v55 = vpop.permute.xlu0 %433 }
 0x16a   : > { %5247 = vst [vmem:[#allocation25_spill] sm:$0xff] %v3548_v54 }
 0x16b   : > { %837 = vrot.lane.b32.xlu1 %v820_v56, %s3168_s20  ;;  %839 = vrot.lane.b32.xlu0 %v821_v57, %s3168_s20 }
 0x16d   : > { %v3560_v60 = vpop.permute.xlu1 %435  ;;  %v3562_v61 = vpop.permute.xlu0 %437 }
 0x16f   : > { %841 = vrot.lane.b32.xlu1 %v822_v62, %s3168_s20  ;;  %843 = vrot.lane.b32.xlu0 %v823_v63, %s3168_s20  ;;  %v926_v62 = vmul.f32 %v918_v25, %v3578_v6  ;;  %v977_v63 = vmul.f32 %v976_v51, %v3644_v50  ;;  %v1370_v6 = vstv %s2857_s23  ;;  %s2861_s23 = sld [smem:[#allocation7 + $0x4]] }
 0x171   : > { %v3572_v2 = vpop.permute.xlu1 %439  ;;  %v3574_v3 = vpop.permute.xlu0 %441 }
 0x173   : > { %845 = vrot.lane.b32.xlu1 %v824_v4, %s3168_s20  ;;  %847 = vrot.lane.b32.xlu0 %v825_v5, %s3168_s20  ;;  %v3654_v4 = vld [vmem:[#allocation2 + $0xb] sm:$0xff]  ;;  %v3656_v5 = vld [vmem:[#allocation2 + $0x1b] sm:$0xff] }
 0x175   : > { %v3582_v8 = vpop.permute.xlu1 %443  ;;  %v3584_v9 = vpop.permute.xlu0 %445 }
 0x177   : > { %849 = vrot.lane.b32.xlu1 %v826_v10, %s3168_s20  ;;  %885 = vrot.lane.b32.xlu0 %v869_v11, %s3168_s20  ;;  %v978_v11 = vmul.f32 %v976_v51, %v3654_v4 }
 0x179   : > { %v3590_v12 = vpop.permute.xlu1 %447  ;;  %v3592_v13 = vpop.permute.xlu0 %483 }
 0x17a   : > { %5249 = vst [vmem:[#allocation27_spill] sm:$0xff] %v3592_v13 }
 0x17b   : > { %887 = vrot.lane.b32.xlu1 %v870_v14, %s3168_s20  ;;  %889 = vrot.lane.b32.xlu0 %v871_v15, %s3168_s20  ;;  %v979_v14 = vmul.f32 %v976_v51, %v3656_v5  ;;  %v3666_v15 = vld [vmem:[#allocation2 + $0x23] sm:$0xff] }
 0x17d   : > { %v3598_v16 = vpop.permute.xlu1 %485  ;;  %v3600_v17 = vpop.permute.xlu0 %487 }
 0x17e   : > { %5250 = vst [vmem:[#allocation28_spill] sm:$0xff] %v3598_v16  ;;  %5251 = vst [vmem:[#allocation29_spill] sm:$0xff] %v3600_v17  ;;  %v3866_v16 = vld [vmem:[#allocation2 + $0x54] sm:$0xff] }
 0x17f   : > { %891 = vrot.lane.b32.xlu1 %v872_v18, %s3168_s20  ;;  %893 = vrot.lane.b32.xlu0 %v873_v19, %s3168_s20  ;;  %v3668_v18 = vld [vmem:[#allocation2 + $0x33] sm:$0xff]  ;;  %5288 = vst [vmem:[#allocation66_spill] sm:$0xff] %v3866_v16 }
 0x180   : > { %v981_v25 = vmul.f32 %v976_v51, %v3668_v18 }
 0x181   : > { %v3606_v20 = vpop.permute.xlu1 %489  ;;  %v3608_v21 = vpop.permute.xlu0 %491 }
 0x182   : > { %5252 = vst [vmem:[#allocation30_spill] sm:$0xff] %v3606_v20  ;;  %5253 = vst [vmem:[#allocation31_spill] sm:$0xff] %v3608_v21  ;;  %v1126_v21 = vstv %s2851_s29  ;;  %s329_s29 = sld [smem:[#allocation3]] }
 0x183   : > { %895 = vrot.lane.b32.xlu1 %v874_v23, %s3168_s20  ;;  %897 = vrot.lane.b32.xlu0 %v875_v24, %s3168_s20  ;;  %v980_v24 = vmul.f32 %v976_v51, %v3666_v15 }
 0x185   : > { %v3614_v26 = vpop.permute.xlu1 %493  ;;  %v3616_v27 = vpop.permute.xlu0 %495 }
 0x186   : > { %5254 = vst [vmem:[#allocation32_spill] sm:$0xff] %v3614_v26  ;;  %5255 = vst [vmem:[#allocation33_spill] sm:$0xff] %v3616_v27 }
 0x187   : > { %899 = vrot.lane.b32.xlu1 %v876_v28, %s3168_s20  ;;  %935 = vrot.lane.b32.xlu0 %v919_v29, %s3169_s30  ;;  %v3678_v28 = vld [vmem:[#allocation2 + $0x3b] sm:$0xff]  ;;  %v3680_v29 = vld [vmem:[#allocation2 + $0x4b] sm:$0xff] }
 0x189   : > { %v3622_v30 = vpop.permute.xlu1 %497  ;;  %v3624_v31 = vpop.permute.xlu0 %541 }
 0x18a   : > { %5256 = vst [vmem:[#allocation34_spill] sm:$0xff] %v3622_v30 }
 0x18b   : > { %937 = vrot.lane.b32.xlu1 %v920_v32, %s3169_s30  ;;  %939 = vrot.lane.b32.xlu0 %v921_v33, %s3169_s30 }
 0x18d   : > { %v3630_v34 = vpop.permute.xlu1 %543  ;;  %v3632_v36 = vpop.permute.xlu0 %545 }
 0x18f   : > { %941 = vrot.lane.b32.xlu1 %v922_v37, %s3169_s30  ;;  %943 = vrot.lane.b32.xlu0 %v923_v40, %s3169_s30  ;;  %v982_v37 = vmul.f32 %v976_v51, %v3678_v28  ;;  %v983_v40 = vmul.f32 %v976_v51, %v3680_v29 }
 0x191   : > { %v3638_v41 = vpop.permute.xlu1 %547  ;;  %v3640_v44 = vpop.permute.xlu0 %549 }
 0x193   : > { %945 = vrot.lane.b32.xlu1 %v924_v45, %s3169_s30  ;;  %947 = vrot.lane.b32.xlu0 %v925_v47, %s3169_s30  ;;  %v3690_v45 = vld [vmem:[#allocation2 + $0x53] sm:$0xff]  ;;  %v1026_v47 = vstv %s2849_s8  ;;  %s2844_s8 = sld [smem:[#allocation3 + $0x101]] }
 0x195   : > { %v3648_v56 = vpop.permute.xlu1 %551  ;;  %v3650_v57 = vpop.permute.xlu0 %553 }
 0x197   : > { %949 = vrot.lane.b32.xlu1 %v926_v62, %s3169_s30  ;;  %993 = vrot.lane.b32.xlu0 %v977_v63, %s3170_s25 }
 0x199   : > { %v3660_v7 = vpop.permute.xlu1 %555  ;;  %v3662_v10 = vpop.permute.xlu0 %591 }
 0x19a   : > { %5257 = vst [vmem:[#allocation35_spill] sm:$0xff] %v3662_v10  ;;  %v1320_v10 = vstv %s2856_s22  ;;  %s2859_s22 = sld [smem:[#allocation7 + $0x2]] }
 0x19b   : > { %995 = vrot.lane.b32.xlu1 %v978_v11, %s3170_s25  ;;  %997 = vrot.lane.b32.xlu0 %v979_v14, %s3170_s25  ;;  %v984_v11 = vmul.f32 %v976_v51, %v3690_v45  ;;  %v1027_v14 = vmul.f32 %v1026_v47, %v3644_v50 }
 0x19d   : > { %v3672_v19 = vpop.permute.xlu1 %593  ;;  %v3674_v23 = vpop.permute.xlu0 %595 }
 0x19e   : > { %5258 = vst [vmem:[#allocation36_spill] sm:$0xff] %v3672_v19  ;;  %5259 = vst [vmem:[#allocation37_spill] sm:$0xff] %v3674_v23 }
 0x19f   : > { %999 = vrot.lane.b32.xlu1 %v980_v24, %s3170_s25  ;;  %1001 = vrot.lane.b32.xlu0 %v981_v25, %s3170_s25 }
 0x1a1   : > { %v3684_v32 = vpop.permute.xlu1 %597  ;;  %v3686_v33 = vpop.permute.xlu0 %599 }
 0x1a2   : > { %5260 = vst [vmem:[#allocation38_spill] sm:$0xff] %v3684_v32  ;;  %5261 = vst [vmem:[#allocation39_spill] sm:$0xff] %v3686_v33 }
 0x1a3   : > { %1003 = vrot.lane.b32.xlu1 %v982_v37, %s3170_s25  ;;  %1005 = vrot.lane.b32.xlu0 %v983_v40, %s3170_s25  ;;  %v1028_v37 = vmul.f32 %v1026_v47, %v3654_v4  ;;  %v1029_v40 = vmul.f32 %v1026_v47, %v3656_v5 }
 0x1a5   : > { %v3694_v62 = vpop.permute.xlu1 %601  ;;  %v3696_v63 = vpop.permute.xlu0 %603 }
 0x1a6   : > { %5262 = vst [vmem:[#allocation40_spill] sm:$0xff] %v3694_v62  ;;  %5263 = vst [vmem:[#allocation41_spill] sm:$0xff] %v3696_v63  ;;  %v1076_v62 = vstv %s2850_s10  ;;  %s4013_s10 = sld [smem:[#allocation3 + $0x201]] }
 0x1a7   : > { %1007 = vrot.lane.b32.xlu1 %v984_v11, %s3170_s25  ;;  %1043 = vrot.lane.b32.xlu0 %v1027_v14, %s3171_s9  ;;  %v1030_v11 = vmul.f32 %v1026_v47, %v3666_v15  ;;  %v1031_v14 = vmul.f32 %v1026_v47, %v3668_v18 }
 0x1a9   : > { %v3702_v24 = vpop.permute.xlu1 %605  ;;  %v3704_v25 = vpop.permute.xlu0 %641 }
 0x1aa   : > { %5264 = vst [vmem:[#allocation42_spill] sm:$0xff] %v3702_v24 }
 0x1ab   : > { %1045 = vrot.lane.b32.xlu1 %v1028_v37, %s3171_s9  ;;  %1047 = vrot.lane.b32.xlu0 %v1029_v40, %s3171_s9  ;;  %v1032_v37 = vmul.f32 %v1026_v47, %v3678_v28  ;;  %v1033_v40 = vmul.f32 %v1026_v47, %v3680_v29 }
 0x1ad   : > { %v3710_v51 = vpop.permute.xlu1 %643  ;;  %v3712_v30 = vpop.permute.xlu0 %645 }
 0x1af   : > { %1049 = vrot.lane.b32.xlu1 %v1030_v11, %s3171_s9  ;;  %1051 = vrot.lane.b32.xlu0 %v1031_v14, %s3171_s9  ;;  %v1034_v11 = vmul.f32 %v1026_v47, %v3690_v45  ;;  %v1077_v14 = vmul.f32 %v1076_v62, %v3644_v50 }
 0x1b1   : > { %v3718_v24 = vpop.permute.xlu1 %647  ;;  %v3720_v63 = vpop.permute.xlu0 %649 }
 0x1b3   : > { %1053 = vrot.lane.b32.xlu1 %v1032_v37, %s3171_s9  ;;  %1055 = vrot.lane.b32.xlu0 %v1033_v40, %s3171_s9  ;;  %v1078_v37 = vmul.f32 %v1076_v62, %v3654_v4  ;;  %v1079_v40 = vmul.f32 %v1076_v62, %v3656_v5 }
 0x1b5   : > { %v3726_v54 = vpop.permute.xlu1 %651  ;;  %v3728_v27 = vpop.permute.xlu0 %653 }
 0x1b7   : > { %1057 = vrot.lane.b32.xlu1 %v1034_v11, %s3171_s9  ;;  %1093 = vrot.lane.b32.xlu0 %v1077_v14, %s3171_s9  ;;  %v1080_v11 = vmul.f32 %v1076_v62, %v3666_v15  ;;  %v1081_v14 = vmul.f32 %v1076_v62, %v3668_v18 }
 0x1b9   : > { %v3734_v26 = vpop.permute.xlu1 %655  ;;  %v3736_v33 = vpop.permute.xlu0 %691 }
 0x1ba   : > { %5265 = vst [vmem:[#allocation43_spill] sm:$0xff] %v3736_v33 }
 0x1bb   : > { %1095 = vrot.lane.b32.xlu1 %v1078_v37, %s3171_s9  ;;  %1097 = vrot.lane.b32.xlu0 %v1079_v40, %s3171_s9  ;;  %v1082_v37 = vmul.f32 %v1076_v62, %v3678_v28  ;;  %v1083_v40 = vmul.f32 %v1076_v62, %v3680_v29 }
 0x1bd   : > { %v3742_v47 = vpop.permute.xlu1 %693  ;;  %v3744_v32 = vpop.permute.xlu0 %695 }
 0x1be   : > { %5266 = vst [vmem:[#allocation44_spill] sm:$0xff] %v3742_v47  ;;  %5267 = vst [vmem:[#allocation45_spill] sm:$0xff] %v3744_v32  ;;  %v1176_v47 = vstv %s2852_s11  ;;  %s2843_s11 = sld [smem:[#allocation3 + $0x100]] }
 0x1bf   : > { %1099 = vrot.lane.b32.xlu1 %v1080_v11, %s3171_s9  ;;  %1101 = vrot.lane.b32.xlu0 %v1081_v14, %s3171_s9  ;;  %v1084_v11 = vmul.f32 %v1076_v62, %v3690_v45  ;;  %v1127_v14 = vmul.f32 %v1126_v21, %v3644_v50 }
 0x1c1   : > { %v3750_v49 = vpop.permute.xlu1 %697  ;;  %v3752_v48 = vpop.permute.xlu0 %699 }
 0x1c2   : > { %5268 = vst [vmem:[#allocation46_spill] sm:$0xff] %v3750_v49  ;;  %5269 = vst [vmem:[#allocation47_spill] sm:$0xff] %v3752_v48 }
 0x1c3   : > { %1103 = vrot.lane.b32.xlu1 %v1082_v37, %s3171_s9  ;;  %1105 = vrot.lane.b32.xlu0 %v1083_v40, %s3171_s9  ;;  %v1128_v37 = vmul.f32 %v1126_v21, %v3654_v4  ;;  %v1129_v40 = vmul.f32 %v1126_v21, %v3656_v5 }
 0x1c5   : > { %v3758_v32 = vpop.permute.xlu1 %701  ;;  %v3760_v20 = vpop.permute.xlu0 %703 }
 0x1c6   : > { %5270 = vst [vmem:[#allocation48_spill] sm:$0xff] %v3758_v32  ;;  %5271 = vst [vmem:[#allocation49_spill] sm:$0xff] %v3760_v20 }
 0x1c7   : > { %1107 = vrot.lane.b32.xlu1 %v1084_v11, %s3171_s9  ;;  %1143 = vrot.lane.b32.xlu0 %v1127_v14, %s3172_s6  ;;  %v1130_v11 = vmul.f32 %v1126_v21, %v3666_v15  ;;  %v1131_v14 = vmul.f32 %v1126_v21, %v3668_v18 }
 0x1c9   : > { %v3766_v48 = vpop.permute.xlu1 %705  ;;  %v3768_v49 = vpop.permute.xlu0 %741 }
 0x1ca   : > { %5272 = vst [vmem:[#allocation50_spill] sm:$0xff] %v3766_v48 }
 0x1cb   : > { %1145 = vrot.lane.b32.xlu1 %v1128_v37, %s3172_s6  ;;  %1147 = vrot.lane.b32.xlu0 %v1129_v40, %s3172_s6  ;;  %v1132_v37 = vmul.f32 %v1126_v21, %v3678_v28  ;;  %v1133_v40 = vmul.f32 %v1126_v21, %v3680_v29 }
 0x1cd   : > { %v3774_v62 = vpop.permute.xlu1 %743  ;;  %v3776_v20 = vpop.permute.xlu0 %745 }
 0x1cf   : > { %1149 = vrot.lane.b32.xlu1 %v1130_v11, %s3172_s6  ;;  %1151 = vrot.lane.b32.xlu0 %v1131_v14, %s3172_s6  ;;  %v1134_v11 = vmul.f32 %v1126_v21, %v3690_v45  ;;  %v1177_v14 = vmul.f32 %v1176_v47, %v3644_v50 }
 0x1d1   : > { %v3782_v48 = vpop.permute.xlu1 %747  ;;  %v3784_v32 = vpop.permute.xlu0 %749 }
 0x1d3   : > { %1153 = vrot.lane.b32.xlu1 %v1132_v37, %s3172_s6  ;;  %1155 = vrot.lane.b32.xlu0 %v1133_v40, %s3172_s6  ;;  %v1178_v37 = vmul.f32 %v1176_v47, %v3654_v4  ;;  %v1179_v40 = vmul.f32 %v1176_v47, %v3656_v5 }
 0x1d5   : > { %v3790_v23 = vpop.permute.xlu1 %751  ;;  %v3792_v43 = vpop.permute.xlu0 %753 }
 0x1d7   : > { %1157 = vrot.lane.b32.xlu1 %v1134_v11, %s3172_s6  ;;  %1193 = vrot.lane.b32.xlu0 %v1177_v14, %s3172_s6  ;;  %v1180_v11 = vmul.f32 %v1176_v47, %v3666_v15  ;;  %v1181_v14 = vmul.f32 %v1176_v47, %v3668_v18 }
 0x1d9   : > { %v3798_v42 = vpop.permute.xlu1 %755  ;;  %v3800_v19 = vpop.permute.xlu0 %835 }
 0x1da   : > { %5273 = vst [vmem:[#allocation51_spill] sm:$0xff] %v3798_v42  ;;  %5274 = vst [vmem:[#allocation52_spill] sm:$0xff] %v3800_v19  ;;  %v3820_v19 = vld [vmem:[#allocation2 + $0x4] sm:$0xff] }
 0x1db   : > { %1195 = vrot.lane.b32.xlu1 %v1178_v37, %s3172_s6  ;;  %1197 = vrot.lane.b32.xlu0 %v1179_v40, %s3172_s6  ;;  %v1182_v37 = vmul.f32 %v1176_v47, %v3678_v28  ;;  %v1183_v40 = vmul.f32 %v1176_v47, %v3680_v29  ;;  %v3832_v28 = vld [vmem:[#allocation2 + $0x1c] sm:$0xff]  ;;  %v1321_v38 = vmul.f32 %v1320_v10, %v3820_v19 }
 0x1dc   : > { %5282 = vst [vmem:[#allocation60_spill] sm:$0xff] %v3832_v28 }
 0x1dd   : > { %v3806_v21 = vpop.permute.xlu1 %837  ;;  %v3808_v50 = vpop.permute.xlu0 %839 }
 0x1de   : > { %5275 = vst [vmem:[#allocation53_spill] sm:$0xff] %v3806_v21  ;;  %5276 = vst [vmem:[#allocation54_spill] sm:$0xff] %v3808_v50  ;;  %v1270_v21 = vstv %s2855_s14  ;;  %v3856_v50 = vld [vmem:[#allocation2 + $0x4c] sm:$0xff]  ;;  %s2853_s14 = sld [smem:[#allocation3 + $0x200]] }
 0x1df   : > { %1199 = vrot.lane.b32.xlu1 %v1180_v11, %s3172_s6  ;;  %1201 = vrot.lane.b32.xlu0 %v1181_v14, %s3172_s6  ;;  %v1184_v11 = vmul.f32 %v1176_v47, %v3690_v45  ;;  %v1271_v14 = vmul.f32 %v1270_v21, %v3820_v19  ;;  %v3844_v45 = vld [vmem:[#allocation2 + $0x34] sm:$0xff]  ;;  %5287 = vst [vmem:[#allocation65_spill] sm:$0xff] %v3856_v50 }
 0x1e0   : > { %5285 = vst [vmem:[#allocation63_spill] sm:$0xff] %v3844_v45  ;;  %v1277_v17 = vmul.f32 %v1270_v21, %v3856_v50 }
 0x1e1   : > { %v3814_v4 = vpop.permute.xlu1 %841  ;;  %v3816_v5 = vpop.permute.xlu0 %843 }
 0x1e2   : > { %5277 = vst [vmem:[#allocation55_spill] sm:$0xff] %v3814_v4  ;;  %5278 = vst [vmem:[#allocation56_spill] sm:$0xff] %v3816_v5  ;;  %v3830_v5 = vld [vmem:[#allocation2 + $0xc] sm:$0xff]  ;;  %v3854_v4 = vld [vmem:[#allocation2 + $0x3c] sm:$0xff] }
 0x1e3   : > { %1203 = vrot.lane.b32.xlu1 %v1182_v37, %s3172_s6  ;;  %1205 = vrot.lane.b32.xlu0 %v1183_v40, %s3172_s6  ;;  %5281 = vst [vmem:[#allocation59_spill] sm:$0xff] %v3830_v5  ;;  %v1272_v40 = vmul.f32 %v1270_v21, %v3830_v5  ;;  %5286 = vst [vmem:[#allocation64_spill] sm:$0xff] %v3854_v4 }
 0x1e5   : > { %v3824_v15 = vpop.permute.xlu1 %845  ;;  %v3826_v18 = vpop.permute.xlu0 %847 }
 0x1e6   : > { %5279 = vst [vmem:[#allocation57_spill] sm:$0xff] %v3824_v15  ;;  %5280 = vst [vmem:[#allocation58_spill] sm:$0xff] %v3826_v18  ;;  %v1273_v18 = vmul.f32 %v1270_v21, %v3832_v28  ;;  %v3842_v15 = vld [vmem:[#allocation2 + $0x24] sm:$0xff] }
 0x1e7   : > { %1207 = vrot.lane.b32.xlu1 %v1184_v11, %s3172_s6  ;;  %1287 = vrot.lane.b32.xlu0 %v1271_v14, %s3168_s20  ;;  %5284 = vst [vmem:[#allocation62_spill] sm:$0xff] %v3842_v15  ;;  %v1274_v14 = vmul.f32 %v1270_v21, %v3842_v15 }
 0x1e9   : > { %v3836_v29 = vpop.permute.xlu1 %849  ;;  %v3838_v37 = vpop.permute.xlu0 %885 }
 0x1ea   : > { %5283 = vst [vmem:[#allocation61_spill] sm:$0xff] %v3836_v29  ;;  %v1275_v29 = vmul.f32 %v1270_v21, %v3844_v45 }
 0x1eb   : > { %1289 = vrot.lane.b32.xlu1 %v1272_v40, %s3168_s20  ;;  %1291 = vrot.lane.b32.xlu0 %v1273_v18, %s3168_s20  ;;  %v1276_v18 = vmul.f32 %v1270_v21, %v3854_v4 }
 0x1ed   : > { %v3848_v47 = vpop.permute.xlu1 %887  ;;  %v3850_v11 = vpop.permute.xlu0 %889 }
 0x1ef   : > { %1293 = vrot.lane.b32.xlu1 %v1274_v14, %s3168_s20  ;;  %1295 = vrot.lane.b32.xlu0 %v1275_v29, %s3168_s20  ;;  %v1278_v29 = vmul.f32 %v1270_v21, %v3866_v16 }
 0x1f1   : > { %v3860_v33 = vpop.permute.xlu1 %891  ;;  %v3862_v40 = vpop.permute.xlu0 %893 }
 0x1f3   : > { %1297 = vrot.lane.b32.xlu1 %v1276_v18, %s3168_s20  ;;  %1299 = vrot.lane.b32.xlu0 %v1277_v17, %s3168_s20  ;;  %v1322_v18 = vmul.f32 %v1320_v10, %v3830_v5  ;;  %v1323_v17 = vmul.f32 %v1320_v10, %v3832_v28 }
 0x1f5   : > { %v3870_v39 = vpop.permute.xlu1 %895  ;;  %v3872_v14 = vpop.permute.xlu0 %897 }
 0x1f6   : > { %5289 = vst [vmem:[#allocation67_spill] sm:$0xff] %v3870_v39  ;;  %5290 = vst [vmem:[#allocation68_spill] sm:$0xff] %v3872_v14 }
 0x1f7   : > { %1301 = vrot.lane.b32.xlu1 %v1278_v29, %s3168_s20  ;;  %1337 = vrot.lane.b32.xlu0 %v1321_v38, %s3168_s20  ;;  %v1324_v29 = vmul.f32 %v1320_v10, %v3842_v15  ;;  %v1325_v38 = vmul.f32 %v1320_v10, %v3844_v45 }
 0x1f9   : > { %v3878_v13 = vpop.permute.xlu1 %899  ;;  %v3880_v35 = vpop.permute.xlu0 %935 }
 0x1fa   : > { %5291 = vst [vmem:[#allocation69_spill] sm:$0xff] %v3878_v13  ;;  %5292 = vst [vmem:[#allocation70_spill] sm:$0xff] %v3880_v35 }
 0x1fb   : > { %1339 = vrot.lane.b32.xlu1 %v1322_v18, %s3168_s20  ;;  %1341 = vrot.lane.b32.xlu0 %v1323_v17, %s3168_s20  ;;  %v1326_v18 = vmul.f32 %v1320_v10, %v3854_v4  ;;  %v1327_v17 = vmul.f32 %v1320_v10, %v3856_v50 }
 0x1fd   : > { %v3886_v21 = vpop.permute.xlu1 %937  ;;  %v3888_v14 = vpop.permute.xlu0 %939 }
 0x1fe   : > { %5293 = vst [vmem:[#allocation71_spill] sm:$0xff] %v3886_v21  ;;  %5294 = vst [vmem:[#allocation72_spill] sm:$0xff] %v3888_v14 }
 0x1ff   : > { %1343 = vrot.lane.b32.xlu1 %v1324_v29, %s3168_s20  ;;  %1345 = vrot.lane.b32.xlu0 %v1325_v38, %s3168_s20  ;;  %v1328_v29 = vmul.f32 %v1320_v10, %v3866_v16  ;;  %v1371_v38 = vmul.f32 %v1370_v6, %v3820_v19 }
 0x201   : > { %v3894_v35 = vpop.permute.xlu1 %941  ;;  %v3896_v13 = vpop.permute.xlu0 %943 }
 0x202   : > { %5295 = vst [vmem:[#allocation73_spill] sm:$0xff] %v3894_v35  ;;  %5296 = vst [vmem:[#allocation74_spill] sm:$0xff] %v3896_v13 }
 0x203   : > { %1347 = vrot.lane.b32.xlu1 %v1326_v18, %s3168_s20  ;;  %1349 = vrot.lane.b32.xlu0 %v1327_v17, %s3168_s20  ;;  %v1372_v18 = vmul.f32 %v1370_v6, %v3830_v5  ;;  %v1373_v17 = vmul.f32 %v1370_v6, %v3832_v28 }
 0x205   : > { %v3902_v14 = vpop.permute.xlu1 %945  ;;  %v3904_v21 = vpop.permute.xlu0 %947 }
 0x206   : > { %5297 = vst [vmem:[#allocation75_spill] sm:$0xff] %v3902_v14  ;;  %5298 = vst [vmem:[#allocation76_spill] sm:$0xff] %v3904_v21 }
 0x207   : > { %1351 = vrot.lane.b32.xlu1 %v1328_v29, %s3168_s20  ;;  %1387 = vrot.lane.b32.xlu0 %v1371_v38, %s3169_s30  ;;  %v1374_v29 = vmul.f32 %v1370_v6, %v3842_v15  ;;  %v1375_v38 = vmul.f32 %v1370_v6, %v3844_v45 }
 0x209   : > { %v3910_v13 = vpop.permute.xlu1 %949  ;;  %v3912_v35 = vpop.permute.xlu0 %993 }
 0x20a   : > { %5299 = vst [vmem:[#allocation77_spill] sm:$0xff] %v3910_v13 }
 0x20b   : > { %1389 = vrot.lane.b32.xlu1 %v1372_v18, %s3169_s30  ;;  %1391 = vrot.lane.b32.xlu0 %v1373_v17, %s3169_s30  ;;  %v1376_v18 = vmul.f32 %v1370_v6, %v3854_v4  ;;  %v1377_v17 = vmul.f32 %v1370_v6, %v3856_v50 }
 0x20d   : > { %v3918_v21 = vpop.permute.xlu1 %995  ;;  %v3920_v10 = vpop.permute.xlu0 %997 }
 0x20f   : > { %1393 = vrot.lane.b32.xlu1 %v1374_v29, %s3169_s30  ;;  %1395 = vrot.lane.b32.xlu0 %v1375_v38, %s3169_s30  ;;  %v1378_v29 = vmul.f32 %v1370_v6, %v3866_v16 }
 0x211   : > { %v3926_v13 = vpop.permute.xlu1 %999  ;;  %v3928_v14 = vpop.permute.xlu0 %1001 }
 0x212   : > { %5300 = vst [vmem:[#allocation78_spill] sm:$0xff] %v3926_v13  ;;  %5301 = vst [vmem:[#allocation79_spill] sm:$0xff] %v3928_v14 }
 0x213   : > { %1397 = vrot.lane.b32.xlu1 %v1376_v18, %s3169_s30  ;;  %1399 = vrot.lane.b32.xlu0 %v1377_v17, %s3169_s30 }
 0x215   : > { %v3934_v28 = vpop.permute.xlu1 %1003  ;;  %v3936_v15 = vpop.permute.xlu0 %1005 }
 0x216   : > { %5302 = vst [vmem:[#allocation80_spill] sm:$0xff] %v3934_v28  ;;  %5303 = vst [vmem:[#allocation81_spill] sm:$0xff] %v3936_v15 }
 0x217   : > { %1401 = vrot.lane.b32.xlu1 %v1378_v29, %s3169_s30 }
 0x219   : > { %v3940_v38 = vpop.permute.xlu1 %1007  ;;  %v3942_v45 = vpop.permute.xlu0 %1043 }
 0x21a   : > { %5304 = vst [vmem:[#allocation82_spill] sm:$0xff] %v3940_v38  ;;  %5305 = vst [vmem:[#allocation83_spill] sm:$0xff] %v3942_v45 }
 0x21d   : > { %v3944_v5 = vpop.permute.xlu1 %1045  ;;  %v3946_v4 = vpop.permute.xlu0 %1047 }
 0x21e   : > { %5306 = vst [vmem:[#allocation84_spill] sm:$0xff] %v3944_v5  ;;  %5307 = vst [vmem:[#allocation85_spill] sm:$0xff] %v3946_v4 }
 0x221   : > { %v3948_v50 = vpop.permute.xlu1 %1049  ;;  %v3950_v18 = vpop.permute.xlu0 %1051 }
 0x222   : > { %5308 = vst [vmem:[#allocation86_spill] sm:$0xff] %v3948_v50  ;;  %5309 = vst [vmem:[#allocation87_spill] sm:$0xff] %v3950_v18 }
 0x225   : > { %v3952_v17 = vpop.permute.xlu1 %1053  ;;  %v3954_v28 = vpop.permute.xlu0 %1055 }
 0x226   : > { %5310 = vst [vmem:[#allocation88_spill] sm:$0xff] %v3952_v17  ;;  %5311 = vst [vmem:[#allocation89_spill] sm:$0xff] %v3954_v28 }
 0x229   : > { %v3956_v15 = vpop.permute.xlu1 %1057  ;;  %v3958_v6 = vpop.permute.xlu0 %1093 }
 0x22a   : > { %5312 = vst [vmem:[#allocation90_spill] sm:$0xff] %v3956_v15 }
 0x22d   : > { %v3960_v29 = vpop.permute.xlu1 %1095  ;;  %v3962_v16 = vpop.permute.xlu0 %1097 }
 0x231   : > { %v3964_v45 = vpop.permute.xlu1 %1099  ;;  %v3966_v5 = vpop.permute.xlu0 %1101 }
 0x232   : > { %5313 = vst [vmem:[#allocation91_spill] sm:$0xff] %v3964_v45  ;;  %5314 = vst [vmem:[#allocation92_spill] sm:$0xff] %v3966_v5 }
 0x235   : > { %v3968_v4 = vpop.permute.xlu1 %1103  ;;  %v3970_v50 = vpop.permute.xlu0 %1105 }
 0x236   : > { %5315 = vst [vmem:[#allocation93_spill] sm:$0xff] %v3968_v4  ;;  %5316 = vst [vmem:[#allocation94_spill] sm:$0xff] %v3970_v50 }
 0x239   : > { %v3972_v18 = vpop.permute.xlu1 %1107  ;;  %v3974_v17 = vpop.permute.xlu0 %1143 }
 0x23a   : > { %5317 = vst [vmem:[#allocation95_spill] sm:$0xff] %v3972_v18  ;;  %5318 = vst [vmem:[#allocation96_spill] sm:$0xff] %v3974_v17  ;;  %v348_v18 = vstv %s2834_s7  ;;  %s2873_s7 = sld [smem:[#allocation7 + $0x181]] }
 0x23d   : > { %v3976_v28 = vpop.permute.xlu1 %1145  ;;  %v3978_v15 = vpop.permute.xlu0 %1147 }
 0x23e   : > { %5319 = vst [vmem:[#allocation97_spill] sm:$0xff] %v3976_v28  ;;  %5320 = vst [vmem:[#allocation98_spill] sm:$0xff] %v3978_v15  ;;  %v3996_v15 = vld [vmem:[#allocation2] sm:$0xff] }
 0x23f   : > { %5328 = vst [vmem:[#allocation106_spill] sm:$0xff] %v3996_v15 }
 0x241   : > { %v3980_v38 = vpop.permute.xlu1 %1149  ;;  %v3982_v39 = vpop.permute.xlu0 %1151 }
 0x242   : > { %5321 = vst [vmem:[#allocation99_spill] sm:$0xff] %v3980_v38  ;;  %5322 = vst [vmem:[#allocation100_spill] sm:$0xff] %v3982_v39  ;;  %v349_v38 = vmul.f32 %v3996_v15, %v348_v18 }
 0x245   : > { %v3984_v45 = vpop.permute.xlu1 %1153  ;;  %v3986_v5 = vpop.permute.xlu0 %1155 }
 0x246   : > { %5323 = vst [vmem:[#allocation101_spill] sm:$0xff] %v3984_v45  ;;  %5324 = vst [vmem:[#allocation102_spill] sm:$0xff] %v3986_v5  ;;  %v457_v5 = vadd.f32 %v3550_v55, %v349_v38  ;;  %v4005_v45 = vld [vmem:[#allocation2 + $0x18] sm:$0xff]  ;;  %v4018_v38 = vld [vmem:[#allocation2 + $0x20] sm:$0xff] }
 0x247   : > { %5331 = vst [vmem:[#allocation109_spill] sm:$0xff] %v4005_v45  ;;  %v351_v13 = vmul.f32 %v4005_v45, %v348_v18  ;;  %5333 = vst [vmem:[#allocation111_spill] sm:$0xff] %v4018_v38  ;;  %v4023_v45 = vld [vmem:[#allocation2 + $0x30] sm:$0xff] }
 0x249   : > { %v3988_v4 = vpop.permute.xlu1 %1157  ;;  %v3990_v50 = vpop.permute.xlu0 %1193 }
 0x24a   : > { %5325 = vst [vmem:[#allocation103_spill] sm:$0xff] %v3988_v4  ;;  %v350_v4 = vmul.f32 %v348_v18, %v3400_v22  ;;  %v352_v22 = vmul.f32 %v4018_v38, %v348_v18 }
 0x24c   : > { %v458_v15 = vadd.f32 %v3560_v60, %v350_v4 }
 0x24d   : > { %v3992_v14 = vpop.permute.xlu1 %1195  ;;  %v3994_v17 = vpop.permute.xlu0 %1197 }
 0x24e   : > { %5326 = vst [vmem:[#allocation104_spill] sm:$0xff] %v3992_v14  ;;  %5327 = vst [vmem:[#allocation105_spill] sm:$0xff] %v3994_v17  ;;  %v565_v14 = vadd.f32 %v3624_v31, %v457_v5  ;;  %v353_v31 = vmul.f32 %v4023_v45, %v348_v18  ;;  %v566_v5 = vadd.f32 %v3630_v34, %v458_v15  ;;  %v4039_v15 = vld [vmem:[#allocation2 + $0x38] sm:$0xff] }
 0x250   : > { %v665_v55 = vadd.f32 %v3704_v25, %v565_v14  ;;  %v461_v4 = vadd.f32 %v3574_v3, %v353_v31  ;;  %v666_v14 = vadd.f32 %v3710_v51, %v566_v5 }
 0x251   : > { %v3999_v39 = vpop.permute.xlu1 %1199  ;;  %v4001_v28 = vpop.permute.xlu0 %1201 }
 0x252   : > { %5329 = vst [vmem:[#allocation107_spill] sm:$0xff] %v3999_v39  ;;  %5330 = vst [vmem:[#allocation108_spill] sm:$0xff] %v4001_v28  ;;  %v459_v28 = vadd.f32 %v3562_v61, %v351_v13  ;;  %v4021_v39 = vstv %s2844_s8  ;;  %v765_v60 = vadd.f32 %v3768_v49, %v665_v55  ;;  %v460_v61 = vadd.f32 %v3572_v2, %v352_v22  ;;  %s2862_s8 = sld [smem:[#allocation7 + $0x80]] }
 0x253   : > { %v801_v34 = vmul.f32 %v4021_v39, %v3532_v46  ;;  %v354_v49 = vmul.f32 %v4039_v15, %v348_v18  ;;  %v569_v3 = vadd.f32 %v3640_v44, %v461_v4  ;;  %v766_v51 = vadd.f32 %v3774_v62, %v666_v14  ;;  %v4065_v62 = vld [vmem:[#allocation2 + $0x50] sm:$0xff] }
 0x255   : > { %v4009_v17 = vpop.permute.xlu1 %1203  ;;  %v4011_v42 = vpop.permute.xlu0 %1205  ;;  %v462_v55 = vadd.f32 %v3582_v8, %v354_v49  ;;  %v803_v8 = vmul.f32 %v4021_v39, %v3544_v53 }
 0x256   : > { %5332 = vst [vmem:[#allocation110_spill] sm:$0xff] %v4011_v42  ;;  %v567_v42 = vadd.f32 %v3632_v36, %v459_v28  ;;  %v4042_v36 = vld [vmem:[#allocation2 + $0x48] sm:$0xff]  ;;  %v568_v28 = vadd.f32 %v3638_v41, %v460_v61  ;;  %v669_v41 = vadd.f32 %v3720_v63, %v569_v3 }
 0x257   : > { %v355_v2 = vmul.f32 %v4042_v36, %v348_v18 }
 0x258   : > { %v667_v38 = vadd.f32 %v3712_v30, %v567_v42  ;;  %v809_v30 = vadd.f32 %v801_v34, %v765_v60  ;;  %v668_v22 = vadd.f32 %v3718_v24, %v568_v28  ;;  %v570_v24 = vadd.f32 %v3648_v56, %v462_v55 }
 0x259   : > { %v4030_v13 = vpop.permute.xlu1 %1207  ;;  %v4032_v25 = vpop.permute.xlu0 %1287  ;;  %v463_v46 = vadd.f32 %v3584_v9, %v355_v2  ;;  %v356_v9 = vmul.f32 %v4065_v62, %v348_v18  ;;  %v769_v63 = vadd.f32 %v3784_v32, %v669_v41  ;;  %v804_v18 = vmul.f32 %v4021_v39, %v3554_v58  ;;  %v5339_v41 = vld [vmem:[#allocation105_spill] sm:$0xff] }
 0x25a   : > { %5334 = vst [vmem:[#allocation112_spill] sm:$0xff] %v4032_v25  ;;  %v767_v42 = vadd.f32 %v3776_v20, %v667_v38  ;;  %v4057_v25 = vstv %s4013_s10  ;;  %v909_v44 = vadd.f32 %v3838_v37, %v809_v30  ;;  %v802_v20 = vmul.f32 %v4021_v39, %v3542_v52  ;;  %s2863_s10 = sld [smem:[#allocation7 + $0x81]] }
 0x25b   : > { %v571_v38 = vadd.f32 %v3650_v57, %v463_v46  ;;  %v768_v60 = vadd.f32 %v3782_v48, %v668_v22  ;;  %v464_v52 = vadd.f32 %v3590_v12, %v356_v9  ;;  %v670_v53 = vadd.f32 %v3726_v54, %v570_v24  ;;  %v5338_v46 = vld [vmem:[#allocation104_spill] sm:$0xff]  ;;  %v5342_v9 = vld [vmem:[#allocation91_spill] sm:$0xff] }
 0x25c   : > { %v810_v61 = vadd.f32 %v802_v20, %v766_v51  ;;  %v811_v37 = vadd.f32 %v803_v8, %v767_v42  ;;  %v1017_v4 = vadd.f32 %v3912_v35, %v909_v44  ;;  %v805_v35 = vmul.f32 %v4021_v39, %v3556_v59  ;;  %v5336_v42 = vld [vmem:[#allocation78_spill] sm:$0xff]  ;;  %v5340_v20 = vld [vmem:[#allocation67_spill] sm:$0xff] }
 0x25d   : > { %v4052_v31 = vpop.permute.xlu1 %1289  ;;  %v4054_v5 = vpop.permute.xlu0 %1291  ;;  %v671_v14 = vadd.f32 %v3728_v27, %v571_v38  ;;  %v572_v54 = vadd.f32 %v3660_v7, %v464_v52  ;;  %v770_v27 = vadd.f32 %v3790_v23, %v670_v53  ;;  %v812_v58 = vadd.f32 %v804_v18, %v768_v60  ;;  %v5341_v8 = vld [vmem:[#allocation26_spill] sm:$0xff]  ;;  %v5345_v52 = vld [vmem:[#allocation92_spill] sm:$0xff] }
 0x25e   : > { %v910_v48 = vadd.f32 %v3848_v47, %v810_v61  ;;  %v911_v32 = vadd.f32 %v3850_v11, %v811_v37  ;;  %v1117_v12 = vadd.f32 %v3958_v6, %v1017_v4  ;;  %v813_v49 = vadd.f32 %v805_v35, %v769_v63  ;;  %v5343_v63 = vld [vmem:[#allocation59_spill] sm:$0xff]  ;;  %v5344_v37 = vld [vmem:[#allocation68_spill] sm:$0xff] }
 0x25f   : > { %v771_v34 = vadd.f32 %v3792_v43, %v671_v14  ;;  %v672_v11 = vadd.f32 %v3734_v26, %v572_v54  ;;  %v912_v59 = vadd.f32 %v3860_v33, %v812_v58  ;;  %v806_v6 = vmul.f32 %v4021_v39, %v3566_v0  ;;  %v5335_v33 = vld [vmem:[#allocation51_spill] sm:$0xff]  ;;  %v5346_v18 = vld [vmem:[#allocation60_spill] sm:$0xff] }
 0x260   : > { %v1018_v2 = vadd.f32 %v3918_v21, %v910_v48  ;;  %v1019_v28 = vadd.f32 %v3920_v10, %v911_v32  ;;  %v1217_v47 = vadd.f32 %v3990_v50, %v1117_v12  ;;  %v807_v7 = vmul.f32 %v4021_v39, %v3568_v1  ;;  %v5337_v1 = vld [vmem:[#allocation79_spill] sm:$0xff]  ;;  %v5347_v35 = vld [vmem:[#allocation80_spill] sm:$0xff] }
 0x261   : > { %v4078_v56 = vpop.permute.xlu1 %1293  ;;  %v4080_v57 = vpop.permute.xlu0 %1295  ;;  %v913_v21 = vadd.f32 %v3862_v40, %v813_v49  ;;  %v1253_v26 = vmul.f32 %v4057_v25, %v3820_v19  ;;  %v772_v3 = vadd.f32 %v5335_v33, %v672_v11  ;;  %v814_v51 = vadd.f32 %v806_v6, %v770_v27  ;;  %v5349_v27 = vld [vmem:[#allocation81_spill] sm:$0xff]  ;;  %v5350_v58 = vld [vmem:[#allocation108_spill] sm:$0xff] }
 0x262   : > { %v1118_v10 = vadd.f32 %v3960_v29, %v1018_v2  ;;  %v1119_v50 = vadd.f32 %v3962_v16, %v1019_v28  ;;  %v815_v0 = vadd.f32 %v807_v7, %v771_v34  ;;  %v1020_v30 = vadd.f32 %v5336_v42, %v912_v59  ;;  %v5352_v7 = vld [vmem:[#allocation62_spill] sm:$0xff] }
 0x263   : > { %v1021_v55 = vadd.f32 %v5337_v1, %v913_v21  ;;  %v1261_v40 = vadd.f32 %v1253_v26, %v1217_v47  ;;  %v914_v29 = vadd.f32 %v5340_v20, %v814_v51  ;;  %v808_v16 = vmul.f32 %v4021_v39, %v5341_v8  ;;  %v5348_v39 = vld [vmem:[#allocation107_spill] sm:$0xff]  ;;  %v5351_v47 = vld [vmem:[#allocation69_spill] sm:$0xff] }
 0x264   : > { %v1218_v22 = vadd.f32 %v5338_v46, %v1118_v10  ;;  %v1219_v44 = vadd.f32 %v5339_v41, %v1119_v50  ;;  %v1120_v24 = vadd.f32 %v5342_v9, %v1020_v30  ;;  %v1254_v61 = vmul.f32 %v4057_v25, %v5343_v63  ;;  %v5353_v10 = vld [vmem:[#allocation63_spill] sm:$0xff]  ;;  %v5354_v26 = vld [vmem:[#allocation93_spill] sm:$0xff]  ;;  %v5356_v30 = vld [vmem:[#allocation82_spill] sm:$0xff] }
 0x265   : > { %v4099_v23 = vpop.permute.xlu1 %1297  ;;  %v4101_v43 = vpop.permute.xlu0 %1299  ;;  %v915_v4 = vadd.f32 %v5344_v37, %v815_v0  ;;  %v1121_v53 = vadd.f32 %v5345_v52, %v1021_v55  ;;  %v1255_v48 = vmul.f32 %v4057_v25, %v5346_v18  ;;  %v816_v32 = vadd.f32 %v808_v16, %v772_v3  ;;  %v5355_v3 = vld [vmem:[#allocation94_spill] sm:$0xff]  ;;  %v5359_v16 = vld [vmem:[#allocation95_spill] sm:$0xff] }
 0x266   : > { %v1022_v12 = vadd.f32 %v5347_v35, %v914_v29  ;;  %v1220_v54 = vadd.f32 %v5348_v39, %v1120_v24  ;;  %v1262_v2 = vadd.f32 %v1254_v61, %v1218_v22  ;;  %v1256_v21 = vmul.f32 %v4057_v25, %v5352_v7  ;;  %v5357_v22 = vld [vmem:[#allocation110_spill] sm:$0xff]  ;;  %v5358_v29 = vld [vmem:[#allocation64_spill] sm:$0xff]  ;;  %v5360_v61 = vld [vmem:[#allocation65_spill] sm:$0xff] }
 0x267   : > { %v1023_v34 = vadd.f32 %v5349_v27, %v915_v4  ;;  %v1221_v49 = vadd.f32 %v5350_v58, %v1121_v53  ;;  %v1263_v28 = vadd.f32 %v1255_v48, %v1219_v44  ;;  %v916_v11 = vadd.f32 %v5351_v47, %v816_v32  ;;  %v5361_v35 = vld [vmem:[#allocation66_spill] sm:$0xff] }
 0x268   : > { %v1257_v50 = vmul.f32 %v4057_v25, %v5353_v10  ;;  %v1122_v33 = vadd.f32 %v5354_v26, %v1022_v12  ;;  %v1264_v55 = vadd.f32 %v1256_v21, %v1220_v54  ;;  %v1258_v8 = vmul.f32 %v4057_v25, %v5358_v29  ;;  %v5366_v21 = vld [vmem:[#allocation19_spill] sm:$0xff]  ;;  %v5367_v26 = vld [vmem:[#allocation20_spill] sm:$0xff] }
 0x269   : > { %v4117_v38 = vpop.permute.xlu1 %1301  ;;  %v1338_v60 = vpop.permute.xlu0 %1337  ;;  %v1123_v51 = vadd.f32 %v5355_v3, %v1023_v34  ;;  %v1024_v1 = vadd.f32 %v5356_v30, %v916_v11  ;;  %v1259_v37 = vmul.f32 %v4057_v25, %v5360_v61  ;;  %v1260_v12 = vmul.f32 %v4057_v25, %v5361_v35  ;;  %v5362_v34 = vld [vmem:[#allocation106_spill] sm:$0xff]  ;;  %v5364_v25 = vld [vmem:[#allocation109_spill] sm:$0xff]  ;;  %v5368_v3 = vld [vmem:[#allocation35_spill] sm:$0xff] }
 0x26a   : > { %v1361_v14 = vadd.f32 %v1338_v60, %v1261_v40  ;;  %v1222_v46 = vadd.f32 %v4009_v17, %v1122_v33  ;;  %v1265_v44 = vadd.f32 %v1257_v50, %v1221_v49  ;;  %v330_v27 = vstv %s329_s29  ;;  %v5363_v49 = vld [vmem:[#allocation18_spill] sm:$0xff]  ;;  %s2864_s29 = sld [smem:[#allocation7 + $0x82]] }
 0x26b   : > { %v1223_v41 = vadd.f32 %v5357_v22, %v1123_v51  ;;  %v1124_v9 = vadd.f32 %v5359_v16, %v1024_v1  ;;  %v331_v58 = vmul.f32 %v5362_v34, %v330_v27  ;;  %v333_v11 = vmul.f32 %v5364_v25, %v330_v27  ;;  %v5379_v34 = vld [vmem:[#allocation31_spill] sm:$0xff] }
 0x26c   : > { %1427 = vrot.lane.b32.xlu0 %v1361_v14, %s3171_s9  ;;  %v1266_v4 = vadd.f32 %v1258_v8, %v1222_v46  ;;  %v4163_v30 = vstv %s2843_s11  ;;  %v335_v22 = vmul.f32 %v4023_v45, %v330_v27  ;;  %v5373_v8 = vld [vmem:[#allocation36_spill] sm:$0xff]  ;;  %s2865_s11 = sld [smem:[#allocation7 + $0x83]] }
 0x26d   : > { %v1340_v59 = vpop.permute.xlu1 %1339  ;;  %v1342_v6 = vpop.permute.xlu0 %1341  ;;  %v1224_v17 = vadd.f32 %v4030_v13, %v1124_v9  ;;  %v1267_v52 = vadd.f32 %v1259_v37, %v1223_v41  ;;  %v409_v33 = vadd.f32 %v5367_v26, %v333_v11  ;;  %v5371_v41 = vld [vmem:[#allocation29_spill] sm:$0xff]  ;;  %v5377_v45 = vld [vmem:[#allocation44_spill] sm:$0xff] }
 0x26e   : > { %v1362_v0 = vadd.f32 %v1340_v59, %v1262_v2  ;;  %v1363_v42 = vadd.f32 %v1342_v6, %v1263_v28  ;;  %v407_v2 = vadd.f32 %v5363_v49, %v331_v58  ;;  %v2988_v28 = vld [vmem:[#allocation2 + $0x8] sm:$0xff]  ;;  %v5374_v9 = vld [vmem:[#allocation21_spill] sm:$0xff]  ;;  %v5382_v11 = vld [vmem:[#allocation24_spill] sm:$0xff] }
 0x26f   : > { %v1268_v39 = vadd.f32 %v1260_v12, %v1224_v17  ;;  %v332_v47 = vmul.f32 %v2988_v28, %v330_v27  ;;  %v5365_v59 = vld [vmem:[#allocation27_spill] sm:$0xff]  ;;  %v5376_v17 = vld [vmem:[#allocation37_spill] sm:$0xff]  ;;  %v4179_v12 = vstv %s2853_s14  ;;  %s2866_s14 = sld [smem:[#allocation7 + $0x84]] }
 0x270   : > { %1429 = vrot.lane.b32.xlu1 %v1362_v0, %s3171_s9  ;;  %1431 = vrot.lane.b32.xlu0 %v1363_v42, %s3171_s9  ;;  %v507_v6 = vadd.f32 %v5365_v59, %v407_v2  ;;  %v5369_v0 = vld [vmem:[#allocation28_spill] sm:$0xff]  ;;  %v5380_v49 = vld [vmem:[#allocation45_spill] sm:$0xff] }
 0x271   : > { %v1344_v40 = vpop.permute.xlu1 %1343  ;;  %v1346_v20 = vpop.permute.xlu0 %1345  ;;  %v408_v50 = vadd.f32 %v5366_v21, %v332_v47  ;;  %v5381_v47 = vld [vmem:[#allocation23_spill] sm:$0xff] }
 0x272   : > { %v1364_v24 = vadd.f32 %v1344_v40, %v1264_v55  ;;  %v1365_v60 = vadd.f32 %v1346_v20, %v1265_v44  ;;  %v615_v51 = vadd.f32 %v5368_v3, %v507_v6  ;;  %v5370_v55 = vld [vmem:[#allocation111_spill] sm:$0xff]  ;;  %v509_v44 = vadd.f32 %v5371_v41, %v409_v33  ;;  %v5387_v41 = vld [vmem:[#allocation33_spill] sm:$0xff] }
 0x273   : > { %v508_v42 = vadd.f32 %v5369_v0, %v408_v50  ;;  %v334_v46 = vmul.f32 %v5370_v55, %v330_v27  ;;  %v5372_v40 = vld [vmem:[#allocation43_spill] sm:$0xff]  ;;  %v5383_v50 = vld [vmem:[#allocation38_spill] sm:$0xff] }
 0x274   : > { %1433 = vrot.lane.b32.xlu1 %v1364_v24, %s3171_s9  ;;  %1435 = vrot.lane.b32.xlu0 %v1365_v60, %s3171_s9  ;;  %v715_v20 = vadd.f32 %v5372_v40, %v615_v51  ;;  %v5375_v60 = vld [vmem:[#allocation22_spill] sm:$0xff]  ;;  %v5384_v33 = vld [vmem:[#allocation39_spill] sm:$0xff]  ;;  %v5385_v51 = vld [vmem:[#allocation52_spill] sm:$0xff] }
 0x275   : > { %v1348_v53 = vpop.permute.xlu1 %1347  ;;  %v1350_v14 = vpop.permute.xlu0 %1349  ;;  %v616_v16 = vadd.f32 %v5373_v8, %v508_v42  ;;  %v410_v24 = vadd.f32 %v5374_v9, %v334_v46  ;;  %v411_v37 = vadd.f32 %v5375_v60, %v335_v22  ;;  %v2991_v42 = vld [vmem:[#allocation2 + $0x1a] sm:$0xff]  ;;  %v5386_v46 = vld [vmem:[#allocation32_spill] sm:$0xff] }
 0x276   : > { %v1366_v48 = vadd.f32 %v1348_v53, %v1266_v4  ;;  %v1367_v32 = vadd.f32 %v1350_v14, %v1267_v52  ;;  %v617_v4 = vadd.f32 %v5376_v17, %v509_v44  ;;  %v2989_v52 = vld [vmem:[#allocation2 + $0x2] sm:$0xff]  ;;  %v336_v14 = vmul.f32 %v4039_v15, %v330_v27  ;;  %v5391_v17 = vld [vmem:[#allocation25_spill] sm:$0xff] }
 0x277   : > { %v783_v53 = vmul.f32 %v2989_v52, %v4163_v30  ;;  %v511_v58 = vadd.f32 %v5379_v34, %v411_v37  ;;  %v338_v15 = vmul.f32 %v4065_v62, %v330_v27  ;;  %v785_v55 = vmul.f32 %v2991_v42, %v4163_v30  ;;  %v2992_v62 = vld [vmem:[#allocation2 + $0x22] sm:$0xff]  ;;  %v5392_v52 = vld [vmem:[#allocation40_spill] sm:$0xff] }
 0x278   : > { %1437 = vrot.lane.b32.xlu1 %v1366_v48, %s3171_s9  ;;  %1439 = vrot.lane.b32.xlu0 %v1367_v32, %s3171_s9  ;;  %v337_v48 = vmul.f32 %v4042_v36, %v330_v27  ;;  %v716_v32 = vadd.f32 %v5377_v45, %v616_v16  ;;  %v717_v2 = vadd.f32 %v5380_v49, %v617_v4  ;;  %v2990_v36 = vld [vmem:[#allocation2 + $0xa] sm:$0xff]  ;;  %v5390_v60 = vld [vmem:[#allocation70_spill] sm:$0xff]  ;;  %v5394_v45 = vld [vmem:[#allocation53_spill] sm:$0xff] }
 0x279   : > { %v1352_v54 = vpop.permute.xlu1 %1351  ;;  %v4165_v1 = vpop.permute.xlu0 %1387  ;;  %v791_v28 = vadd.f32 %v783_v53, %v715_v20  ;;  %v412_v25 = vadd.f32 %v5381_v47, %v336_v14  ;;  %v784_v6 = vmul.f32 %v2990_v36, %v4163_v30  ;;  %v619_v3 = vadd.f32 %v5384_v33, %v511_v58  ;;  %v5388_v20 = vld [vmem:[#allocation46_spill] sm:$0xff]  ;;  %v5389_v16 = vld [vmem:[#allocation47_spill] sm:$0xff]  ;;  %v5393_v14 = vld [vmem:[#allocation41_spill] sm:$0xff] }
 0x27a   : > { %v1368_v13 = vadd.f32 %v1352_v54, %v1268_v39  ;;  %v5378_v54 = vld [vmem:[#allocation30_spill] sm:$0xff]  ;;  %v413_v59 = vadd.f32 %v5382_v11, %v337_v48  ;;  %v786_v27 = vmul.f32 %v2992_v62, %v4163_v30  ;;  %v414_v4 = vadd.f32 %v5391_v17, %v338_v15  ;;  %v2993_v58 = vld [vmem:[#allocation2 + $0x32] sm:$0xff]  ;;  %v5396_v47 = vld [vmem:[#allocation83_spill] sm:$0xff] }
 0x27b   : > { %v859_v0 = vadd.f32 %v5385_v51, %v791_v28  ;;  %v512_v22 = vadd.f32 %v5386_v46, %v412_v25  ;;  %v792_v40 = vadd.f32 %v784_v6, %v716_v32  ;;  %v719_v9 = vadd.f32 %v5389_v16, %v619_v3  ;;  %v5395_v32 = vld [vmem:[#allocation54_spill] sm:$0xff]  ;;  %v5398_v15 = vld [vmem:[#allocation48_spill] sm:$0xff]  ;;  %v5399_v6 = vld [vmem:[#allocation49_spill] sm:$0xff] }
 0x27c   : > { %1441 = vrot.lane.b32.xlu1 %v1368_v13, %s3171_s9  ;;  %v510_v13 = vadd.f32 %v5378_v54, %v410_v24  ;;  %v513_v44 = vadd.f32 %v5387_v41, %v413_v59  ;;  %v793_v24 = vadd.f32 %v785_v55, %v717_v2  ;;  %v787_v49 = vmul.f32 %v2993_v58, %v4163_v30  ;;  %v2994_v28 = vld [vmem:[#allocation2 + $0x3a] sm:$0xff]  ;;  %v5401_v42 = vld [vmem:[#allocation72_spill] sm:$0xff] }
 0x27d   : > { %v4181_v39 = vpop.permute.xlu1 %1389  ;;  %v4190_v21 = vpop.permute.xlu0 %1391  ;;  %v959_v37 = vadd.f32 %v5390_v60, %v859_v0  ;;  %v620_v53 = vadd.f32 %v5392_v52, %v512_v22  ;;  %v860_v54 = vadd.f32 %v5394_v45, %v792_v40  ;;  %v788_v2 = vmul.f32 %v2994_v28, %v4163_v30  ;;  %v5397_v11 = vld [vmem:[#allocation34_spill] sm:$0xff]  ;;  %v5402_v46 = vld [vmem:[#allocation96_spill] sm:$0xff] }
 0x27e   : > { %v618_v26 = vadd.f32 %v5383_v50, %v510_v13  ;;  %v621_v48 = vadd.f32 %v5393_v14, %v513_v44  ;;  %v861_v34 = vadd.f32 %v5395_v32, %v793_v24  ;;  %v514_v59 = vadd.f32 %v5397_v11, %v414_v4  ;;  %v5403_v41 = vld [vmem:[#allocation42_spill] sm:$0xff]  ;;  %v2995_v40 = vld [vmem:[#allocation2 + $0x4a] sm:$0xff] }
 0x27f   : > { %v1067_v25 = vadd.f32 %v5396_v47, %v959_v37  ;;  %v720_v36 = vadd.f32 %v5398_v15, %v620_v53  ;;  %v795_v0 = vadd.f32 %v787_v49, %v719_v9  ;;  %v789_v62 = vmul.f32 %v2995_v40, %v4163_v30  ;;  %v5404_v24 = vld [vmem:[#allocation84_spill] sm:$0xff]  ;;  %v5405_v37 = vld [vmem:[#allocation55_spill] sm:$0xff]  ;;  %v5408_v53 = vld [vmem:[#allocation50_spill] sm:$0xff] }
 0x280   : > { %v718_v8 = vadd.f32 %v5388_v20, %v618_v26  ;;  %v721_v50 = vadd.f32 %v5399_v6, %v621_v48  ;;  %v5400_v26 = vld [vmem:[#allocation71_spill] sm:$0xff]  ;;  %v961_v55 = vadd.f32 %v5401_v42, %v861_v34  ;;  %v622_v44 = vadd.f32 %v5403_v41, %v514_v59  ;;  %v2996_v20 = vld [vmem:[#allocation2 + $0x52] sm:$0xff]  ;;  %v5411_v49 = vld [vmem:[#allocation74_spill] sm:$0xff] }
 0x281   : > { %v4206_v13 = vpop.permute.xlu1 %1393  ;;  %v960_v33 = vadd.f32 %v5400_v26, %v860_v54  ;;  %v4216_v3 = vpop.permute.xlu0 %1395  ;;  %v1167_v22 = vadd.f32 %v5402_v46, %v1067_v25  ;;  %v790_v16 = vmul.f32 %v2996_v20, %v4163_v30  ;;  %v5406_v4 = vld [vmem:[#allocation56_spill] sm:$0xff]  ;;  %v1235_v9 = vmul.f32 %v4179_v12, %v3820_v19  ;;  %v5409_v54 = vld [vmem:[#allocation97_spill] sm:$0xff]  ;;  %v5412_v47 = vld [vmem:[#allocation98_spill] sm:$0xff] }
 0x282   : > { %v794_v51 = vadd.f32 %v786_v27, %v718_v8  ;;  %v863_v52 = vadd.f32 %v5406_v4, %v795_v0  ;;  %v5407_v27 = vld [vmem:[#allocation85_spill] sm:$0xff]  ;;  %v722_v14 = vadd.f32 %v5408_v53, %v622_v44  ;;  %v796_v48 = vadd.f32 %v788_v2, %v720_v36  ;;  %v5414_v6 = vld [vmem:[#allocation58_spill] sm:$0xff]  ;;  %v5417_v42 = vld [vmem:[#allocation112_spill] sm:$0xff] }
 0x283   : > { %v1068_v60 = vadd.f32 %v5404_v24, %v960_v33  ;;  %v1069_v8 = vadd.f32 %v5407_v27, %v961_v55  ;;  %v797_v45 = vadd.f32 %v789_v62, %v721_v50  ;;  %v5410_v30 = vld [vmem:[#allocation73_spill] sm:$0xff]  ;;  %v1243_v11 = vadd.f32 %v1235_v9, %v1167_v22  ;;  %v5415_v50 = vld [vmem:[#allocation86_spill] sm:$0xff]  ;;  %v5418_v41 = vld [vmem:[#allocation75_spill] sm:$0xff] }
 0x284   : > { %v862_v17 = vadd.f32 %v5405_v37, %v794_v51  ;;  %v963_v28 = vadd.f32 %v5411_v49, %v863_v52  ;;  %v5413_v59 = vld [vmem:[#allocation57_spill] sm:$0xff]  ;;  %v1236_v19 = vmul.f32 %v4179_v12, %v5343_v63  ;;  %v1237_v2 = vmul.f32 %v4179_v12, %v5346_v18  ;;  %v5416_v51 = vld [vmem:[#allocation87_spill] sm:$0xff]  ;;  %v5419_v40 = vld [vmem:[#allocation76_spill] sm:$0xff] }
 0x285   : > { %v1168_v32 = vadd.f32 %v5409_v54, %v1068_v60  ;;  %v4231_v34 = vpop.permute.xlu1 %1397  ;;  %v1169_v25 = vadd.f32 %v5412_v47, %v1069_v8  ;;  %v864_v15 = vadd.f32 %v5413_v59, %v796_v48  ;;  %v865_v26 = vadd.f32 %v5414_v6, %v797_v45  ;;  %v1400_v36 = vpop.permute.xlu0 %1399  ;;  %v5420_v63 = vld [vmem:[#allocation99_spill] sm:$0xff]  ;;  %v5421_v60 = vld [vmem:[#allocation100_spill] sm:$0xff]  ;;  %v5422_v4 = vld [vmem:[#allocation61_spill] sm:$0xff] }
 0x286   : > { %v962_v58 = vadd.f32 %v5410_v30, %v862_v17  ;;  %v1071_v0 = vadd.f32 %v5416_v51, %v963_v28  ;;  %v1311_v55 = vadd.f32 %v5417_v42, %v1243_v11  ;;  %v1238_v46 = vmul.f32 %v4179_v12, %v5352_v7  ;;  %v5423_v27 = vld [vmem:[#allocation88_spill] sm:$0xff]  ;;  %v5424_v9 = vld [vmem:[#allocation89_spill] sm:$0xff]  ;;  %v5427_v49 = vld [vmem:[#allocation102_spill] sm:$0xff] }
 0x287   : > { %v798_v22 = vadd.f32 %v790_v16, %v722_v14  ;;  %v964_v44 = vadd.f32 %v5418_v41, %v864_v15  ;;  %v965_v62 = vadd.f32 %v5419_v40, %v865_v26  ;;  %v1244_v20 = vadd.f32 %v1236_v19, %v1168_v32  ;;  %v5425_v32 = vld [vmem:[#allocation77_spill] sm:$0xff]  ;;  %v5429_v51 = vld [vmem:[#allocation103_spill] sm:$0xff] }
 0x288   : > { %v1070_v33 = vadd.f32 %v5415_v50, %v962_v58  ;;  %v1171_v18 = vadd.f32 %v5421_v60, %v1071_v0  ;;  %v1245_v37 = vadd.f32 %v1237_v2, %v1169_v25  ;;  %v1411_v17 = vadd.f32 %v4165_v1, %v1311_v55  ;;  %v5426_v30 = vld [vmem:[#allocation101_spill] sm:$0xff] }
 0x289   : > { %v866_v52 = vadd.f32 %v5422_v4, %v798_v22  ;;  %v1072_v8 = vadd.f32 %v5423_v27, %v964_v44  ;;  %v1073_v7 = vadd.f32 %v5424_v9, %v965_v62  ;;  %v1402_v16 = vpop.permute.xlu1 %1401  ;;  %v1312_v14 = vadd.f32 %v4052_v31, %v1244_v20  ;;  %v5428_v31 = vld [vmem:[#allocation90_spill] sm:$0xff] }
 0x28a   : > { %v1170_v24 = vadd.f32 %v5420_v63, %v1070_v33  ;;  %v1313_v48 = vadd.f32 %v4054_v5, %v1245_v37  ;;  %v1239_v45 = vmul.f32 %v4179_v12, %v5353_v10  ;;  %v1240_v10 = vmul.f32 %v4179_v12, %v5358_v29 }
 0x28b   : > { %v966_v1 = vadd.f32 %v5425_v32, %v866_v52  ;;  %v1172_v58 = vadd.f32 %v5426_v30, %v1072_v8  ;;  %v1173_v28 = vadd.f32 %v5427_v49, %v1073_v7  ;;  %v1412_v11 = vadd.f32 %v4181_v39, %v1312_v14 }
 0x28c   : > { %v1246_v47 = vadd.f32 %v1238_v46, %v1170_v24  ;;  %v1247_v25 = vadd.f32 %v1239_v45, %v1171_v18  ;;  %v1413_v59 = vadd.f32 %v4190_v21, %v1313_v48  ;;  %v1241_v15 = vmul.f32 %v4179_v12, %v5360_v61 }
 0x28d   : > { %v1074_v5 = vadd.f32 %v5428_v31, %v966_v1  ;;  %v1248_v50 = vadd.f32 %v1240_v10, %v1172_v58  ;;  %v1553_v24 = vstv %s2859_s22  ;;  %s2869_s22 = sld [smem:[#allocation7 + $0x102]] }
 0x28e   : > { %v1314_v39 = vadd.f32 %v4078_v56, %v1246_v47  ;;  %v1315_v21 = vadd.f32 %v4080_v57, %v1247_v25  ;;  %v1249_v33 = vadd.f32 %v1241_v15, %v1173_v28  ;;  %v1242_v56 = vmul.f32 %v4179_v12, %v5361_v35 }
 0x28f   : > { %v1174_v0 = vadd.f32 %v5429_v51, %v1074_v5  ;;  %v1316_v55 = vadd.f32 %v4099_v23, %v1248_v50  ;;  %v1653_v15 = vstv %s2861_s23  ;;  %s2871_s23 = sld [smem:[#allocation7 + $0x104]] }
 0x290   : > { %v1414_v42 = vadd.f32 %v4206_v13, %v1314_v39  ;;  %v1415_v29 = vadd.f32 %v4216_v3, %v1315_v21  ;;  %v1317_v13 = vadd.f32 %v4101_v43, %v1249_v33 }
 0x291   : > { %v1250_v22 = vadd.f32 %v1242_v56, %v1174_v0  ;;  %v1416_v41 = vadd.f32 %v4231_v34, %v1316_v55  ;;  %v1711_v56 = vstv %s2862_s8  ;;  %s2874_s8 = sld [smem:[#allocation7 + $0x182]] }
 0x292   : > { %v1417_v44 = vadd.f32 %v1400_v36, %v1317_v13 }
 0x293   : > { %v1318_v43 = vadd.f32 %v4117_v38, %v1250_v22 }
 0x295   : > { %v1418_v62 = vadd.f32 %v1402_v16, %v1318_v43 }
 0x2de   : > { %v1428_v53 = vpop.permute.xlu0 %1427 }
 0x2df   : > { %v1451_v54 = vadd.f32 %v1428_v53, %v1411_v17 }
 0x2e1   : > { %1460 = vst.msk [vmem:[%s3371_s12] sm:$0xff] %vm1459_vm3, %v1451_v54  ;;  %1476 = vrot.lane.b32.xlu0 %v1451_v54, %s3167_s26 }
 0x2e2   : > { %v1430_v6 = vpop.permute.xlu1 %1429  ;;  %v1432_v26 = vpop.permute.xlu0 %1431 }
 0x2e3   : > { %v1452_v19 = vadd.f32 %v1430_v6, %v1412_v11  ;;  %v1453_v2 = vadd.f32 %v1432_v26, %v1413_v59 }
 0x2e5   : > { %1461 = vst.msk [vmem:[%s3371_s12 + $0x8] sm:$0xff] %vm1459_vm3, %v1452_v19  ;;  %1462 = vst.msk [vmem:[%s3371_s12 + $0x10] sm:$0xff] %vm1459_vm3, %v1453_v2  ;;  %1478 = vrot.lane.b32.xlu1 %v1452_v19, %s3167_s26  ;;  %1480 = vrot.lane.b32.xlu0 %v1453_v2, %s3167_s26 }
 0x2e6   : > { %v1434_v57 = vpop.permute.xlu1 %1433  ;;  %v1436_v61 = vpop.permute.xlu0 %1435  ;;  %v4368_v2 = vstv %s2873_s7  ;;  %s2872_s7 = sld [smem:[#allocation7 + $0x180]] }
 0x2e7   : > { %v1454_v3 = vadd.f32 %v1434_v57, %v1414_v42  ;;  %v1455_v46 = vadd.f32 %v1436_v61, %v1415_v29  ;;  %5430 = vst [vmem:[#allocation51_spill] sm:$0xff] %v4368_v2 }
 0x2e9   : > { %1463 = vst.msk [vmem:[%s3371_s12 + $0x18] sm:$0xff] %vm1459_vm3, %v1454_v3  ;;  %1464 = vst.msk [vmem:[%s3371_s12 + $0x20] sm:$0xff] %vm1459_vm3, %v1455_v46  ;;  %1482 = vrot.lane.b32.xlu1 %v1454_v3, %s3167_s26  ;;  %1484 = vrot.lane.b32.xlu0 %v1455_v46, %s3167_s26 }
 0x2ea   : > { %v1438_v23 = vpop.permute.xlu1 %1437  ;;  %v1440_v35 = vpop.permute.xlu0 %1439 }
 0x2eb   : > { %v1456_v12 = vadd.f32 %v1438_v23, %v1416_v41  ;;  %v1457_v40 = vadd.f32 %v1440_v35, %v1417_v44 }
 0x2ed   : > { %1465 = vst.msk [vmem:[%s3371_s12 + $0x28] sm:$0xff] %vm1459_vm3, %v1456_v12  ;;  %1466 = vst.msk [vmem:[%s3371_s12 + $0x30] sm:$0xff] %vm1459_vm3, %v1457_v40  ;;  %1486 = vrot.lane.b32.xlu1 %v1456_v12, %s3167_s26  ;;  %1488 = vrot.lane.b32.xlu0 %v1457_v40, %s3167_s26 }
 0x2ee   : > { %v1442_v34 = vpop.permute.xlu1 %1441 }
 0x2ef   : > { %v1458_v36 = vadd.f32 %v1442_v34, %v1418_v62  ;;  %v1761_v34 = vstv %s2863_s10  ;;  %s1516_s10 = sld [smem:[#allocation7]] }
 0x2f1   : > { %1467 = vst.msk [vmem:[%s3371_s12 + $0x38] sm:$0xff] %vm1459_vm3, %v1458_v36  ;;  %1490 = vrot.lane.b32.xlu1 %v1458_v36, %s3167_s26  ;;  %s2860_s26 = sld [smem:[#allocation7 + $0x3]] }
 0x2f7   : > { %v1603_v58 = vstv %s2860_s26  ;;  %s2870_s26 = sld [smem:[#allocation7 + $0x103]] }
 0x353   : > { %v1477_v20 = vpop.permute.xlu0 %1476 }
 0x354   : > { %1500 = vst.msk [vmem:[#allocation2 + $0x2] sm:$0xff] %vm312_vm2, %v1477_v20 }
 0x357   : > { %v1479_v38 = vpop.permute.xlu1 %1478  ;;  %v1481_v63 = vpop.permute.xlu0 %1480 }
 0x358   : > { %1501 = vst.msk [vmem:[#allocation2 + $0xa] sm:$0xff] %vm312_vm2, %v1479_v38  ;;  %1502 = vst.msk [vmem:[#allocation2 + $0x1a] sm:$0xff] %vm312_vm2, %v1481_v63 }
 0x35b   : > { %v1483_v60 = vpop.permute.xlu1 %1482  ;;  %v1485_v18 = vpop.permute.xlu0 %1484  ;;  %v4307_v37 = vld [vmem:[#allocation2] sm:$0xff] }
 0x35c   : > { %1503 = vst.msk [vmem:[#allocation2 + $0x22] sm:$0xff] %vm312_vm2, %v1483_v60  ;;  %1504 = vst.msk [vmem:[#allocation2 + $0x32] sm:$0xff] %vm312_vm2, %v1485_v18  ;;  %v1554_v17 = vmul.f32 %v1553_v24, %v4307_v37  ;;  %v1604_v47 = vmul.f32 %v1603_v58, %v4307_v37  ;;  %v1654_v26 = vmul.f32 %v1653_v15, %v4307_v37  ;;  %v4380_v29 = vld [vmem:[#allocation2 + $0x1] sm:$0xff] }
 0x35d   : > { %v1712_v61 = vmul.f32 %v1711_v56, %v4380_v29  ;;  %v1762_v20 = vmul.f32 %v1761_v34, %v4380_v29 }
 0x35e   : > { %1570 = vrot.lane.b32.xlu0 %v1554_v17, %s3168_s20 }
 0x35f   : > { %v1487_v4 = vpop.permute.xlu1 %1486  ;;  %v1489_v52 = vpop.permute.xlu0 %1488  ;;  %v4313_v27 = vld [vmem:[#allocation2 + $0x8] sm:$0xff]  ;;  %v4315_v8 = vld [vmem:[#allocation2 + $0x18] sm:$0xff] }
 0x360   : > { %1505 = vst.msk [vmem:[#allocation2 + $0x3a] sm:$0xff] %vm312_vm2, %v1487_v4  ;;  %1506 = vst.msk [vmem:[#allocation2 + $0x4a] sm:$0xff] %vm312_vm2, %v1489_v52  ;;  %v1555_v9 = vmul.f32 %v1553_v24, %v4313_v27  ;;  %v1556_v7 = vmul.f32 %v1553_v24, %v4315_v8  ;;  %v1605_v25 = vmul.f32 %v1603_v58, %v4313_v27  ;;  %v4386_v55 = vld [vmem:[#allocation2 + $0x9] sm:$0xff]  ;;  %v4388_v13 = vld [vmem:[#allocation2 + $0x19] sm:$0xff]  ;;  %v1811_v4 = vstv %s2864_s29  ;;  %s2858_s29 = sld [smem:[#allocation7 + $0x1]] }
 0x361   : > { %v1606_v11 = vmul.f32 %v1603_v58, %v4315_v8  ;;  %v1655_v39 = vmul.f32 %v1653_v15, %v4313_v27  ;;  %v1656_v21 = vmul.f32 %v1653_v15, %v4315_v8  ;;  %v1713_v3 = vmul.f32 %v1711_v56, %v4386_v55 }
 0x362   : > { %1572 = vrot.lane.b32.xlu1 %v1555_v9, %s3168_s20  ;;  %1574 = vrot.lane.b32.xlu0 %v1556_v7, %s3168_s20  ;;  %v1714_v46 = vmul.f32 %v1711_v56, %v4388_v13  ;;  %v1763_v38 = vmul.f32 %v1761_v34, %v4386_v55  ;;  %v1764_v63 = vmul.f32 %v1761_v34, %v4388_v13 }
 0x363   : > { %v1491_v16 = vpop.permute.xlu1 %1490  ;;  %v4323_v53 = vld [vmem:[#allocation2 + $0x20] sm:$0xff]  ;;  %v4325_v14 = vld [vmem:[#allocation2 + $0x30] sm:$0xff]  ;;  %v1812_v9 = vmul.f32 %v1811_v4, %v4380_v29  ;;  %v1813_v7 = vmul.f32 %v1811_v4, %v4386_v55 }
 0x364   : > { %1507 = vst.msk [vmem:[#allocation2 + $0x52] sm:$0xff] %vm312_vm2, %v1491_v16  ;;  %v1557_v48 = vmul.f32 %v1553_v24, %v4323_v53  ;;  %v1558_v45 = vmul.f32 %v1553_v24, %v4325_v14  ;;  %v1607_v59 = vmul.f32 %v1603_v58, %v4323_v53  ;;  %v1608_v31 = vmul.f32 %v1603_v58, %v4325_v14  ;;  %v4394_v22 = vld [vmem:[#allocation2 + $0x21] sm:$0xff]  ;;  %v4396_v41 = vld [vmem:[#allocation2 + $0x31] sm:$0xff] }
 0x365   : > { %v1657_v50 = vmul.f32 %v1653_v15, %v4323_v53  ;;  %v1658_v33 = vmul.f32 %v1653_v15, %v4325_v14  ;;  %v1715_v44 = vmul.f32 %v1711_v56, %v4394_v22  ;;  %v1716_v23 = vmul.f32 %v1711_v56, %v4396_v41 }
 0x366   : > { %1576 = vrot.lane.b32.xlu1 %v1557_v48, %s3168_s20  ;;  %1578 = vrot.lane.b32.xlu0 %v1558_v45, %s3168_s20  ;;  %v1766_v60 = vmul.f32 %v1761_v34, %v4396_v41  ;;  %v1814_v16 = vmul.f32 %v1811_v4, %v4388_v13  ;;  %v1815_v48 = vmul.f32 %v1811_v4, %v4394_v22 }
 0x367   : > { %v4332_v54 = vld [vmem:[#allocation2 + $0x38] sm:$0xff]  ;;  %v4334_v32 = vld [vmem:[#allocation2 + $0x48] sm:$0xff]  ;;  %v1816_v45 = vmul.f32 %v1811_v4, %v4396_v41 }
 0x368   : > { %v1559_v1 = vmul.f32 %v1553_v24, %v4332_v54  ;;  %v1560_v30 = vmul.f32 %v1553_v24, %v4334_v32  ;;  %v1609_v5 = vmul.f32 %v1603_v58, %v4332_v54  ;;  %v1610_v10 = vmul.f32 %v1603_v58, %v4334_v32  ;;  %v4402_v35 = vld [vmem:[#allocation2 + $0x39] sm:$0xff]  ;;  %v4404_v43 = vld [vmem:[#allocation2 + $0x49] sm:$0xff] }
 0x369   : > { %v1659_v0 = vmul.f32 %v1653_v15, %v4332_v54  ;;  %v1660_v42 = vmul.f32 %v1653_v15, %v4334_v32  ;;  %v1717_v12 = vmul.f32 %v1711_v56, %v4402_v35  ;;  %v1718_v40 = vmul.f32 %v1711_v56, %v4404_v43 }
 0x36a   : > { %1580 = vrot.lane.b32.xlu1 %v1559_v1, %s3168_s20  ;;  %1582 = vrot.lane.b32.xlu0 %v1560_v30, %s3168_s20  ;;  %v1767_v18 = vmul.f32 %v1761_v34, %v4402_v35  ;;  %v1768_v17 = vmul.f32 %v1761_v34, %v4404_v43  ;;  %v1817_v1 = vmul.f32 %v1811_v4, %v4402_v35 }
 0x36b   : > { %v4340_v49 = vld [vmem:[#allocation2 + $0x50] sm:$0xff]  ;;  %v1818_v30 = vmul.f32 %v1811_v4, %v4404_v43 }
 0x36c   : > { %v1561_v28 = vmul.f32 %v1553_v24, %v4340_v49  ;;  %v1611_v6 = vmul.f32 %v1603_v58, %v4340_v49  ;;  %v4364_v19 = vld [vmem:[#allocation2 + $0x53] sm:$0xff]  ;;  %v1661_v57 = vmul.f32 %v1653_v15, %v4340_v49  ;;  %v1765_v24 = vmul.f32 %v1761_v34, %v4394_v22 }
 0x36d   : > { %v4374_v51 = vmul.f32 %v4368_v2, %v4364_v19  ;;  %v4410_v62 = vld [vmem:[#allocation2 + $0x51] sm:$0xff]  ;;  %v1861_v58 = vstv %s2865_s11  ;;  %v1911_v15 = vstv %s2866_s14  ;;  %s2867_s11 = sld [smem:[#allocation7 + $0x100]]  ;;  %s2868_s14 = sld [smem:[#allocation7 + $0x101]] }
 0x36e   : > { %1584 = vrot.lane.b32.xlu1 %v1561_v28, %s3168_s20  ;;  %1620 = vrot.lane.b32.xlu0 %v1604_v47, %s3168_s20  ;;  %v1719_v36 = vmul.f32 %v1711_v56, %v4410_v62  ;;  %v1769_v52 = vmul.f32 %v1761_v34, %v4410_v62  ;;  %v1819_v28 = vmul.f32 %v1811_v4, %v4410_v62 }
 0x36f   : > { %5431 = vst [vmem:[#allocation78_spill] sm:$0xff] %v4374_v51  ;;  %v1862_v47 = vmul.f32 %v1861_v58, %v4380_v29  ;;  %v4632_v51 = vld [vmem:[#allocation2 + $0x3b] sm:$0xff] }
 0x372   : > { %1622 = vrot.lane.b32.xlu1 %v1605_v25, %s3168_s20  ;;  %1624 = vrot.lane.b32.xlu0 %v1606_v11, %s3168_s20  ;;  %v1863_v25 = vmul.f32 %v1861_v58, %v4386_v55  ;;  %v1864_v11 = vmul.f32 %v1861_v58, %v4388_v13 }
 0x376   : > { %1626 = vrot.lane.b32.xlu1 %v1607_v59, %s3168_s20  ;;  %1628 = vrot.lane.b32.xlu0 %v1608_v31, %s3168_s20  ;;  %v1865_v59 = vmul.f32 %v1861_v58, %v4394_v22  ;;  %v1866_v31 = vmul.f32 %v1861_v58, %v4396_v41 }
 0x37a   : > { %1630 = vrot.lane.b32.xlu1 %v1609_v5, %s3168_s20  ;;  %1632 = vrot.lane.b32.xlu0 %v1610_v10, %s3168_s20  ;;  %v1867_v5 = vmul.f32 %v1861_v58, %v4402_v35  ;;  %v1868_v10 = vmul.f32 %v1861_v58, %v4404_v43 }
 0x37e   : > { %1634 = vrot.lane.b32.xlu1 %v1611_v6, %s3168_s20  ;;  %1670 = vrot.lane.b32.xlu0 %v1654_v26, %s3169_s30  ;;  %v1869_v6 = vmul.f32 %v1861_v58, %v4410_v62  ;;  %v1912_v26 = vmul.f32 %v1911_v15, %v4380_v29  ;;  %v1916_v29 = vmul.f32 %v1911_v15, %v4396_v41 }
 0x37f   : > { %v1919_v41 = vmul.f32 %v1911_v15, %v4410_v62  ;;  %v4510_v62 = vld [vmem:[#allocation2 + $0x32] sm:$0xff] }
 0x382   : > { %1672 = vrot.lane.b32.xlu1 %v1655_v39, %s3169_s30  ;;  %1674 = vrot.lane.b32.xlu0 %v1656_v21, %s3169_s30  ;;  %v1913_v21 = vmul.f32 %v1911_v15, %v4386_v55  ;;  %v1918_v55 = vmul.f32 %v1911_v15, %v4404_v43 }
 0x386   : > { %1676 = vrot.lane.b32.xlu1 %v1657_v50, %s3169_s30  ;;  %1678 = vrot.lane.b32.xlu0 %v1658_v33, %s3169_s30  ;;  %v1914_v50 = vmul.f32 %v1911_v15, %v4388_v13  ;;  %v4486_v13 = vld [vmem:[#allocation2 + $0x2] sm:$0xff] }
 0x38a   : > { %1680 = vrot.lane.b32.xlu1 %v1659_v0, %s3169_s30  ;;  %1682 = vrot.lane.b32.xlu0 %v1660_v42, %s3169_s30  ;;  %v1915_v42 = vmul.f32 %v1911_v15, %v4394_v22 }
 0x38e   : > { %1684 = vrot.lane.b32.xlu1 %v1661_v57, %s3169_s30  ;;  %1728 = vrot.lane.b32.xlu0 %v1712_v61, %s3170_s25  ;;  %v1917_v61 = vmul.f32 %v1911_v15, %v4402_v35  ;;  %v4498_v35 = vld [vmem:[#allocation2 + $0x1a] sm:$0xff] }
 0x392   : > { %1730 = vrot.lane.b32.xlu1 %v1713_v3, %s3170_s25  ;;  %1732 = vrot.lane.b32.xlu0 %v1714_v46, %s3170_s25  ;;  %v2005_v3 = vstv %s2869_s22  ;;  %s4729_s22 = sld [smem:[#allocation7 + $0x203]] }
 0x393   : > { %v2008_v34 = vmul.f32 %v2005_v3, %v4498_v35 }
 0x396   : > { %1734 = vrot.lane.b32.xlu1 %v1715_v44, %s3170_s25  ;;  %1736 = vrot.lane.b32.xlu0 %v1716_v23, %s3170_s25  ;;  %v2006_v44 = vmul.f32 %v2005_v3, %v4486_v13  ;;  %v4496_v23 = vld [vmem:[#allocation2 + $0xa] sm:$0xff] }
 0x39a   : > { %1738 = vrot.lane.b32.xlu1 %v1717_v12, %s3170_s25  ;;  %1740 = vrot.lane.b32.xlu0 %v1718_v40, %s3170_s25  ;;  %v2007_v40 = vmul.f32 %v2005_v3, %v4496_v23 }
 0x39e   : > { %1742 = vrot.lane.b32.xlu1 %v1719_v36, %s3170_s25  ;;  %1778 = vrot.lane.b32.xlu0 %v1762_v20, %s3171_s9  ;;  %v4508_v36 = vld [vmem:[#allocation2 + $0x22] sm:$0xff] }
 0x3a2   : > { %1780 = vrot.lane.b32.xlu1 %v1763_v38, %s3171_s9  ;;  %1782 = vrot.lane.b32.xlu0 %v1764_v63, %s3171_s9  ;;  %v2009_v63 = vmul.f32 %v2005_v3, %v4508_v36 }
 0x3a6   : > { %1784 = vrot.lane.b32.xlu1 %v1765_v24, %s3171_s9  ;;  %1786 = vrot.lane.b32.xlu0 %v1766_v60, %s3171_s9  ;;  %v2010_v24 = vmul.f32 %v2005_v3, %v4510_v62  ;;  %v4520_v60 = vld [vmem:[#allocation2 + $0x3a] sm:$0xff] }
 0x3aa   : > { %1788 = vrot.lane.b32.xlu1 %v1767_v18, %s3171_s9  ;;  %1790 = vrot.lane.b32.xlu0 %v1768_v17, %s3171_s9  ;;  %v4522_v18 = vld [vmem:[#allocation2 + $0x4a] sm:$0xff] }
 0x3ae   : > { %1792 = vrot.lane.b32.xlu1 %v1769_v52, %s3171_s9  ;;  %1828 = vrot.lane.b32.xlu0 %v1812_v9, %s3171_s9  ;;  %v2011_v52 = vmul.f32 %v2005_v3, %v4520_v60  ;;  %v2012_v9 = vmul.f32 %v2005_v3, %v4522_v18 }
 0x3b2   : > { %1830 = vrot.lane.b32.xlu1 %v1813_v7, %s3171_s9  ;;  %1832 = vrot.lane.b32.xlu0 %v1814_v16, %s3171_s9  ;;  %v4532_v7 = vld [vmem:[#allocation2 + $0x52] sm:$0xff]  ;;  %v2055_v16 = vstv %s2870_s26  ;;  %s2875_s26 = sld [smem:[#allocation7 + $0x183]] }
 0x3b3   : > { %5436 = vst [vmem:[#allocation26_spill] sm:$0xff] %v4532_v7 }
 0x3b6   : > { %1834 = vrot.lane.b32.xlu1 %v1815_v48, %s3171_s9  ;;  %1836 = vrot.lane.b32.xlu0 %v1816_v45, %s3171_s9 }
 0x3ba   : > { %1838 = vrot.lane.b32.xlu1 %v1817_v1, %s3171_s9  ;;  %1840 = vrot.lane.b32.xlu0 %v1818_v30, %s3171_s9  ;;  %v2013_v1 = vmul.f32 %v2005_v3, %v4532_v7  ;;  %v2056_v30 = vmul.f32 %v2055_v16, %v4486_v13 }
 0x3be   : > { %1842 = vrot.lane.b32.xlu1 %v1819_v28, %s3171_s9  ;;  %1878 = vrot.lane.b32.xlu0 %v1862_v47, %s3172_s6  ;;  %v2057_v47 = vmul.f32 %v2055_v16, %v4496_v23 }
 0x3c2   : > { %1880 = vrot.lane.b32.xlu1 %v1863_v25, %s3172_s6  ;;  %1882 = vrot.lane.b32.xlu0 %v1864_v11, %s3172_s6  ;;  %v2058_v25 = vmul.f32 %v2055_v16, %v4498_v35 }
 0x3c6   : > { %1884 = vrot.lane.b32.xlu1 %v1865_v59, %s3172_s6  ;;  %1886 = vrot.lane.b32.xlu0 %v1866_v31, %s3172_s6  ;;  %v2059_v31 = vmul.f32 %v2055_v16, %v4508_v36 }
 0x3ca   : > { %1888 = vrot.lane.b32.xlu1 %v1867_v5, %s3172_s6  ;;  %1890 = vrot.lane.b32.xlu0 %v1868_v10, %s3172_s6  ;;  %v2060_v5 = vmul.f32 %v2055_v16, %v4510_v62 }
 0x3ce   : > { %1892 = vrot.lane.b32.xlu1 %v1869_v6, %s3172_s6  ;;  %1928 = vrot.lane.b32.xlu0 %v1912_v26, %s3172_s6  ;;  %v2061_v6 = vmul.f32 %v2055_v16, %v4520_v60  ;;  %v2062_v26 = vmul.f32 %v2055_v16, %v4522_v18 }
 0x3d0   : > { %v4466_v39 = vpop.permute.xlu0 %1570 }
 0x3d2   : > { %1930 = vrot.lane.b32.xlu1 %v1913_v21, %s3172_s6  ;;  %1932 = vrot.lane.b32.xlu0 %v1914_v50, %s3172_s6  ;;  %v2105_v21 = vstv %s2871_s23  ;;  %s2879_s23 = sld [smem:[#allocation7 + $0x202]] }
 0x3d4   : > { %v4472_v33 = vpop.permute.xlu1 %1572  ;;  %v4474_v0 = vpop.permute.xlu0 %1574 }
 0x3d6   : > { %1934 = vrot.lane.b32.xlu1 %v1915_v42, %s3172_s6  ;;  %1936 = vrot.lane.b32.xlu0 %v1916_v29, %s3172_s6  ;;  %v2063_v29 = vmul.f32 %v2055_v16, %v4532_v7  ;;  %v2111_v16 = vmul.f32 %v2105_v21, %v4520_v60 }
 0x3d8   : > { %v4480_v56 = vpop.permute.xlu1 %1576  ;;  %v4482_v57 = vpop.permute.xlu0 %1578 }
 0x3da   : > { %1938 = vrot.lane.b32.xlu1 %v1917_v61, %s3172_s6  ;;  %1940 = vrot.lane.b32.xlu0 %v1918_v55, %s3172_s6  ;;  %v2106_v61 = vmul.f32 %v2105_v21, %v4486_v13 }
 0x3dc   : > { %v4490_v46 = vpop.permute.xlu1 %1580  ;;  %v4492_v22 = vpop.permute.xlu0 %1582 }
 0x3de   : > { %1942 = vrot.lane.b32.xlu1 %v1919_v41, %s3172_s6  ;;  %2022 = vrot.lane.b32.xlu0 %v2006_v44, %s3168_s20  ;;  %v2107_v41 = vmul.f32 %v2105_v21, %v4496_v23  ;;  %v2108_v44 = vmul.f32 %v2105_v21, %v4498_v35 }
 0x3e0   : > { %v4502_v43 = vpop.permute.xlu1 %1584  ;;  %v4504_v12 = vpop.permute.xlu0 %1620 }
 0x3e2   : > { %2024 = vrot.lane.b32.xlu1 %v2007_v40, %s3168_s20  ;;  %2026 = vrot.lane.b32.xlu0 %v2008_v34, %s3168_s20 }
 0x3e4   : > { %v4514_v20 = vpop.permute.xlu1 %1622  ;;  %v4516_v38 = vpop.permute.xlu0 %1624 }
 0x3e5   : > { %5432 = vst [vmem:[#allocation79_spill] sm:$0xff] %v4514_v20  ;;  %5433 = vst [vmem:[#allocation104_spill] sm:$0xff] %v4516_v38 }
 0x3e6   : > { %2028 = vrot.lane.b32.xlu1 %v2009_v63, %s3168_s20  ;;  %2030 = vrot.lane.b32.xlu0 %v2010_v24, %s3168_s20  ;;  %v2109_v63 = vmul.f32 %v2105_v21, %v4508_v36  ;;  %v2110_v24 = vmul.f32 %v2105_v21, %v4510_v62 }
 0x3e8   : > { %v4526_v17 = vpop.permute.xlu1 %1626  ;;  %v4528_v4 = vpop.permute.xlu0 %1628 }
 0x3e9   : > { %5434 = vst [vmem:[#allocation105_spill] sm:$0xff] %v4526_v17  ;;  %5435 = vst [vmem:[#allocation67_spill] sm:$0xff] %v4528_v4  ;;  %v1517_v4 = vstv %s1516_s10 }
 0x3ea   : > { %2032 = vrot.lane.b32.xlu1 %v2011_v52, %s3168_s20  ;;  %2034 = vrot.lane.b32.xlu0 %v2012_v9, %s3168_s20 }
 0x3ec   : > { %v4536_v48 = vpop.permute.xlu1 %1630  ;;  %v4538_v45 = vpop.permute.xlu0 %1632 }
 0x3ed   : > { %5437 = vst [vmem:[#allocation91_spill] sm:$0xff] %v4536_v48  ;;  %5438 = vst [vmem:[#allocation59_spill] sm:$0xff] %v4538_v45  ;;  %v2263_v48 = vstv %s2874_s8 }
 0x3ee   : > { %2036 = vrot.lane.b32.xlu1 %v2013_v1, %s3168_s20  ;;  %2072 = vrot.lane.b32.xlu0 %v2056_v30, %s3168_s20  ;;  %v2112_v1 = vmul.f32 %v2105_v21, %v4522_v18  ;;  %v4598_v30 = vld [vmem:[#allocation2 + $0x3] sm:$0xff] }
 0x3ef   : > { %5445 = vst [vmem:[#allocation108_spill] sm:$0xff] %v4598_v30 }
 0x3f0   : > { %v4544_v58 = vpop.permute.xlu1 %1634  ;;  %v4546_v28 = vpop.permute.xlu0 %1670 }
 0x3f1   : > { %5439 = vst [vmem:[#allocation68_spill] sm:$0xff] %v4544_v58 }
 0x3f2   : > { %2074 = vrot.lane.b32.xlu1 %v2057_v47, %s3168_s20  ;;  %2076 = vrot.lane.b32.xlu0 %v2058_v25, %s3168_s20  ;;  %v2163_v47 = vstv %s2872_s7  ;;  %s2881_s7 = sld [smem:[#allocation7 + $0x204]] }
 0x3f3   : > { %v2169_v58 = vmul.f32 %v2163_v47, %v4632_v51 }
 0x3f4   : > { %v4552_v11 = vpop.permute.xlu1 %1672  ;;  %v4554_v59 = vpop.permute.xlu0 %1674 }
 0x3f6   : > { %2078 = vrot.lane.b32.xlu1 %v2059_v31, %s3168_s20  ;;  %2080 = vrot.lane.b32.xlu0 %v2060_v5, %s3168_s20  ;;  %v2113_v5 = vmul.f32 %v2105_v21, %v4532_v7  ;;  %v4622_v21 = vld [vmem:[#allocation2 + $0x33] sm:$0xff] }
 0x3f8   : > { %v4560_v10 = vpop.permute.xlu1 %1676  ;;  %v4562_v15 = vpop.permute.xlu0 %1678 }
 0x3fa   : > { %2082 = vrot.lane.b32.xlu1 %v2061_v6, %s3168_s20  ;;  %2084 = vrot.lane.b32.xlu0 %v2062_v26, %s3168_s20  ;;  %v2164_v6 = vmul.f32 %v2163_v47, %v4598_v30  ;;  %v4608_v26 = vld [vmem:[#allocation2 + $0xb] sm:$0xff] }
 0x3fc   : > { %v4568_v50 = vpop.permute.xlu1 %1680  ;;  %v4570_v42 = vpop.permute.xlu0 %1682 }
 0x3fe   : > { %2086 = vrot.lane.b32.xlu1 %v2063_v29, %s3168_s20  ;;  %2122 = vrot.lane.b32.xlu0 %v2106_v61, %s3169_s30  ;;  %v4610_v29 = vld [vmem:[#allocation2 + $0x1b] sm:$0xff] }
 0x400   : > { %v4576_v55 = vpop.permute.xlu1 %1684  ;;  %v4578_v3 = vpop.permute.xlu0 %1728 }
 0x401   : > { %5440 = vst [vmem:[#allocation92_spill] sm:$0xff] %v4578_v3 }
 0x402   : > { %2124 = vrot.lane.b32.xlu1 %v2107_v41, %s3169_s30  ;;  %2126 = vrot.lane.b32.xlu0 %v2108_v44, %s3169_s30  ;;  %v2165_v44 = vmul.f32 %v2163_v47, %v4608_v26 }
 0x404   : > { %v4584_v40 = vpop.permute.xlu1 %1730  ;;  %v4586_v34 = vpop.permute.xlu0 %1732 }
 0x405   : > { %5441 = vst [vmem:[#allocation60_spill] sm:$0xff] %v4584_v40  ;;  %5442 = vst [vmem:[#allocation80_spill] sm:$0xff] %v4586_v34  ;;  %v4681_v40 = vstv %s2858_s29  ;;  %s2674_s29 = sshll.u32 %s3371_s12, 4  ;;  %s5072_s29 = int_to_ptr.vmem [resolvable:$true] %s2674_s29 }
 0x406   : > { %2128 = vrot.lane.b32.xlu1 %v2109_v63, %s3169_s30  ;;  %2130 = vrot.lane.b32.xlu0 %v2110_v24, %s3169_s30  ;;  %v2166_v63 = vmul.f32 %v2163_v47, %v4610_v29  ;;  %v4620_v24 = vld [vmem:[#allocation2 + $0x23] sm:$0xff] }
 0x408   : > { %v4592_v52 = vpop.permute.xlu1 %1734  ;;  %v4594_v9 = vpop.permute.xlu0 %1736 }
 0x409   : > { %5443 = vst [vmem:[#allocation107_spill] sm:$0xff] %v4592_v52  ;;  %5444 = vst [vmem:[#allocation81_spill] sm:$0xff] %v4594_v9  ;;  %v2265_v52 = vmul.f32 %v2263_v48, %v4608_v26 }
 0x40a   : > { %2132 = vrot.lane.b32.xlu1 %v2111_v16, %s3169_s30  ;;  %2134 = vrot.lane.b32.xlu0 %v2112_v1, %s3169_s30 }
 0x40c   : > { %v4602_v25 = vpop.permute.xlu1 %1738  ;;  %v4604_v31 = vpop.permute.xlu0 %1740 }
 0x40d   : > { %5446 = vst [vmem:[#allocation69_spill] sm:$0xff] %v4602_v25  ;;  %5447 = vst [vmem:[#allocation62_spill] sm:$0xff] %v4604_v31 }
 0x40e   : > { %2136 = vrot.lane.b32.xlu1 %v2113_v5, %s3169_s30  ;;  %2180 = vrot.lane.b32.xlu0 %v2164_v6, %s3170_s25  ;;  %v2167_v5 = vmul.f32 %v2163_v47, %v4620_v24  ;;  %v2168_v6 = vmul.f32 %v2163_v47, %v4622_v21 }
 0x410   : > { %v4614_v61 = vpop.permute.xlu1 %1742  ;;  %v4616_v41 = vpop.permute.xlu0 %1778 }
 0x411   : > { %5448 = vst [vmem:[#allocation63_spill] sm:$0xff] %v4614_v61  ;;  %v4634_v61 = vld [vmem:[#allocation2 + $0x4b] sm:$0xff] }
 0x412   : > { %2182 = vrot.lane.b32.xlu1 %v2165_v44, %s3170_s25  ;;  %2184 = vrot.lane.b32.xlu0 %v2166_v63, %s3170_s25  ;;  %v2170_v31 = vmul.f32 %v2163_v47, %v4634_v61  ;;  %v2270_v7 = vmul.f32 %v2263_v48, %v4634_v61 }
 0x414   : > { %v4626_v16 = vpop.permute.xlu1 %1780  ;;  %v4628_v1 = vpop.permute.xlu0 %1782 }
 0x416   : > { %2186 = vrot.lane.b32.xlu1 %v2167_v5, %s3170_s25  ;;  %2188 = vrot.lane.b32.xlu0 %v2168_v6, %s3170_s25  ;;  %v2171_v5 = vmul.f32 %v2163_v47, %v4364_v19  ;;  %v2214_v6 = vmul.f32 %v4368_v2, %v4598_v30  ;;  %v2267_v2 = vmul.f32 %v2263_v48, %v4620_v24 }
 0x418   : > { %v4638_v44 = vpop.permute.xlu1 %1784  ;;  %v4640_v63 = vpop.permute.xlu0 %1786 }
 0x41a   : > { %2190 = vrot.lane.b32.xlu1 %v2169_v58, %s3170_s25  ;;  %2192 = vrot.lane.b32.xlu0 %v2170_v31, %s3170_s25  ;;  %v2264_v31 = vmul.f32 %v2263_v48, %v4598_v30 }
 0x41c   : > { %v4646_v25 = vpop.permute.xlu1 %1788  ;;  %v4648_v45 = vpop.permute.xlu0 %1790 }
 0x41e   : > { %2194 = vrot.lane.b32.xlu1 %v2171_v5, %s3170_s25  ;;  %2230 = vrot.lane.b32.xlu0 %v2214_v6, %s3171_s9  ;;  %v2266_v6 = vmul.f32 %v2263_v48, %v4610_v29  ;;  %s2876_s25 = sld [smem:[#allocation7 + $0x184]] }
 0x420   : > { %v4655_v9 = vpop.permute.xlu1 %1792  ;;  %v4657_v58 = vpop.permute.xlu0 %1828 }
 0x421   : > { %5449 = vst [vmem:[#allocation93_spill] sm:$0xff] %v4655_v9  ;;  %5450 = vst [vmem:[#allocation94_spill] sm:$0xff] %v4657_v58  ;;  %v2271_v58 = vmul.f32 %v2263_v48, %v4364_v19  ;;  %v1536_v9 = vmul.f32 %v4681_v40, %v4307_v37 }
 0x422   : > { %2280 = vrot.lane.b32.xlu1 %v2264_v31, %s3171_s9  ;;  %2282 = vrot.lane.b32.xlu0 %v2265_v52, %s3171_s9  ;;  %v2268_v52 = vmul.f32 %v2263_v48, %v4622_v21 }
 0x424   : > { %v4663_v47 = vpop.permute.xlu1 %1830  ;;  %v4665_v5 = vpop.permute.xlu0 %1832 }
 0x425   : > { %5451 = vst [vmem:[#allocation82_spill] sm:$0xff] %v4663_v47  ;;  %5452 = vst [vmem:[#allocation110_spill] sm:$0xff] %v4665_v5  ;;  %v2269_v47 = vmul.f32 %v2263_v48, %v4632_v51  ;;  %v1518_v5 = vmul.f32 %v1517_v4, %v4307_v37  ;;  %v1522_v37 = vmul.f32 %v1517_v4, %v4325_v14 }
 0x426   : > { %2284 = vrot.lane.b32.xlu1 %v2266_v6, %s3171_s9  ;;  %2286 = vrot.lane.b32.xlu0 %v2267_v2, %s3171_s9  ;;  %v4683_v6 = vstv %s2867_s11  ;;  %v4685_v2 = vstv %s2868_s14  ;;  %s2655_s11 = scalar_lea.sflag [#allocation5], %s3361_s13  ;;  %s3053_s14 = scalar_lea.vmem %s5072_s29, 1024 }
 0x427   : > { %v1594_v34 = vadd.f32 %v4466_v39, %v1518_v5  ;;  %v4696_v5 = vstv %s2876_s25  ;;  %v4706_v48 = vmul.f32 %v4685_v2, %v4486_v13  ;;  %p3054_p0 = scmp.ne.s32.totalorder %s5072_s29, %s3053_s14  ;;  %s3173_s25 = smov [#allocation10]  }
 0x428   : > { %v4671_v17 = vpop.permute.xlu1 %1834  ;;  %v4673_v31 = vpop.permute.xlu0 %1836  ;;  %v2364_v3 = vmul.f32 %v4696_v5, %v4598_v30  ;;  %v1598_v30 = vadd.f32 %v4482_v57, %v1522_v37  ;;  %v1972_v57 = vmul.f32 %v4683_v6, %v4498_v35  ;;  %v1538_v37 = vmul.f32 %v4681_v40, %v4315_v8 }
 0x429   : > { %5453 = vst [vmem:[#allocation64_spill] sm:$0xff] %v4671_v17  ;;  %5454 = vst [vmem:[#allocation95_spill] sm:$0xff] %v4673_v31  ;;  %v1694_v39 = vadd.f32 %v4546_v28, %v1594_v34  ;;  %v1521_v34 = vmul.f32 %v1517_v4, %v4323_v53  ;;  %p3055_p6 = pnand %p3054_p0, %p5486_p3 }
 0x42a   : > { %2288 = vrot.lane.b32.xlu1 %v2268_v52, %s3171_s9  ;;  %2290 = vrot.lane.b32.xlu0 %v2269_v47, %s3171_s9  ;;  %v1519_v52 = vmul.f32 %v1517_v4, %v4313_v27  ;;  %v1520_v47 = vmul.f32 %v1517_v4, %v4315_v8  ;;  %v2369_v8 = vmul.f32 %v4696_v5, %v4632_v51 }
 0x42b   : > { %v1802_v38 = vadd.f32 %v4616_v41, %v1694_v39  ;;  %v1525_v39 = vmul.f32 %v1517_v4, %v4340_v49  ;;  %p3056_p4 = pneg %p3055_p6 }
 0x42c   : > { %v4687_v17 = vpop.permute.xlu1 %1838  ;;  %v4689_v31 = vpop.permute.xlu0 %1840  ;;  %v1596_v28 = vadd.f32 %v4474_v0, %v1520_v47  ;;  %v1597_v47 = vadd.f32 %v4480_v56, %v1521_v34 }
 0x42d   : > { %5455 = vst [vmem:[#allocation65_spill] sm:$0xff] %v4687_v17  ;;  %5456 = vst [vmem:[#allocation66_spill] sm:$0xff] %v4689_v31  ;;  %v1970_v31 = vmul.f32 %v4683_v6, %v4486_v13  ;;  %v1595_v17 = vadd.f32 %v4472_v33, %v1519_v52  ;;  %v2365_v13 = vmul.f32 %v4696_v5, %v4608_v26 }
 0x42e   : > { %2292 = vrot.lane.b32.xlu1 %v2270_v7, %s3171_s9  ;;  %2294 = vrot.lane.b32.xlu0 %v2271_v58, %s3171_s9  ;;  %v1523_v7 = vmul.f32 %v1517_v4, %v4332_v54  ;;  %v1524_v33 = vmul.f32 %v1517_v4, %v4334_v32  ;;  %v1696_v52 = vadd.f32 %v4554_v59, %v1596_v28 }
 0x42f   : > { %v1695_v0 = vadd.f32 %v4552_v11, %v1595_v17  ;;  %v2366_v4 = vmul.f32 %v4696_v5, %v4610_v29  ;;  %v1971_v59 = vmul.f32 %v4683_v6, %v4496_v23 }
 0x430   : > { %v4714_v58 = vpop.permute.xlu1 %1842  ;;  %v1879_v20 = vpop.permute.xlu0 %1878  ;;  %v1804_v11 = vadd.f32 %v4628_v1, %v1696_v52  ;;  %v1599_v28 = vadd.f32 %v4490_v46, %v1523_v7  ;;  %v1600_v34 = vadd.f32 %v4492_v22, %v1524_v33  ;;  %v2368_v22 = vmul.f32 %v4696_v5, %v4622_v21 }
 0x431   : > { %5457 = vst [vmem:[#allocation106_spill] sm:$0xff] %v4714_v58  ;;  %v1902_v41 = vadd.f32 %v1879_v20, %v1802_v38  ;;  %v1537_v58 = vmul.f32 %v4681_v40, %v4313_v27  ;;  %v1803_v17 = vadd.f32 %v4626_v16, %v1695_v0  ;;  %v2367_v27 = vmul.f32 %v4696_v5, %v4620_v24 }
 0x432   : > { %2380 = vrot.lane.b32.xlu1 %v2364_v3, %s3172_s6  ;;  %2382 = vrot.lane.b32.xlu0 %v2365_v13, %s3172_s6  ;;  %v1697_v3 = vadd.f32 %v4560_v10, %v1597_v47  ;;  %v1698_v16 = vadd.f32 %v4562_v15, %v1598_v30  ;;  %v1973_v7 = vmul.f32 %v4683_v6, %v4508_v36 }
 0x433   : > { %v4734_v20 = vadd.f32 %v1970_v31, %v1902_v41  ;;  %v1700_v33 = vadd.f32 %v4570_v42, %v1600_v34  ;;  %v1601_v47 = vadd.f32 %v4502_v43, %v1525_v39  ;;  %v5460_v34 = vld [vmem:[#allocation104_spill] sm:$0xff] }
 0x434   : > { %v1881_v56 = vpop.permute.xlu1 %1880  ;;  %v1883_v38 = vpop.permute.xlu0 %1882  ;;  %v1805_v13 = vadd.f32 %v4638_v44, %v1697_v3  ;;  %v1806_v0 = vadd.f32 %v4640_v63, %v1698_v16  ;;  %v1974_v44 = vmul.f32 %v4683_v6, %v4510_v62  ;;  %v1699_v63 = vadd.f32 %v4568_v50, %v1599_v28  ;;  %v4793_v16 = vld [vmem:[#allocation2 + $0x4] sm:$0xff] }
 0x435   : > { %v1903_v1 = vadd.f32 %v1881_v56, %v1803_v17  ;;  %v1904_v31 = vadd.f32 %v1883_v38, %v1804_v11  ;;  %v1644_v17 = vadd.f32 %v4504_v12, %v1536_v9  ;;  %v1539_v11 = vmul.f32 %v4681_v40, %v4323_v53 }
 0x436   : > { %2384 = vrot.lane.b32.xlu1 %v2366_v4, %s3172_s6  ;;  %2386 = vrot.lane.b32.xlu0 %v2367_v27, %s3172_s6  ;;  %v4775_v56 = vstv %s4729_s22  ;;  %v1807_v38 = vadd.f32 %v4646_v25, %v1699_v63  ;;  %v1808_v50 = vadd.f32 %v4648_v45, %v1700_v33  ;;  %v2370_v12 = vmul.f32 %v4696_v5, %v4634_v61  ;;  %v5458_v27 = vld [vmem:[#allocation92_spill] sm:$0xff]  ;;  %v5463_v63 = vld [vmem:[#allocation26_spill] sm:$0xff]  ;;  %s3057_s22 = sshll.u32 %s3173_s25, 4  ;;  %s3058_s22 = int_to_ptr.vmem [resolvable:$false] %s3057_s22 }
 0x437   : > { %v4754_v10 = vadd.f32 %v1971_v59, %v1903_v1  ;;  %v4756_v15 = vadd.f32 %v1972_v57, %v1904_v31  ;;  %v2371_v53 = vmul.f32 %v4696_v5, %v4364_v19  ;;  %v1975_v9 = vmul.f32 %v4683_v6, %v4520_v60  ;;  %v4795_v1 = vld [vmem:[#allocation2 + $0xc] sm:$0xff]  ;;  %s3059_s12 = scalar_lea.vmem %s3058_s22, 2048  ;;  %p3060_p10 = scmp.lt.s32.totalorder %s5072_s29, %s3058_s22 }
 0x438   : > { %v1885_v30 = vpop.permute.xlu1 %1884  ;;  %v1887_v46 = vpop.permute.xlu0 %1886  ;;  %v1976_v25 = vmul.f32 %v4683_v6, %v4522_v18  ;;  %v1701_v45 = vadd.f32 %v4576_v55, %v1601_v47  ;;  %v1752_v59 = vadd.f32 %v5458_v27, %v1644_v17  ;;  %v5459_v31 = vld [vmem:[#allocation79_spill] sm:$0xff]  ;;  %v1646_v5 = vadd.f32 %v5460_v34, %v1538_v37  ;;  %v5461_v55 = vld [vmem:[#allocation93_spill] sm:$0xff]  ;;  %v5465_v47 = vld [vmem:[#allocation80_spill] sm:$0xff]  ;;  %p3061_p8 = scmp.lt.s32.totalorder %s3059_s12, %s3053_s14 }
 0x439   : > { %v1905_v52 = vadd.f32 %v1885_v30, %v1805_v13  ;;  %v1906_v41 = vadd.f32 %v1887_v46, %v1806_v0  ;;  %v1645_v28 = vadd.f32 %v5459_v31, %v1537_v58  ;;  %v1540_v13 = vmul.f32 %v4681_v40, %v4325_v14  ;;  %v5462_v30 = vld [vmem:[#allocation94_spill] sm:$0xff] }
 0x43a   : > { %2388 = vrot.lane.b32.xlu1 %v2368_v22, %s3172_s6  ;;  %2390 = vrot.lane.b32.xlu0 %v2369_v8, %s3172_s6  ;;  %v1809_v0 = vadd.f32 %v5461_v55, %v1701_v45  ;;  %v1852_v46 = vadd.f32 %v5462_v30, %v1752_v59  ;;  %v1541_v58 = vmul.f32 %v4681_v40, %v4332_v54  ;;  %v4821_v54 = vld [vmem:[#allocation2 + $0x24] sm:$0xff]  ;;  %p3062_p5 = por %p3061_p8, %p3060_p10 }
 0x43b   : > { %v4779_v42 = vadd.f32 %v1973_v7, %v1905_v52  ;;  %v4781_v4 = vadd.f32 %v1974_v44, %v1906_v41  ;;  %v2508_v14 = vmul.f32 %v4775_v56, %v4793_v16  ;;  %v2509_v44 = vmul.f32 %v4775_v56, %v4795_v1  ;;  %v5464_v52 = vld [vmem:[#allocation60_spill] sm:$0xff]  ;;  %v5469_v27 = vld [vmem:[#allocation110_spill] sm:$0xff] }
 0x43c   : > { %v1889_v43 = vpop.permute.xlu1 %1888  ;;  %v1891_v39 = vpop.permute.xlu0 %1890  ;;  %v1977_v33 = vmul.f32 %v4683_v6, %v5463_v63  ;;  %v1753_v41 = vadd.f32 %v5464_v52, %v1645_v28  ;;  %v1754_v17 = vadd.f32 %v5465_v47, %v1646_v5  ;;  %v5468_v6 = vld [vmem:[#allocation82_spill] sm:$0xff]  ;;  %v1989_v34 = vmul.f32 %v4685_v2, %v4496_v23  ;;  %v5475_v47 = vld [vmem:[#allocation95_spill] sm:$0xff]  ;;  %p3063_p9 = pnand %p3062_p5, %p3056_p4 }
 0x43d   : > { %v1907_v57 = vadd.f32 %v1889_v43, %v1807_v38  ;;  %v1908_v3 = vadd.f32 %v1891_v39, %v1808_v50  ;;  %v4819_v43 = vld [vmem:[#allocation2 + $0x1c] sm:$0xff]  ;;  %v1990_v5 = vmul.f32 %v4685_v2, %v4498_v35  ;;  %v1543_v23 = vmul.f32 %v4681_v40, %v4340_v49  ;;  %v5474_v35 = vld [vmem:[#allocation64_spill] sm:$0xff] }
 0x43e   : > { %2392 = vrot.lane.b32.xlu1 %v2370_v12, %s3172_s6  ;;  %2394 = vrot.lane.b32.xlu0 %v2371_v53, %s3172_s6  ;;  %v5466_v39 = vld [vmem:[#allocation105_spill] sm:$0xff]  ;;  %v5467_v53 = vld [vmem:[#allocation67_spill] sm:$0xff]  ;;  %v1853_v45 = vadd.f32 %v5468_v6, %v1753_v41  ;;  %v1854_v59 = vadd.f32 %v5469_v27, %v1754_v17  ;;  %v2510_v28 = vmul.f32 %v4775_v56, %v4819_v43  ;;  %v5477_v6 = vld [vmem:[#allocation62_spill] sm:$0xff] }
 0x43f   : > { %v4805_v22 = vadd.f32 %v1975_v9, %v1907_v57  ;;  %v4807_v8 = vadd.f32 %v1976_v25, %v1908_v3  ;;  %v1647_v12 = vadd.f32 %v5466_v39, %v1539_v11  ;;  %v1648_v9 = vadd.f32 %v5467_v53, %v1540_v13  ;;  %v5470_v13 = vld [vmem:[#allocation107_spill] sm:$0xff] }
 0x440   : > { %v1893_v7 = vpop.permute.xlu1 %1892  ;;  %v1929_v37 = vpop.permute.xlu0 %1928  ;;  %v1542_v25 = vmul.f32 %v4681_v40, %v4334_v32  ;;  %v2511_v32 = vmul.f32 %v4775_v56, %v4821_v54  ;;  %v1991_v40 = vmul.f32 %v4685_v2, %v4508_v36  ;;  %v1992_v53 = vmul.f32 %v4685_v2, %v4510_v62  ;;  %v5479_v36 = vld [vmem:[#allocation65_spill] sm:$0xff] }
 0x441   : > { %v1909_v38 = vadd.f32 %v1893_v7, %v1809_v0  ;;  %v1952_v50 = vadd.f32 %v1929_v37, %v1852_v46  ;;  %v1755_v55 = vadd.f32 %v5470_v13, %v1647_v12  ;;  %v5471_v0 = vld [vmem:[#allocation81_spill] sm:$0xff] }
 0x442   : > { %2524 = vrot.lane.b32.xlu1 %v2508_v14, %s3168_s20  ;;  %2526 = vrot.lane.b32.xlu0 %v2509_v44, %s3168_s20  ;;  %v1756_v30 = vadd.f32 %v5471_v0, %v1648_v9  ;;  %v4846_v7 = vld [vmem:[#allocation2 + $0x34] sm:$0xff]  ;;  %v4848_v37 = vld [vmem:[#allocation2 + $0x3c] sm:$0xff]  ;;  %v5472_v14 = vld [vmem:[#allocation91_spill] sm:$0xff] }
 0x443   : > { %v4831_v57 = vadd.f32 %v1977_v33, %v1909_v38  ;;  %v4834_v3 = vadd.f32 %v4706_v48, %v1952_v50  ;;  %v1649_v44 = vadd.f32 %v5472_v14, %v1541_v58  ;;  %v5473_v33 = vld [vmem:[#allocation59_spill] sm:$0xff]  ;;  %v1855_v41 = vadd.f32 %v5474_v35, %v1755_v55  ;;  %v5476_v9 = vld [vmem:[#allocation69_spill] sm:$0xff] }
 0x444   : > { %v1931_v31 = vpop.permute.xlu1 %1930  ;;  %v1933_v11 = vpop.permute.xlu0 %1932  ;;  %v1650_v52 = vadd.f32 %v5473_v33, %v1542_v25  ;;  %v1856_v17 = vadd.f32 %v5475_v47, %v1756_v30  ;;  %v2512_v58 = vmul.f32 %v4775_v56, %v4846_v7  ;;  %v2513_v49 = vmul.f32 %v4775_v56, %v4848_v37 }
 0x445   : > { %v1953_v48 = vadd.f32 %v1931_v31, %v1853_v45  ;;  %v1954_v46 = vadd.f32 %v1933_v11, %v1854_v59  ;;  %v1757_v25 = vadd.f32 %v5476_v9, %v1649_v44  ;;  %v4872_v31 = vld [vmem:[#allocation2 + $0x4c] sm:$0xff]  ;;  %v4874_v11 = vld [vmem:[#allocation2 + $0x54] sm:$0xff]  ;;  %v1993_v14 = vmul.f32 %v4685_v2, %v4520_v60 }
 0x446   : > { %2528 = vrot.lane.b32.xlu1 %v2510_v28, %s3168_s20  ;;  %2530 = vrot.lane.b32.xlu0 %v2511_v32, %s3168_s20  ;;  %v1758_v45 = vadd.f32 %v5477_v6, %v1650_v52  ;;  %v5478_v28 = vld [vmem:[#allocation68_spill] sm:$0xff]  ;;  %v5481_v44 = vld [vmem:[#allocation63_spill] sm:$0xff]  ;;  %v1994_v35 = vmul.f32 %v4685_v2, %v4522_v18 }
 0x447   : > { %v4858_v38 = vadd.f32 %v1989_v34, %v1953_v48  ;;  %v4860_v50 = vadd.f32 %v1990_v5, %v1954_v46  ;;  %v1651_v32 = vadd.f32 %v5478_v28, %v1543_v23  ;;  %v1857_v34 = vadd.f32 %v5479_v36, %v1757_v25  ;;  %v5480_v5 = vld [vmem:[#allocation66_spill] sm:$0xff]  ;;  %v5483_v60 = vld [vmem:[#allocation51_spill] sm:$0xff] }
 0x448   : > { %v1935_v39 = vpop.permute.xlu1 %1934  ;;  %v1937_v12 = vpop.permute.xlu0 %1936  ;;  %v1858_v62 = vadd.f32 %v5480_v5, %v1758_v45  ;;  %v2514_v48 = vmul.f32 %v4775_v56, %v4872_v31  ;;  %v2515_v46 = vmul.f32 %v4775_v56, %v4874_v11  ;;  %v2217_v45 = vmul.f32 %v5483_v60, %v4620_v24 }
 0x449   : > { %v1955_v27 = vadd.f32 %v1935_v39, %v1855_v41  ;;  %v1956_v59 = vadd.f32 %v1937_v12, %v1856_v17  ;;  %v1759_v33 = vadd.f32 %v5481_v44, %v1651_v32  ;;  %v5482_v41 = vld [vmem:[#allocation106_spill] sm:$0xff]  ;;  %v2219_v28 = vmul.f32 %v5483_v60, %v4632_v51 }
 0x44a   : > { %2532 = vrot.lane.b32.xlu1 %v2512_v58, %s3168_s20  ;;  %2534 = vrot.lane.b32.xlu0 %v2513_v49, %s3168_s20  ;;  %v2215_v58 = vmul.f32 %v5483_v60, %v4608_v26  ;;  %v2216_v49 = vmul.f32 %v5483_v60, %v4610_v29  ;;  %v2220_v32 = vmul.f32 %v5483_v60, %v4634_v61 }
 0x44b   : > { %v4881_v13 = vadd.f32 %v1991_v40, %v1955_v27  ;;  %v4883_v55 = vadd.f32 %v1992_v53, %v1956_v59  ;;  %v1859_v47 = vadd.f32 %v5482_v41, %v1759_v33  ;;  %v1995_v53 = vmul.f32 %v4685_v2, %v5463_v63 }
 0x44c   : > { %v1939_v0 = vpop.permute.xlu1 %1938  ;;  %v1941_v30 = vpop.permute.xlu0 %1940  ;;  %v2218_v27 = vmul.f32 %v5483_v60, %v4622_v21 }
 0x44d   : > { %v1957_v52 = vadd.f32 %v1939_v0, %v1857_v34  ;;  %v1958_v23 = vadd.f32 %v1941_v30, %v1858_v62  ;;  %v5484_v62 = vld [vmem:[#allocation108_spill] sm:$0xff] }
 0x44e   : > { %2536 = vrot.lane.b32.xlu1 %v2514_v48, %s3168_s20  ;;  %2538 = vrot.lane.b32.xlu0 %v2515_v46, %s3168_s20 }
 0x44f   : > { %v4897_v17 = vadd.f32 %v1993_v14, %v1957_v52  ;;  %v4899_v39 = vadd.f32 %v1994_v35, %v1958_v23 }
 0x450   : > { %v1943_v56 = vpop.permute.xlu1 %1942  ;;  %v2023_v12 = vpop.permute.xlu0 %2022 }
 0x451   : > { %v1959_v40 = vadd.f32 %v1943_v56, %v1859_v47  ;;  %v4906_v18 = vadd.f32 %v2023_v12, %v4734_v20 }
 0x452   : > { %2232 = vrot.lane.b32.xlu1 %v2215_v58, %s3171_s9  ;;  %2234 = vrot.lane.b32.xlu0 %v2216_v49, %s3171_s9 }
 0x453   : > { %v4912_v9 = vadd.f32 %v1995_v53, %v1959_v40 }
 0x454   : > { %v2025_v25 = vpop.permute.xlu1 %2024  ;;  %v2027_v6 = vpop.permute.xlu0 %2026 }
 0x455   : > { %v4919_v20 = vadd.f32 %v2025_v25, %v4754_v10  ;;  %v4922_v59 = vadd.f32 %v2027_v6, %v4756_v15  ;;  %v2313_v15 = vstv %s2875_s26 }
 0x456   : > { %2236 = vrot.lane.b32.xlu1 %v2217_v45, %s3171_s9  ;;  %2238 = vrot.lane.b32.xlu0 %v2218_v27, %s3171_s9  ;;  %v2314_v0 = vmul.f32 %v2313_v15, %v5484_v62  ;;  %v2315_v14 = vmul.f32 %v2313_v15, %v4608_v26  ;;  %v2316_v44 = vmul.f32 %v2313_v15, %v4610_v29 }
 0x457   : > { %v2317_v23 = vmul.f32 %v2313_v15, %v4620_v24  ;;  %v2318_v35 = vmul.f32 %v2313_v15, %v4622_v21  ;;  %v2319_v41 = vmul.f32 %v2313_v15, %v4632_v51  ;;  %v2320_v47 = vmul.f32 %v2313_v15, %v4634_v61 }
 0x458   : > { %v2029_v2 = vpop.permute.xlu1 %2028  ;;  %v2031_v63 = vpop.permute.xlu0 %2030  ;;  %v2321_v12 = vmul.f32 %v2313_v15, %v4364_v19 }
 0x459   : > { %v4931_v36 = vadd.f32 %v2029_v2, %v4779_v42  ;;  %v4934_v10 = vadd.f32 %v2031_v63, %v4781_v4  ;;  %v5485_v42 = vld [vmem:[#allocation78_spill] sm:$0xff] }
 0x45a   : > { %2240 = vrot.lane.b32.xlu1 %v2219_v28, %s3171_s9  ;;  %2242 = vrot.lane.b32.xlu0 %v2220_v32, %s3171_s9 }
 0x45c   : > { %v2033_v34 = vpop.permute.xlu1 %2032  ;;  %v2035_v5 = vpop.permute.xlu0 %2034 }
 0x45d   : > { %v4940_v30 = vadd.f32 %v2033_v34, %v4805_v22  ;;  %v4943_v48 = vadd.f32 %v2035_v5, %v4807_v8 }
 0x45e   : > { %2244 = vrot.lane.b32.xlu1 %v5485_v42, %s3171_s9  ;;  %2330 = vrot.lane.b32.xlu0 %v2314_v0, %s3172_s6 }
 0x460   : > { %v2037_v4 = vpop.permute.xlu1 %2036  ;;  %v2073_v46 = vpop.permute.xlu0 %2072 }
 0x461   : > { %v4951_v33 = vadd.f32 %v2037_v4, %v4831_v57  ;;  %v4954_v22 = vadd.f32 %v2073_v46, %v4834_v3 }
 0x462   : > { %2332 = vrot.lane.b32.xlu1 %v2315_v14, %s3172_s6  ;;  %2334 = vrot.lane.b32.xlu0 %v2316_v44, %s3172_s6 }
 0x464   : > { %v2075_v8 = vpop.permute.xlu1 %2074  ;;  %v2077_v52 = vpop.permute.xlu0 %2076 }
 0x465   : > { %v4961_v26 = vadd.f32 %v2075_v8, %v4858_v38  ;;  %v4964_v29 = vadd.f32 %v2077_v52, %v4860_v50  ;;  %v2457_v38 = vstv %s2879_s23 }
 0x466   : > { %2336 = vrot.lane.b32.xlu1 %v2317_v23, %s3172_s6  ;;  %2338 = vrot.lane.b32.xlu0 %v2318_v35, %s3172_s6  ;;  %v2458_v60 = vmul.f32 %v2457_v38, %v4793_v16  ;;  %v2459_v58 = vmul.f32 %v2457_v38, %v4795_v1  ;;  %v2460_v49 = vmul.f32 %v2457_v38, %v4819_v43 }
 0x467   : > { %v2461_v53 = vmul.f32 %v2457_v38, %v4821_v54  ;;  %v2462_v25 = vmul.f32 %v2457_v38, %v4846_v7  ;;  %v2463_v27 = vmul.f32 %v2457_v38, %v4848_v37  ;;  %v2464_v2 = vmul.f32 %v2457_v38, %v4872_v31 }
 0x468   : > { %v2079_v57 = vpop.permute.xlu1 %2078  ;;  %v2081_v3 = vpop.permute.xlu0 %2080  ;;  %v2465_v15 = vmul.f32 %v2457_v38, %v4874_v11 }
 0x469   : > { %v4971_v24 = vadd.f32 %v2079_v57, %v4881_v13  ;;  %v4974_v21 = vadd.f32 %v2081_v3, %v4883_v55 }
 0x46a   : > { %2340 = vrot.lane.b32.xlu1 %v2319_v41, %s3172_s6  ;;  %2342 = vrot.lane.b32.xlu0 %v2320_v47, %s3172_s6 }
 0x46c   : > { %v2083_v50 = vpop.permute.xlu1 %2082  ;;  %v2085_v56 = vpop.permute.xlu0 %2084 }
 0x46d   : > { %v4981_v51 = vadd.f32 %v2083_v50, %v4897_v17  ;;  %v4984_v61 = vadd.f32 %v2085_v56, %v4899_v39 }
 0x46e   : > { %2344 = vrot.lane.b32.xlu1 %v2321_v12, %s3172_s6  ;;  %2474 = vrot.lane.b32.xlu0 %v2458_v60, %s3168_s20 }
 0x470   : > { %v2087_v13 = vpop.permute.xlu1 %2086  ;;  %v2123_v55 = vpop.permute.xlu0 %2122 }
 0x471   : > { %v4991_v19 = vadd.f32 %v2087_v13, %v4912_v9  ;;  %v2146_v40 = vadd.f32 %v2123_v55, %v4906_v18 }
 0x472   : > { %2476 = vrot.lane.b32.xlu1 %v2459_v58, %s3168_s20  ;;  %2478 = vrot.lane.b32.xlu0 %v2460_v49, %s3168_s20 }
 0x474   : > { %v2125_v17 = vpop.permute.xlu1 %2124  ;;  %v2127_v39 = vpop.permute.xlu0 %2126 }
 0x475   : > { %v4999_v6 = vadd.f32 %v2125_v17, %v4919_v20  ;;  %v5002_v45 = vadd.f32 %v2127_v39, %v4922_v59  ;;  %v2557_v20 = vstv %s2881_s7 }
 0x476   : > { %2480 = vrot.lane.b32.xlu1 %v2461_v53, %s3168_s20  ;;  %2482 = vrot.lane.b32.xlu0 %v2462_v25, %s3168_s20  ;;  %v2558_v34 = vmul.f32 %v2557_v20, %v4793_v16  ;;  %v2559_v0 = vmul.f32 %v2557_v20, %v4795_v1  ;;  %v2560_v42 = vmul.f32 %v2557_v20, %v4819_v43 }
 0x477   : > { %v2561_v46 = vmul.f32 %v2557_v20, %v4821_v54  ;;  %v2562_v14 = vmul.f32 %v2557_v20, %v4846_v7  ;;  %v2563_v52 = vmul.f32 %v2557_v20, %v4848_v37  ;;  %v2565_v57 = vmul.f32 %v2557_v20, %v4874_v11 }
 0x478   : > { %v2129_v18 = vpop.permute.xlu1 %2128  ;;  %v2131_v9 = vpop.permute.xlu0 %2130 }
 0x479   : > { %v5009_v63 = vadd.f32 %v2129_v18, %v4931_v36  ;;  %v5012_v28 = vadd.f32 %v2131_v9, %v4934_v10 }
 0x47a   : > { %2484 = vrot.lane.b32.xlu1 %v2463_v27, %s3168_s20  ;;  %2486 = vrot.lane.b32.xlu0 %v2464_v2, %s3168_s20 }
 0x47c   : > { %v2133_v59 = vpop.permute.xlu1 %2132  ;;  %v2135_v32 = vpop.permute.xlu0 %2134 }
 0x47d   : > { %v5019_v5 = vadd.f32 %v2133_v59, %v4940_v30  ;;  %v5022_v36 = vadd.f32 %v2135_v32, %v4943_v48 }
 0x47e   : > { %2488 = vrot.lane.b32.xlu1 %v2465_v15, %s3168_s20  ;;  %2574 = vrot.lane.b32.xlu0 %v2558_v34, %s3169_s30  ;;  %s2878_s20 = sld [smem:[#allocation7 + $0x201]] }
 0x480   : > { %v2137_v10 = vpop.permute.xlu1 %2136  ;;  %v2181_v62 = vpop.permute.xlu0 %2180 }
 0x481   : > { %v5029_v4 = vadd.f32 %v2137_v10, %v4951_v33  ;;  %v2564_v33 = vmul.f32 %v2557_v20, %v4872_v31  ;;  %v2204_v49 = vadd.f32 %v2181_v62, %v4954_v22 }
 0x482   : > { %2576 = vrot.lane.b32.xlu1 %v2559_v0, %s3169_s30  ;;  %2578 = vrot.lane.b32.xlu0 %v2560_v42, %s3169_s30 }
 0x484   : > { %v2183_v30 = vpop.permute.xlu1 %2182  ;;  %v2185_v48 = vpop.permute.xlu0 %2184  ;;  %v2439_v39 = vstv %s2878_s20 }
 0x485   : > { %v2205_v17 = vadd.f32 %v2183_v30, %v4961_v26  ;;  %v2441_v27 = vmul.f32 %v2439_v39, %v4795_v1  ;;  %v2206_v2 = vadd.f32 %v2185_v48, %v4964_v29  ;;  %v2442_v0 = vmul.f32 %v2439_v39, %v4819_v43 }
 0x486   : > { %2580 = vrot.lane.b32.xlu1 %v2561_v46, %s3169_s30  ;;  %2582 = vrot.lane.b32.xlu0 %v2562_v14, %s3169_s30  ;;  %v2443_v42 = vmul.f32 %v2439_v39, %v4821_v54 }
 0x488   : > { %v2187_v44 = vpop.permute.xlu1 %2186  ;;  %v2189_v8 = vpop.permute.xlu0 %2188 }
 0x489   : > { %v2207_v20 = vadd.f32 %v2187_v44, %v4971_v24  ;;  %v2208_v30 = vadd.f32 %v2189_v8, %v4974_v21 }
 0x48a   : > { %2584 = vrot.lane.b32.xlu1 %v2563_v52, %s3169_s30  ;;  %2586 = vrot.lane.b32.xlu0 %v2564_v33, %s3169_s30 }
 0x48c   : > { %v2191_v23 = vpop.permute.xlu1 %2190  ;;  %v2193_v35 = vpop.permute.xlu0 %2192 }
 0x48d   : > { %v2209_v46 = vadd.f32 %v2191_v23, %v4981_v51 }
 0x48e   : > { %2588 = vrot.lane.b32.xlu1 %v2565_v57, %s3169_s30  ;;  %s2895_s30 = sshll.u32 %s3223_s19, 10 }
 0x48f   : > { %s5069_s10 = scalar_lea.hbm %s5197_s3, %s2895_s30 }
 0x490   : > { %v2195_v3 = vpop.permute.xlu1 %2194  ;;  %v2231_v41 = vpop.permute.xlu0 %2230 }
 0x491   : > { %v5043_v47 = vadd.f32 %v2231_v41, %v2146_v40  ;;  %v2440_v40 = vmul.f32 %v2439_v39, %v4793_v16  ;;  %v2444_v41 = vmul.f32 %v2439_v39, %v4846_v7 }
 0x494   : > { %v2281_v38 = vpop.permute.xlu1 %2280  ;;  %v2283_v50 = vpop.permute.xlu0 %2282 }
 0x495   : > { %v2304_v53 = vadd.f32 %v2281_v38, %v2204_v49  ;;  %v2305_v25 = vadd.f32 %v2283_v50, %v2205_v17  ;;  %v2445_v38 = vmul.f32 %v2439_v39, %v4848_v37  ;;  %v2210_v50 = vadd.f32 %v2193_v35, %v4984_v61 }
 0x498   : > { %v2285_v56 = vpop.permute.xlu1 %2284  ;;  %v2287_v12 = vpop.permute.xlu0 %2286 }
 0x499   : > { %v2306_v15 = vadd.f32 %v2285_v56, %v2206_v2  ;;  %v2307_v34 = vadd.f32 %v2287_v12, %v2207_v20  ;;  %v2211_v56 = vadd.f32 %v2195_v3, %v4991_v19 }
 0x49c   : > { %v2289_v60 = vpop.permute.xlu1 %2288  ;;  %v2291_v13 = vpop.permute.xlu0 %2290 }
 0x49d   : > { %v2308_v48 = vadd.f32 %v2289_v60, %v2208_v30  ;;  %v2309_v24 = vadd.f32 %v2291_v13, %v2209_v46 }
 0x4a0   : > { %v2293_v55 = vpop.permute.xlu1 %2292  ;;  %v2295_v58 = vpop.permute.xlu0 %2294 }
 0x4a1   : > { %v2310_v8 = vadd.f32 %v2293_v55, %v2210_v50  ;;  %v2311_v51 = vadd.f32 %v2295_v58, %v2211_v56 }
 0x4a4   : > { %v2381_v18 = vpop.permute.xlu1 %2380  ;;  %v2383_v9 = vpop.permute.xlu0 %2382 }
 0x4a5   : > { %v2404_v59 = vadd.f32 %v2381_v18, %v2304_v53  ;;  %v2405_v32 = vadd.f32 %v2383_v9, %v2305_v25  ;;  %v2446_v25 = vmul.f32 %v2439_v39, %v4872_v31  ;;  %v2447_v18 = vmul.f32 %v2439_v39, %v4874_v11 }
 0x4a7   : > { %v2448_v22 = vadd.f32 %v2440_v40, %v2404_v59  ;;  %v2449_v10 = vadd.f32 %v2441_v27, %v2405_v32 }
 0x4a8   : > { %v2385_v26 = vpop.permute.xlu1 %2384  ;;  %v2387_v62 = vpop.permute.xlu0 %2386 }
 0x4a9   : > { %v2406_v14 = vadd.f32 %v2385_v26, %v2306_v15  ;;  %v2407_v29 = vadd.f32 %v2387_v62, %v2307_v34 }
 0x4ab   : > { %v2450_v44 = vadd.f32 %v2442_v0, %v2406_v14  ;;  %v2451_v52 = vadd.f32 %v2443_v42, %v2407_v29 }
 0x4ac   : > { %v2389_v33 = vpop.permute.xlu1 %2388  ;;  %v2391_v57 = vpop.permute.xlu0 %2390 }
 0x4ad   : > { %v2408_v12 = vadd.f32 %v2389_v33, %v2308_v48  ;;  %v2409_v21 = vadd.f32 %v2391_v57, %v2309_v24 }
 0x4af   : > { %v2452_v23 = vadd.f32 %v2444_v41, %v2408_v12  ;;  %v2453_v49 = vadd.f32 %v2445_v38, %v2409_v21 }
 0x4b0   : > { %v2393_v60 = vpop.permute.xlu1 %2392  ;;  %v2395_v13 = vpop.permute.xlu0 %2394 }
 0x4b1   : > { %v2410_v17 = vadd.f32 %v2393_v60, %v2310_v8  ;;  %v2411_v53 = vadd.f32 %v2395_v13, %v2311_v51 }
 0x4b3   : > { %v2454_v61 = vadd.f32 %v2446_v25, %v2410_v17  ;;  %v2455_v35 = vadd.f32 %v2447_v18, %v2411_v53 }
 0x4b4   : > { %v2525_v19 = vpop.permute.xlu1 %2524  ;;  %v2527_v3 = vpop.permute.xlu0 %2526 }
 0x4b5   : > { %v2548_v9 = vadd.f32 %v2525_v19, %v2448_v22  ;;  %v2549_v55 = vadd.f32 %v2527_v3, %v2449_v10 }
 0x4b7   : > { %2614 = vrot.lane.b32.xlu0 %v2548_v9, %s3171_s9  ;;  %2616 = vrot.lane.b32.xlu1 %v2549_v55, %s3171_s9 }
 0x4b8   : > { %v2529_v58 = vpop.permute.xlu1 %2528  ;;  %v2531_v40 = vpop.permute.xlu0 %2530 }
 0x4b9   : > { %v2550_v27 = vadd.f32 %v2529_v58, %v2450_v44  ;;  %v2551_v2 = vadd.f32 %v2531_v40, %v2451_v52 }
 0x4bb   : > { %2618 = vrot.lane.b32.xlu0 %v2550_v27, %s3171_s9  ;;  %2620 = vrot.lane.b32.xlu1 %v2551_v2, %s3171_s9 }
 0x4bc   : > { %v2533_v39 = vpop.permute.xlu1 %2532  ;;  %v2535_v20 = vpop.permute.xlu0 %2534 }
 0x4bd   : > { %3066 = shalt.err (!%p3063_p9)
}
 0x4be   : > { %s3067_s26 = scalar_lea.hbm %s5069_s10, 1024  ;;  %s3071_s20 = scalar_lea.hbm %s5197_s3, 2048 }
 0x4bf   : > { %p3068_p1 = scmp.ne.s32.totalorder %s5069_s10, %s3067_s26  ;;  %p3072_p12 = scmp.lt.u32.totalorder %s5069_s10, %s5197_s3 }
 0x4c0   : > { %p3073_p13 = scmp.lt.u32.totalorder %s3071_s20, %s3067_s26  ;;  %p3075_p0 = scmp.lt.u32.totalorder %s3067_s26, %s5069_s10 }
 0x4c1   : > { %p3069_p2 = pnand %p3068_p1, %p5486_p3 }
 0x4c2   : > { %p3074_p7 = por %p3073_p13, %p3072_p12 }
 0x4c3   : > { %p3070_p11 = pneg %p3069_p2 }
 0x4c4   : > { %p3076_p6 = por %p3075_p0, %p3074_p7 }
 0x4c6   : > { %p3077_p4 = pnand %p3076_p6, %p3070_p11 }
 0x4c8   : > { %3080 = shalt.err (!%p3077_p4)
}
 0x4c9   : > { %s3174_s14 = smov 128   ;;  %s3175_s25 = smov 8   ;;  %v2552_v59 = vadd.f32 %v2533_v39, %v2452_v23  ;;  %v2553_v32 = vadd.f32 %v2535_v20, %v2453_v49  ;;  %v2537_v15 = vpop.permute.xlu1 %2536  ;;  %v2539_v34 = vpop.permute.xlu0 %2538 }
 0x4ca   : > { %2908 = dma.vmem_to_hbm [thread:$0]  (%p5486_p3), %s5072_s29, 1024, %s5069_s10, %s2655_s11, %s3174_s14, %s3174_s14, %s3175_s25   ;;  %v2554_v22 = vadd.f32 %v2537_v15, %v2454_v61  ;;  %v2555_v10 = vadd.f32 %v2539_v34, %v2455_v35 }
 0x4cb   : > { %2622 = vrot.lane.b32.xlu0 %v2552_v59, %s3171_s9  ;;  %2624 = vrot.lane.b32.xlu1 %v2553_v32, %s3171_s9  ;;  %s2877_s22 = sld [smem:[#allocation7 + $0x200]]  ;;  %s5141_s11 = scalar_lea.hbm %s5198_s4, %s2895_s30 }
 0x4cc   : > { %s2660_s12 = scalar_lea.sflag [#allocation12], %s3361_s13  ;;  %s3176_s19 = smov [#allocation11]  }
 0x4cd   : > { %v2233_v26 = vpop.permute.xlu1 %2232  ;;  %v2235_v62 = vpop.permute.xlu0 %2234  ;;  %s3085_s23 = sshll.u32 %s3176_s19, 4  ;;  %s3086_s23 = int_to_ptr.vmem [resolvable:$false] %s3085_s23 }
 0x4ce   : > { %v2255_v52 = vadd.f32 %v2233_v26, %v4999_v6  ;;  %v2256_v33 = vadd.f32 %v2235_v62, %v5002_v45  ;;  %s3087_s30 = scalar_lea.vmem %s3086_s23, 2048 }
 0x4cf   : > { %2626 = vrot.lane.b32.xlu0 %v2554_v22, %s3171_s9  ;;  %2628 = vrot.lane.b32.xlu1 %v2555_v10, %s3171_s9  ;;  %s2691_s9 = sshll.u32 %s3373_s5, 4  ;;  %s5143_s9 = int_to_ptr.vmem [resolvable:$true] %s2691_s9 }
 0x4d0   : > { %s3081_s26 = scalar_lea.vmem %s5143_s9, 1024  ;;  %p3088_p9 = scmp.lt.s32.totalorder %s5143_s9, %s3086_s23 }
 0x4d1   : > { %v2237_v0 = vpop.permute.xlu1 %2236  ;;  %v2239_v42 = vpop.permute.xlu0 %2238  ;;  %v2421_v14 = vstv %s2877_s22  ;;  %p3082_p10 = scmp.ne.s32.totalorder %s5143_s9, %s3081_s26  ;;  %p3089_p1 = scmp.lt.s32.totalorder %s3087_s30, %s3081_s26 }
 0x4d2   : > { %v2422_v44 = vmul.f32 %v2421_v14, %v4793_v16  ;;  %v2423_v12 = vmul.f32 %v2421_v14, %v4795_v1  ;;  %v2424_v21 = vmul.f32 %v2421_v14, %v4819_v43  ;;  %v2257_v8 = vadd.f32 %v2237_v0, %v5009_v63 }
 0x4d3   : > { %v2258_v51 = vadd.f32 %v2239_v42, %v5012_v28  ;;  %v2425_v45 = vmul.f32 %v2421_v14, %v4821_v54  ;;  %v2426_v13 = vmul.f32 %v2421_v14, %v4846_v7  ;;  %v2427_v61 = vmul.f32 %v2421_v14, %v4848_v37  ;;  %p3083_p8 = pnand %p3082_p10, %p5486_p3  ;;  %p3090_p2 = por %p3089_p1, %p3088_p9 }
 0x4d4   : > { %v2428_v35 = vmul.f32 %v2421_v14, %v4872_v31 }
 0x4d5   : > { %v2241_v30 = vpop.permute.xlu1 %2240  ;;  %v2243_v46 = vpop.permute.xlu0 %2242  ;;  %p3084_p5 = pneg %p3083_p8 }
 0x4d6   : > { %v2259_v17 = vadd.f32 %v2241_v30, %v5019_v5  ;;  %v2260_v1 = vadd.f32 %v2243_v46, %v5022_v36  ;;  %v2429_v5 = vmul.f32 %v2421_v14, %v4874_v11 }
 0x4d7   : > { %p3091_p11 = pnand %p3090_p2, %p3084_p5 }
 0x4d9   : > { %v2245_v29 = vpop.permute.xlu1 %2244  ;;  %v2331_v48 = vpop.permute.xlu0 %2330 }
 0x4da   : > { %v2354_v24 = vadd.f32 %v2331_v48, %v5043_v47  ;;  %v2261_v19 = vadd.f32 %v2245_v29, %v5029_v4 }
 0x4dc   : > { %v2430_v57 = vadd.f32 %v2422_v44, %v2354_v24 }
 0x4dd   : > { %v2333_v41 = vpop.permute.xlu1 %2332  ;;  %v2335_v38 = vpop.permute.xlu0 %2334 }
 0x4de   : > { %v2355_v50 = vadd.f32 %v2333_v41, %v2255_v52  ;;  %v2356_v56 = vadd.f32 %v2335_v38, %v2256_v33 }
 0x4e0   : > { %v2431_v47 = vadd.f32 %v2423_v12, %v2355_v50  ;;  %v2432_v23 = vadd.f32 %v2424_v21, %v2356_v56 }
 0x4e1   : > { %v2337_v16 = vpop.permute.xlu1 %2336  ;;  %v2339_v49 = vpop.permute.xlu0 %2338 }
 0x4e2   : > { %v2357_v6 = vadd.f32 %v2337_v16, %v2257_v8  ;;  %v2358_v60 = vadd.f32 %v2339_v49, %v2258_v51 }
 0x4e4   : > { %v2433_v53 = vadd.f32 %v2425_v45, %v2357_v6  ;;  %v2434_v43 = vadd.f32 %v2426_v13, %v2358_v60 }
 0x4e5   : > { %v2341_v25 = vpop.permute.xlu1 %2340  ;;  %v2343_v63 = vpop.permute.xlu0 %2342 }
 0x4e6   : > { %v2359_v18 = vadd.f32 %v2341_v25, %v2259_v17  ;;  %v2360_v28 = vadd.f32 %v2343_v63, %v2260_v1 }
 0x4e8   : > { %v2435_v3 = vadd.f32 %v2427_v61, %v2359_v18  ;;  %v2436_v54 = vadd.f32 %v2428_v35, %v2360_v28 }
 0x4e9   : > { %v2345_v9 = vpop.permute.xlu1 %2344  ;;  %v2475_v36 = vpop.permute.xlu0 %2474 }
 0x4ea   : > { %v2361_v7 = vadd.f32 %v2345_v9, %v2261_v19  ;;  %v2498_v11 = vadd.f32 %v2475_v36, %v2430_v57 }
 0x4ec   : > { %v2437_v55 = vadd.f32 %v2429_v5, %v2361_v7 }
 0x4ed   : > { %v2477_v58 = vpop.permute.xlu1 %2476  ;;  %v2479_v40 = vpop.permute.xlu0 %2478 }
 0x4ee   : > { %v2499_v26 = vadd.f32 %v2477_v58, %v2431_v47  ;;  %v2500_v46 = vadd.f32 %v2479_v40, %v2432_v23 }
 0x4f1   : > { %v2481_v27 = vpop.permute.xlu1 %2480  ;;  %v2483_v2 = vpop.permute.xlu0 %2482 }
 0x4f2   : > { %v2501_v14 = vadd.f32 %v2481_v27, %v2433_v53  ;;  %v2502_v57 = vadd.f32 %v2483_v2, %v2434_v43 }
 0x4f5   : > { %v2485_v39 = vpop.permute.xlu1 %2484  ;;  %v2487_v20 = vpop.permute.xlu0 %2486 }
 0x4f6   : > { %v2503_v41 = vadd.f32 %v2485_v39, %v2435_v3  ;;  %v2504_v51 = vadd.f32 %v2487_v20, %v2436_v54 }
 0x4f9   : > { %v2489_v59 = vpop.permute.xlu1 %2488  ;;  %v2575_v37 = vpop.permute.xlu0 %2574 }
 0x4fa   : > { %v2598_v62 = vadd.f32 %v2575_v37, %v2498_v11  ;;  %v2505_v47 = vadd.f32 %v2489_v59, %v2437_v55 }
 0x4fd   : > { %v2577_v32 = vpop.permute.xlu1 %2576  ;;  %v2579_v31 = vpop.permute.xlu0 %2578 }
 0x4fe   : > { %v2599_v0 = vadd.f32 %v2577_v32, %v2499_v26  ;;  %v2600_v24 = vadd.f32 %v2579_v31, %v2500_v46 }
 0x501   : > { %v2581_v15 = vpop.permute.xlu1 %2580  ;;  %v2583_v4 = vpop.permute.xlu0 %2582 }
 0x502   : > { %v2601_v44 = vadd.f32 %v2581_v15, %v2501_v14  ;;  %v2602_v56 = vadd.f32 %v2583_v4, %v2502_v57 }
 0x505   : > { %v2585_v34 = vpop.permute.xlu1 %2584  ;;  %v2587_v22 = vpop.permute.xlu0 %2586 }
 0x506   : > { %v2603_v12 = vadd.f32 %v2585_v34, %v2503_v41  ;;  %v2604_v49 = vadd.f32 %v2587_v22, %v2504_v51 }
 0x509   : > { %v2589_v10 = vpop.permute.xlu1 %2588 }
 0x50a   : > { %v2605_v6 = vadd.f32 %v2589_v10, %v2505_v47 }
 0x529   : > { %v2617_v42 = vpop.permute.xlu1 %2616  ;;  %v2615_v30 = vpop.permute.xlu0 %2614 }
 0x52a   : > { %v2639_v29 = vadd.f32 %v2617_v42, %v2599_v0  ;;  %v2638_v48 = vadd.f32 %v2615_v30, %v2598_v62 }
 0x52c   : > { %2647 = vst.msk [vmem:[%s3373_s5 + $0x8] sm:$0xff] %vm1459_vm3, %v2639_v29  ;;  %2646 = vst.msk [vmem:[%s3373_s5] sm:$0xff] %vm1459_vm3, %v2638_v48 }
 0x52d   : > { %v2621_v52 = vpop.permute.xlu1 %2620  ;;  %v2619_v33 = vpop.permute.xlu0 %2618 }
 0x52e   : > { %v2641_v38 = vadd.f32 %v2621_v52, %v2601_v44  ;;  %v2640_v50 = vadd.f32 %v2619_v33, %v2600_v24 }
 0x530   : > { %2649 = vst.msk [vmem:[%s3373_s5 + $0x18] sm:$0xff] %vm1459_vm3, %v2641_v38  ;;  %2648 = vst.msk [vmem:[%s3373_s5 + $0x10] sm:$0xff] %vm1459_vm3, %v2640_v50 }
 0x53d   : > { %v2625_v21 = vpop.permute.xlu1 %2624  ;;  %v2623_v8 = vpop.permute.xlu0 %2622 }
 0x53e   : > { %v2643_v23 = vadd.f32 %v2625_v21, %v2603_v12  ;;  %v2642_v16 = vadd.f32 %v2623_v8, %v2602_v56 }
 0x540   : > { %2651 = vst.msk [vmem:[%s3373_s5 + $0x28] sm:$0xff] %vm1459_vm3, %v2643_v23  ;;  %2650 = vst.msk [vmem:[%s3373_s5 + $0x20] sm:$0xff] %vm1459_vm3, %v2642_v16 }
 0x541   : > { %v2629_v60 = vpop.permute.xlu1 %2628  ;;  %v2627_v45 = vpop.permute.xlu0 %2626 }
 0x542   : > { %v2645_v13 = vadd.f32 %v2629_v60, %v2605_v6  ;;  %v2644_v17 = vadd.f32 %v2627_v45, %v2604_v49 }
 0x544   : > { %2653 = vst.msk [vmem:[%s3373_s5 + $0x38] sm:$0xff] %vm1459_vm3, %v2645_v13  ;;  %2652 = vst.msk [vmem:[%s3373_s5 + $0x30] sm:$0xff] %vm1459_vm3, %v2644_v17 }
 0x545   : > { %3094 = shalt.err (!%p3091_p11)
}
 0x546   : > { %s3095_s5 = scalar_lea.hbm %s5141_s11, 1024  ;;  %s3099_s6 = scalar_lea.hbm %s5198_s4, 2048 }
 0x547   : > { %p3096_p12 = scmp.ne.s32.totalorder %s5141_s11, %s3095_s5  ;;  %p3100_p0 = scmp.lt.u32.totalorder %s5141_s11, %s5198_s4 }
 0x548   : > { %p3101_p6 = scmp.lt.u32.totalorder %s3099_s6, %s3095_s5  ;;  %p3103_p10 = scmp.lt.u32.totalorder %s3095_s5, %s5141_s11 }
 0x549   : > { %p3097_p13 = pnand %p3096_p12, %p5486_p3 }
 0x54a   : > { %p3102_p4 = por %p3101_p6, %p3100_p0 }
 0x54b   : > { %p3098_p7 = pneg %p3097_p13 }
 0x54c   : > { %p3104_p8 = por %p3103_p10, %p3102_p4 }
 0x54e   : > { %p3105_p5 = pnand %p3104_p8, %p3098_p7 }
 0x550   : > { %3108 = shalt.err (!%p3105_p5)
}
 0x551   : > { %2909 = dma.vmem_to_hbm [thread:$0]  (%p5486_p3), %s5143_s9, 1024, %s5141_s11, %s2660_s12, %s3174_s14, %s3174_s14, %s3175_s25  }
 0x552 PF: > { %s2706_s10 = sand.u32 1, %s3147_s15   ;;  %p5487_p9 = scmp.ne.s32.totalorder %s5228_s28, 0 }
 0x553   : > { %p5488_p1 = scmp.ge.s32.totalorder %s3159_s18, 2  ;;  %s2707_s29 = scalar_lea.sflag [#allocation5], %s2706_s10 }
 0x555   : > { %p2924_p2 = pnand %p5488_p1, %p5487_p9 }
 0x557   : > { %3138 = dma.done.wait (!%p2924_p2), %s2707_s29, 1024  }
 0x558   : > { %3140 = vsyncadd (!%p2924_p2), %s2707_s29, 4294966272  ;;  %s2716_s27 = scalar_lea.sflag [#allocation12], %s2706_s10 }
 0x559   : > { %3142 = dma.done.wait (!%p2924_p2), %s2716_s27, 1024  }
 0x55a   : > { %3144 = vsyncadd (!%p2924_p2), %s2716_s27, 4294966272  ;;  %p23_p3 = scmp.ge.s32.totalorder %s3227_s21, 4   ;;  %s5489_s15 = smov %s3151_s16 }
 0x55b   : > { %s5490_s16 = smov %s3155_s17  ;;  %s5491_s17 = smov %s3239_s24 }
 0x55c   : > { %s5492_s18 = smov %s3227_s21  ;;  %25 = sbr.rel (!%p23_p3) target bundleno = 9 (0x9), region = 107 }
 0x563   :  { %2721 = vsyncpa [#allocation4], 1 }
 0x564   :  { %2723 = vsyncpa [#allocation4 + $0x1], 1 }
 0x565   :  { %2724 = vsyncpa [#allocation5], 1 }
 0x566   :  { %2726 = vsyncpa [#allocation5 + $0x1], 1 }
 0x567   :  { %2727 = vsyncpa [#allocation12], 1 }
 0x568   :  { %2729 = vsyncpa [#allocation12 + $0x1], 1 }
 0x569   :  { %2730 = vsyncpa [#allocation6], 1 }
 0x56a   :  { %2732 = vsyncpa [#allocation6 + $0x1], 1 }
 0x56b   :  { %2733 = vsyncpa [#allocation8], 1 }

</bundles_post_ra>
